<compile_context>
chip_gen: v7x
topology: tpu7x:2x2x1
jax: 0.10.0
libtpu: 0.0.40
codegen_flags: <defaults>
</compile_context>

<pallas_src>
import math
from functools import partial

import jax
import jax.numpy as jnp
from jax import lax
from jax.experimental import pallas as pl
from jax.experimental.pallas import tpu as pltpu


# ----------------------------- kernels --------------------------------------


def _linear_kernel(x_ref, w_ref, o_ref, *, use_bf16):
    # x_ref: (tm, tk), w_ref: (tn, tk); contract on K (NT layout, no W.T copy).
    k = pl.program_id(2)
    x = x_ref[...]
    w = w_ref[...]
    if use_bf16:
        x = x.astype(jnp.bfloat16)
        w = w.astype(jnp.bfloat16)
    prod = lax.dot_general(
        x, w,
        dimension_numbers=(((1,), (1,)), ((), ())),
        preferred_element_type=jnp.float32,
    )

    @pl.when(k == 0)
    def _():
        o_ref[...] = prod            # overwrite: no dependence on stale VMEM

    @pl.when(k > 0)
    def _():
        o_ref[...] += prod           # f32 accumulate directly in the output block


def _linear_bias_kernel(x_ref, w_ref, b_ref, o_ref, *, use_bf16):
    k = pl.program_id(2)
    x = x_ref[...]
    w = w_ref[...]
    if use_bf16:
        x = x.astype(jnp.bfloat16)
        w = w.astype(jnp.bfloat16)
    prod = lax.dot_general(
        x, w,
        dimension_numbers=(((1,), (1,)), ((), ())),
        preferred_element_type=jnp.float32,
    )

    @pl.when(k == 0)
    def _():
        o_ref[...] = prod

    @pl.when(k > 0)
    def _():
        o_ref[...] += prod

    @pl.when(k == pl.num_programs(2) - 1)
    def _():
        # Bias added exactly once, on the f32 accumulator, broadcast over rows.
        o_ref[...] += b_ref[...].astype(jnp.float32)


# ----------------------------- helpers ---------------------------------------


def _round_up(x, m):
    return (x + m - 1) // m * m


def _cdiv(a, b):
    return -(-a // b)


def prepare_weight(W, *, tk=512):
    """Optionally hoist the K-axis zero-pad of the nn.Linear weight to init time.

    No-op when fin is already a multiple of the (clamped) K tile. The padded
    weight can be passed directly to fcblock_mtx_forward.
    """
    fout, fin = W.shape
    tk_eff = min(tk, _round_up(fin, 128))
    Kp = _round_up(fin, tk_eff)
    if Kp == fin:
        return W
    return jnp.pad(W, ((0, 0), (0, Kp - fin)))


# ----------------------------- wrapper ---------------------------------------


def fcblock_mtx_forward(inp, W, b=None, *, tm=512, tn=512, tk=512, use_bf16=False):
    """Pallas implementation of FCBlock_Mtx.forward (parent-task path).

    inp: (B, fin) float32
    W:   (fout, fin) or (fout, Kp) (pre-padded via prepare_weight) float32
    b:   optional (fout,) float32
    returns (B, fout) == inp @ W.T (+ b)
    """
    B, fin = inp.shape
    fout, fin_w = W.shape
    out_dtype = inp.dtype

    # ---------------- tiny-problem fast path (plain XLA fusion) --------------
    # pallas_call fixed cost (~0.35 us / grid step + pad copies) dwarfs the work
    # for the module's default shapes; XLA fuses this into one MXU/VPU op.
    if fout < 128 or fin < 128 or (2 * B * fin * fout) < 10_000_000:
        W_v = W if fin_w == fin else W[:, :fin]
        out = jnp.dot(inp, W_v.T, preferred_element_type=jnp.float32)
        if b is not None:
            out = out + b.astype(jnp.float32)
        return out.astype(out_dtype)

    # ---------------- tile selection (v7x-safe: <= ~10 MiB working set) ------
    tm = min(tm, _round_up(B, 8))
    tn = min(tn, _round_up(fout, 128))
    tk = min(tk, _round_up(fin, 128))

    # v7x megacore: if the M grid collapses to one block, keep >=2 N blocks so
    # the second TensorCore gets work (no measured effect on 1-TC v5e/v6e).
    n_aligned = _round_up(fout, 128)
    if _cdiv(B, tm) == 1 and _cdiv(n_aligned, tn) == 1 and n_aligned >= 256:
        tn = _round_up(_cdiv(n_aligned, 2), 128)

    Kp = _round_up(fin, tk)

    # Only the K (reduction) axis is zero-padded; partial M/N blocks are masked
    # on writeback by Pallas. Pads are no-ops for tile-aligned fin, and the
    # weight pad can be hoisted to init time via prepare_weight().
    x_p = inp if Kp == fin else jnp.pad(inp, ((0, 0), (0, Kp - fin)))
    if fin_w == Kp:
        w_p = W
    elif fin_w == fin:
        w_p = W if Kp == fin else jnp.pad(W, ((0, 0), (0, Kp - fin)))
    else:
        raise ValueError(f"W fin axis {fin_w} matches neither fin={fin} nor Kp={Kp}")

    grid = (_cdiv(B, tm), _cdiv(fout, tn), Kp // tk)
    gm, gn, _ = grid

    x_item = jnp.dtype(inp.dtype).itemsize
    w_item = jnp.dtype(W.dtype).itemsize
    cost = pl.CostEstimate(
        flops=2 * B * fin * fout,
        transcendentals=0,
        bytes_accessed=(gn * B * Kp * x_item          # x re-streamed per N tile
                        + gm * fout * Kp * w_item     # W re-streamed per M tile
                        + B * fout * 4                # f32 output
                        + (fout * 4 if b is not None else 0)),
    )
    compiler_params = pltpu.CompilerParams(
        dimension_semantics=("parallel", "parallel", "arbitrary"),
        vmem_limit_bytes=32 * 1024 * 1024,  # safe on v7x (64 MiB phys); ~10 MiB used
    )

    # f32 accumulation happens directly in the output block (k-invariant index
    # map keeps it resident across the K axis) -> no VMEM scratch.
    out_shape = jax.ShapeDtypeStruct((B, fout), jnp.float32)

    x_spec = pl.BlockSpec((tm, tk), lambda i, j, k: (i, k))
    w_spec = pl.BlockSpec((tn, tk), lambda i, j, k: (j, k))
    o_spec = pl.BlockSpec((tm, tn), lambda i, j, k: (i, j))

    if b is None:
        out = pl.pallas_call(
            partial(_linear_kernel, use_bf16=use_bf16),
            out_shape=out_shape,
            grid_spec=pltpu.PrefetchScalarGridSpec(
                num_scalar_prefetch=0,
                grid=grid,
                in_specs=[x_spec, w_spec],
                out_specs=o_spec,
            ),
            compiler_params=compiler_params,
            cost_estimate=cost,
        )(x_p, w_p)
    else:
        b2d = b.reshape(1, fout)
        b_spec = pl.BlockSpec((1, tn), lambda i, j, k: (0, j))
        out = pl.pallas_call(
            partial(_linear_bias_kernel, use_bf16=use_bf16),
            out_shape=out_shape,
            grid_spec=pltpu.PrefetchScalarGridSpec(
                num_scalar_prefetch=0,
                grid=grid,
                in_specs=[x_spec, w_spec, b_spec],
                out_specs=o_spec,
            ),
            compiler_params=compiler_params,
            cost_estimate=cost,
        )(x_p, w_p, b2d)

    if out.dtype != out_dtype:
        out = out.astype(out_dtype)
    return out


def xavier_uniform(key, fout, fin, dtype=jnp.float32):
    # torch.nn.init.xavier_uniform_ with gain=1: U(-a, a), a = sqrt(6/(fin+fout))
    a = math.sqrt(6.0 / (fin + fout))
    return jax.random.uniform(key, (fout, fin), dtype=dtype, minval=-a, maxval=a)


if __name__ == "__main__":
    key = jax.random.PRNGKey(0)
    k_w, k_x, k_w2, k_x2 = jax.random.split(key, 4)

    # ---- tiny shapes consistent with the module defaults (XLA fast path) ----
    B, fin, fout = 8, 32, 64
    W = xavier_uniform(k_w, fout, fin)                       # self.fc.weight
    x = jax.random.normal(k_x, (B, fin), dtype=jnp.float32)  # inp

    out = jax.block_until_ready(fcblock_mtx_forward(x, W, None))   # bias=False default
    ref = x @ W.T
    assert out.shape == (B, fout)
    assert jnp.allclose(out, ref, atol=1e-5, rtol=1e-5)

    b = jnp.full((fout,), 0.01, jnp.float32)                 # bias=True path (fill 0.01)
    out_b = jax.block_until_ready(fcblock_mtx_forward(x, W, b))
    assert jnp.allclose(out_b, ref + b, atol=1e-5, rtol=1e-5)

    # ---- larger shapes: Pallas tiled path (partial M/N blocks, K reduction) -
    B2, fin2, fout2 = 300, 1024, 640
    W2 = xavier_uniform(k_w2, fout2, fin2)
    W2p = prepare_weight(W2)                                 # one-time K pad (no-op here)
    x2 = jax.random.normal(k_x2, (B2, fin2), dtype=jnp.float32)
    b2 = jnp.full((fout2,), 0.01, jnp.float32)

    ref2 = jnp.dot(x2, W2.T, precision=lax.Precision.HIGHEST) + b2

    out2 = jax.block_until_ready(fcblock_mtx_forward(x2, W2p, b2))
    assert out2.shape == (B2, fout2)
    assert jnp.allclose(out2, ref2, atol=1e-3, rtol=1e-3)

    out2_nb = jax.block_until_ready(fcblock_mtx_forward(x2, W2p, None))
    assert jnp.allclose(out2_nb, ref2 - b2, atol=1e-3, rtol=1e-3)

    # opt-in bf16 operands (f32 accumulation) -> looser tolerance vs f32 ref
    out2_bf = jax.block_until_ready(fcblock_mtx_forward(x2, W2p, b2, use_bf16=True))
    assert jnp.allclose(out2_bf, ref2, atol=5e-2, rtol=5e-2)

    print("KERNEL_OK")
</pallas_src>

<mosaic_0001>
module attributes {stable_mosaic.version = 11 : i64} {
  func.func @_linear_bias_kernel(%arg0: i32, %arg1: i32, %arg2: i32, %arg3: memref<304x512xf32, #tpu.memory_space<vmem>>, %arg4: memref<512x512xf32, #tpu.memory_space<vmem>>, %arg5: memref<1x512xf32, #tpu.memory_space<vmem>>, %arg6: memref<304x512xf32, #tpu.memory_space<vmem>>) attributes {dimension_semantics = [#tpu.dimension_semantics<parallel>, #tpu.dimension_semantics<parallel>, #tpu.dimension_semantics<arbitrary>], iteration_bounds = array<i64: 1, 2, 2>, scalar_prefetch = 0 : i64, scratch_operands = 0 : i64, tpu.core_type = #tpu.core_type<tc>, window_params = [{transform_indices = @transform_0, window_bounds = array<i64: 304, 512>}, {transform_indices = @transform_1, window_bounds = array<i64: 512, 512>}, {transform_indices = @transform_2, window_bounds = array<i64: 1, 512>}, {transform_indices = @transform_3, window_bounds = array<i64: 304, 512>}]} {
    %c0 = arith.constant 0 : index
    %c0_0 = arith.constant 0 : index
    %0 = vector.load %arg3[%c0, %c0_0] : memref<304x512xf32, #tpu.memory_space<vmem>>, vector<304x512xf32>
    %c0_1 = arith.constant 0 : index
    %c0_2 = arith.constant 0 : index
    %1 = vector.load %arg4[%c0_1, %c0_2] : memref<512x512xf32, #tpu.memory_space<vmem>>, vector<512x512xf32>
    %cst = arith.constant dense<0.000000e+00> : vector<304x512xf32>
    %2 = tpu.matmul %0, %1, %cst {dimension_numbers = #tpu.dot_dimension_numbers<[1], [1], [0], [0], [0, 0, 1, 0], [], []>} : vector<304x512xf32>, vector<512x512xf32>, vector<304x512xf32> -> vector<304x512xf32>
    %c0_i32 = arith.constant 0 : i32
    %3 = arith.cmpi eq, %arg2, %c0_i32 : i32
    %4 = arith.extui %3 : i1 to i32
    %c0_i32_3 = arith.constant 0 : i32
    %5 = arith.cmpi ne, %4, %c0_i32_3 : i32
    scf.if %5 {
      %c0_7 = arith.constant 0 : index
      %c0_8 = arith.constant 0 : index
      %12 = vector.load %arg6[%c0_7, %c0_8] : memref<304x512xf32, #tpu.memory_space<vmem>>, vector<304x512xf32>
      tpu.vector_store %arg6[%c0_7, %c0_8], %2 {strides = array<i32>} : memref<304x512xf32, #tpu.memory_space<vmem>>, vector<304x512xf32>,
    } else {
    }
    %c0_i32_4 = arith.constant 0 : i32
    %6 = arith.cmpi sgt, %arg2, %c0_i32_4 : i32
    %7 = arith.extui %6 : i1 to i32
    %c0_i32_5 = arith.constant 0 : i32
    %8 = arith.cmpi ne, %7, %c0_i32_5 : i32
    scf.if %8 {
      %c0_7 = arith.constant 0 : index
      %c0_8 = arith.constant 0 : index
      %12 = vector.load %arg6[%c0_7, %c0_8] : memref<304x512xf32, #tpu.memory_space<vmem>>, vector<304x512xf32>
      %13 = arith.addf %12, %2 : vector<304x512xf32>
      %c0_9 = arith.constant 0 : index
      %c0_10 = arith.constant 0 : index
      %14 = vector.load %arg6[%c0_9, %c0_10] : memref<304x512xf32, #tpu.memory_space<vmem>>, vector<304x512xf32>
      tpu.vector_store %arg6[%c0_9, %c0_10], %13 {strides = array<i32>} : memref<304x512xf32, #tpu.memory_space<vmem>>, vector<304x512xf32>,
    } else {
    }
    %c1_i32 = arith.constant 1 : i32
    %9 = arith.cmpi eq, %arg2, %c1_i32 : i32
    %10 = arith.extui %9 : i1 to i32
    %c0_i32_6 = arith.constant 0 : i32
    %11 = arith.cmpi ne, %10, %c0_i32_6 : i32
    scf.if %11 {
      %c0_7 = arith.constant 0 : index
      %c0_8 = arith.constant 0 : index
      %12 = vector.load %arg6[%c0_7, %c0_8] : memref<304x512xf32, #tpu.memory_space<vmem>>, vector<304x512xf32>
      %c0_9 = arith.constant 0 : index
      %c0_10 = arith.constant 0 : index
      %13 = vector.load %arg5[%c0_9, %c0_10] : memref<1x512xf32, #tpu.memory_space<vmem>>, vector<1x512xf32>
      %14 = vector.broadcast %13 : vector<1x512xf32> to vector<304x512xf32>
      %15 = arith.addf %12, %14 : vector<304x512xf32>
      %c0_11 = arith.constant 0 : index
      %c0_12 = arith.constant 0 : index
      %16 = vector.load %arg6[%c0_11, %c0_12] : memref<304x512xf32, #tpu.memory_space<vmem>>, vector<304x512xf32>
      tpu.vector_store %arg6[%c0_11, %c0_12], %15 {strides = array<i32>} : memref<304x512xf32, #tpu.memory_space<vmem>>, vector<304x512xf32>,
    } else {
    }
    return
  }
  func.func @transform_0(%arg0: i32, %arg1: i32, %arg2: i32) -> (i32, i32) {
    %c0_i32 = arith.constant 0 : i32
    return %arg0, %arg2 : i32, i32
  }
  func.func @transform_1(%arg0: i32, %arg1: i32, %arg2: i32) -> (i32, i32) {
    %c0_i32 = arith.constant 0 : i32
    return %arg1, %arg2 : i32, i32
  }
  func.func @transform_2(%arg0: i32, %arg1: i32, %arg2: i32) -> (i32, i32) {
    %c0_i32 = arith.constant 0 : i32
    %c0_i32_0 = arith.constant 0 : i32
    return %c0_i32, %arg1 : i32, i32
  }
  func.func @transform_3(%arg0: i32, %arg1: i32, %arg2: i32) -> (i32, i32) {
    %c0_i32 = arith.constant 0 : i32
    return %arg0, %arg1 : i32, i32
  }
}

</mosaic_0001>

<bundles_post_ra>
// kernel: tpu_custom_call.1
= control target key start
LH: loop header
LB: loop body
LE: loop exit
PB: predicated region body
PF: predicated region fallthrough
CT: control target
= control target key end

     0   :  { %s6370_s0 = inlined_call_operand.hbm [shape: f32[300,1024], index: 0, kind: input, shape index: {}]   ;;  %s6371_s1 = inlined_call_operand.hbm [shape: f32[640,1024], index: 1, kind: input, shape index: {}]   ;;  %s6372_s2 = inlined_call_operand.hbm [shape: f32[1,640], index: 2, kind: input, shape index: {}]   ;;  %s6373_s3 = inlined_call_operand.hbm [shape: f32[300,640], index: 3, kind: output, shape index: {}]  }
   0x1   :  { %6397 = sst [smem:[#allocation123_spill]] %s6370_s0 }
   0x2   :  { %6398 = sst [smem:[#allocation124_spill]] %s6373_s3 }
   0x3   :  { %8 = vsyncpa [#allocation3], 0 }
   0x4   :  { %10 = vsyncpa [#allocation3 + $0x1], 0 }
   0x5   :  { %11 = vsyncpa [#allocation6], 0 }
   0x6   :  { %13 = vsyncpa [#allocation6 + $0x1], 0 }
   0x7   :  { %14 = vsyncpa [#allocation4], 0 }
   0x8   :  { %16 = vsyncpa [#allocation4 + $0x1], 0  ;;  %s4021_s12 = smov 0   ;;  %s4023_s13 = smov 0  }
   0x9   :  { %s4025_s14 = smov 0   ;;  %s4027_s15 = smov 0  }
   0xa   :  { %s4029_s16 = smov 0   ;;  %s4031_s17 = smov 0  }
   0xb   :  { %s4033_s18 = smov 0   ;;  %s4035_s19 = smov 0  }
   0xc   :  { %s4037_s20 = smov 0   ;;  %s4039_s21 = smov 0  }
   0xd   :  { %s4041_s22 = smov 0   ;;  %s4043_s23 = smov 0  }
   0xe   :  { %s4045_s24 = smov 0   ;;  %s4047_s25 = smov 0  }
   0xf LB: > { %6399 = sst [smem:[#allocation13_spill]] %s3935_s12  ;;  %s4090_s26 = sadd.s32 4294967295, %s3987_s25   ;;  %s3987_s25 = sphi %s4047_s25, %s22_s25   ;;  %s3983_s24 = sphi %s4045_s24, %s6737_s24   ;;  %s3979_s23 = sphi %s4043_s23, %s6736_s23   ;;  %s3975_s22 = sphi %s4041_s22, %s6735_s22   ;;  %s3971_s21 = sphi %s4039_s21, %s6734_s21   ;;  %s3967_s20 = sphi %s4037_s20, %s6723_s20   ;;  %s3963_s19 = sphi %s4035_s19, %s6733_s19   ;;  %s3959_s18 = sphi %s4033_s18, %s6732_s18   ;;  %s3955_s17 = sphi %s4031_s17, %s6731_s17   ;;  %s3951_s16 = sphi %s4029_s16, %s6730_s16   ;;  %s3947_s15 = sphi %s4027_s15, %s6729_s15   ;;  %s3943_s14 = sphi %s4025_s14, %s6728_s14   ;;  %s3939_s13 = sphi %s4023_s13, %s6727_s13   ;;  %s3935_s12 = sphi %s4021_s12, %s6726_s12  }
  0x10   : > { %6400 = sst [smem:[#allocation14_spill]] %s3967_s20  ;;  %s34_s28 = sadd.s32 1, %s3979_s23 }
  0x11   : > { %6401 = sst [smem:[#allocation15_spill]] %s3975_s22  ;;  %s37_s29 = sadd.s32 1, %s3983_s24 }
  0x12   : > { %p35_p0 = scmp.ge.s32.totalorder %s34_s28, 2  ;;  %s50_s30 = sadd.s32 1, %s3967_s20 }
  0x13   : > { %p57_p1 = scmp.ne.s32.totalorder %s3967_s20, %s3963_s19  ;;  %p58_p2 = scmp.eq.s32.totalorder %s3987_s25, 0 }
  0x14   : > { %s6739_s28 = smov (%p35_p0, %s34_s28), 0  ;;  %s6741_s29 = smov (!%p35_p0, %s37_s29), %s3983_s24 }
  0x15   : > { %6402 = sst [smem:[#allocation16_spill]] %s6739_s28  ;;  %s46_s4 = ssub.s32 %s3979_s23, %s6739_s28 }
  0x16   : > { %p4106_p3 = por %p58_p2, %p57_p1  ;;  %p39_p4 = scmp.ge.s32.totalorder %s6741_s29, 2 }
  0x17   : > { %p48_p5 = scmp.eq.s32.totalorder %s46_s4, 0  ;;  %p63_p6 = scmp.ne.s32.totalorder %s3963_s19, %s3959_s18 }
  0x18   : > { %p64_p7 = scmp.eq.s32.totalorder %s4090_s26, 0  ;;  %s6743_s29 = smov (%p39_p4, %s6741_s29), 0 }
  0x19   : > { %6404 = sst [smem:[#allocation17_spill]] %s6743_s29  ;;  %s73_s8 = ssub.s32 %s3983_s24, %s6743_s29 }
  0x1a   : > { %s4115_s6 = scalar_select %p48_p5, %s3967_s20, %s50_s30  }
  0x1b   : > { %p4119_p8 = por %p64_p7, %p63_p6  ;;  %s75_s9 = sor.u32 %s73_s8, %s46_s4 }
  0x1c   : > { %6405 = sst [smem:[#allocation18_spill]] %s4115_s6  ;;  %s78_s10 = sadd.s32 1, %s3955_s17 }
  0x1d   : > { %s6406_s7 = scalar_select %p4119_p8, 1, 0 }
  0x1e   : > { %p76_p9 = scmp.eq.s32.totalorder %s75_s9, 0  ;;  %p85_p10 = scmp.ne.s32.totalorder %s3955_s17, %s3951_s16 }
  0x1f   : > { %p91_p11 = scmp.ne.s32.totalorder %s3951_s16, %s3947_s15  ;;  %p102_p12 = scmp.eq.s32.totalorder %s73_s8, 0 }
  0x20   : > { %s4131_s11 = scalar_select %p76_p9, %s3955_s17, %s78_s10  }
  0x21   : > { %p4135_p13 = por %p85_p10, %p58_p2  ;;  %p4141_p0 = por %p91_p11, %p64_p7 }
  0x22   : > { %6407 = sst [smem:[#allocation19_spill]] %s4131_s11  ;;  %s104_s27 = sadd.s32 1, %s3943_s14 }
  0x23   : > { %s6409_s30 = scalar_select %p4141_p0, 1, 0 }
  0x24   : > { %p111_p1 = scmp.ne.s32.totalorder %s3943_s14, %s3939_s13  ;;  %p117_p5 = scmp.ne.s32.totalorder %s3939_s13, %s3935_s12 }
  0x25   : > { %s4149_s4 = scalar_select %p102_p12, %s3943_s14, %s104_s27  }
  0x26   : > { %p4153_p4 = por %p111_p1, %p58_p2  ;;  %p143_p6 = scmp.eq.s32.totalorder %s4090_s26, 3 }
  0x27   : > { %6410 = sst [smem:[#allocation20_spill]] %s4149_s4  ;;  %s6412_s8 = sadd.s32 4294967294, %s3987_s25  }
  0x28   : > { %s6411_s15 = scalar_select %p4153_p4, 1, 0 }
  0x29   : > { %p149_p9 = scmp.eq.s32.totalorder %s6412_s8, 3  ;;  %p4164_p10 = por %p117_p5, %p64_p7 }
  0x2a   : > { %p4168_p11 = por %p143_p6, %p111_p1  ;;  %p3171_p2 = scmp.ge.s32.totalorder %s3987_s25, 4 }
  0x2b   : > { %s6413_s9 = scalar_select %p4164_p10, 1, 0 }
  0x2c   : > { %s6414_s10 = scalar_select %p4168_p11, 1, 0 }
  0x2d   : > { %p4172_p12 = por %p149_p9, %p117_p5  ;;  %165 = sbr.rel (%p3171_p2) target bundleno = 150 (0x96), region = 16 }
  0x2e   : > { %6415 = sst [smem:[#allocation21_spill]] %s6414_s10  ;;  %s169_s8 = sand.u32 (!%p3171_p2), 1, %s3967_s20  }
  0x2f   : > { %s6416_s27 = scalar_select %p4172_p12, 1, 0 }
  0x30   : > { %s3203_s29 = sshll.u32 (!%p3171_p2), %s3979_s23, 9  ;;  %s3616_s28 = smul.u32 (!%p3171_p2), 1216, %s169_s8 }
  0x31   : > { %6417 = sst [smem:[#allocation22_spill]] %s6416_s27  ;;  %s6418_s0 = sld [smem:[#allocation123_spill]] (!%p3171_p2) }
  0x32   : > { %s173_s12 = scalar_lea.vmem (!%p3171_p2), [#allocation2], %s3616_s28  ;;  %s4186_s3 = scalar_lea.sflag (!%p3171_p2), [#allocation3], %s169_s8 }
  0x33   : > { %s183_s27 = sshll.u32 (!%p3171_p2), %s173_s12, 4  ;;  %s4184_s27 = int_to_ptr.vmem [resolvable:$true] %s183_s27 }
  0x37   : > { %s4182_s4 = scalar_lea.hbm %s6418_s0, %s3203_s29  ;;  %s3753_s29 = scalar_lea.hbm %s6418_s0, 38912 }
  0x38   : > { %s3749_s22 = scalar_lea.hbm %s4182_s4, 19456  ;;  %p3754_p6 = scmp.lt.u32.totalorder %s4182_s4, %s6418_s0 }
  0x39   : > { %p3750_p7 = scmp.ne.s32.totalorder %s4182_s4, %s3749_s22  ;;  %p3755_p9 = scmp.lt.u32.totalorder %s3753_s29, %s3749_s22 }
  0x3a   : > { %p3757_p12 = scmp.lt.u32.totalorder %s3749_s22, %s4182_s4 }
  0x3b   : > { %p3751_p1 = pnand %p3750_p7, %p4106_p3  ;;  %p3756_p2 = por %p3755_p9, %p3754_p6 }
  0x3d   : > { %p3752_p5 = pneg %p3751_p1  ;;  %p3758_p11 = por %p3757_p12, %p3756_p2 }
  0x3f   : > { %p3759_p10 = pnand %p3758_p11, %p3752_p5 }
  0x41   : > { %3762 = shalt.err (!%p3759_p10)
}
  0x42   : > { %s3763_s12 = scalar_lea.vmem %s4184_s27, 19456  ;;  %s3989_s20 = smov [#allocation2]  }
  0x43   : > { %p3764_p7 = scmp.ne.s32.totalorder %s4184_s27, %s3763_s12  ;;  %s3767_s28 = sshll.u32 %s3989_s20, 4  ;;  %s3768_s28 = int_to_ptr.vmem [resolvable:$false] %s3767_s28 }
  0x44   : > { %s3769_s10 = scalar_lea.vmem %s3768_s28, 38912  ;;  %p3770_p8 = scmp.lt.s32.totalorder %s4184_s27, %s3768_s28 }
  0x45   : > { %p3765_p1 = pnand %p3764_p7, %p4106_p3  ;;  %p3771_p4 = scmp.lt.s32.totalorder %s3769_s10, %s3763_s12 }
  0x47   : > { %p3766_p0 = pneg %p3765_p1  ;;  %p3772_p6 = por %p3771_p4, %p3770_p8 }
  0x49   : > { %p3773_p9 = pnand %p3772_p6, %p3766_p0 }
  0x4b   : > { %3776 = shalt.err (!%p3773_p9)
}
  0x4c   : > { %s3990_s22 = smov 1024   ;;  %s3991_s8 = smov 512  }
  0x4d   : > { %s3992_s29 = smov 32   ;;  %192 = sbr.rel (!%p4135_p13) target bundleno = 114 (0x72), region = 24 }
  0x4e   : > { %3619 = dma.hbm_to_vmem [thread:$0]  (%p4106_p3), %s4182_s4, 19456, %s4184_s27, %s4186_s3, %s3990_s22, %s3991_s8, %s3992_s29  }
  0x4f   : > { %s193_s6 = sand.u32 (%p4135_p13), 1, %s3987_s25   ;;  %s195_s11 = sand.u32 (%p4135_p13), 1, %s3955_s17  }
  0x50   : > { %s3174_s12 = sshll.u32 (%p4135_p13), %s195_s11, 11  ;;  %s3175_s20 = sshll.u32 (%p4135_p13), %s3983_s24, 6 }
  0x51   : > { %s3176_s28 = sshll.u32 (%p4135_p13), %s3979_s23, 2  ;;  %s200_s10 = ssub.s32 (%p4135_p13), 80, %s3175_s20 }
  0x52   : > { %p201_p8 = scmp.lt.s32.totalorder (%p4135_p13), %s200_s10, 64  ;;  %s4219_s3 = scalar_lea.sflag (%p4135_p13), [#allocation6], %s193_s6 }
  0x53   : > { %s197_s18 = scalar_lea.vmem (%p4135_p13), [#allocation5], %s3174_s12 }
  0x54   : > { %s6745_s10 = smov (!%p201_p8, %s200_s10), 64 }
  0x55   : > { %s4216_s0 = sshll.u32 %s6745_s10, 9 }
  0x56   : > { %s206_s5 = ssub.s32 32768, %s4216_s0 }
  0x57   : > { %207 = vsyncadd %s4219_s3, %s206_s5  ;;  %p3179_p3 = scmp.ne.s32.totalorder %s4216_s0, 0  ;;  %s3205_s4 = sshll.u32 %s3983_s24, 9 }
  0x58   : > { %s210_s27 = sadd.s32 %s3205_s4, %s3176_s28  ;;  %s214_s22 = sshll.u32 %s197_s18, 4  ;;  %s4224_s22 = int_to_ptr.vmem [resolvable:$true] %s214_s22 }
  0x59   : > { %s3181_s8 = sshll.u32 %s210_s27, 7  ;;  %s3781_s10 = scalar_lea.hbm %s6371_s1, 81920 }
  0x5a   : > { %s4229_s20 = scalar_lea.hbm %s6371_s1, %s3181_s8 }
  0x5b   : > { %s3777_s6 = scalar_lea.hbm %s4229_s20, %s4216_s0  ;;  %p3782_p10 = scmp.lt.u32.totalorder %s4229_s20, %s6371_s1 }
  0x5c   : > { %p3778_p13 = scmp.ne.s32.totalorder %s4229_s20, %s3777_s6  ;;  %p3783_p11 = scmp.lt.u32.totalorder %s3781_s10, %s3777_s6 }
  0x5d   : > { %p3785_p5 = scmp.lt.u32.totalorder %s3777_s6, %s4229_s20 }
  0x5e   : > { %p3779_p0 = pnand %p3778_p13, %p3179_p3  ;;  %p3784_p12 = por %p3783_p11, %p3782_p10 }
  0x60   : > { %p3780_p4 = pneg %p3779_p0  ;;  %p3786_p2 = por %p3785_p5, %p3784_p12 }
  0x62   : > { %p3787_p7 = pnand %p3786_p2, %p3780_p4 }
  0x64   : > { %3790 = shalt.err (!%p3787_p7)
}
  0x65   : > { %s3791_s4 = scalar_lea.vmem %s4224_s22, %s4216_s0  ;;  %s3993_s27 = smov [#allocation5]  }
  0x66   : > { %p3792_p1 = scmp.ne.s32.totalorder %s4224_s22, %s3791_s4  ;;  %s3795_s8 = sshll.u32 %s3993_s27, 4  ;;  %s3796_s8 = int_to_ptr.vmem [resolvable:$false] %s3795_s8 }
  0x67   : > { %s3797_s29 = scalar_lea.vmem %s3796_s8, 65536  ;;  %p3798_p8 = scmp.lt.s32.totalorder %s4224_s22, %s3796_s8 }
  0x68   : > { %p3793_p6 = pnand %p3792_p1, %p3179_p3  ;;  %p3799_p13 = scmp.lt.s32.totalorder %s3797_s29, %s3791_s4 }
  0x6a   : > { %p3794_p9 = pneg %p3793_p6  ;;  %p3800_p0 = por %p3799_p13, %p3798_p8 }
  0x6c   : > { %p3801_p10 = pnand %p3800_p0, %p3794_p9 }
  0x6e   : > { %3804 = shalt.err (!%p3801_p10)
}
  0x6f   : > { %s3994_s11 = smov 1024   ;;  %s3995_s6 = smov 512  }
  0x70   : > { %s3996_s12 = smov 32  }
  0x71   : > { %220 = dma.hbm_to_vmem [thread:$0]  (%p3179_p3), %s4229_s20, %s4216_s0, %s4224_s22, %s4219_s3, %s3994_s11, %s3995_s6, %s3996_s12  }
  0x72 PF: > { %p6419_p4 = scmp.ne.s32.totalorder %s6411_s15, 0 }
  0x73   : > { %s224_s28 = sand.u32 (%p6419_p4), 1, %s3987_s25   ;;  %s226_s10 = sand.u32 (%p6419_p4), 1, %s3943_s14  }
  0x74   : > { %223 = sbr.rel (!%p6419_p4) target bundleno = 150 (0x96), region = 28  ;;  %s3184_s5 = sshll.u32 (%p6419_p4), %s226_s10, 2 }
  0x75   : > { %s3185_s18 = sshll.u32 (%p6419_p4), %s3983_s24, 2  ;;  %s4264_s29 = scalar_lea.sflag (%p6419_p4), [#allocation6], %s224_s28 }
  0x76   : > { %s230_s4 = ssub.s32 (%p6419_p4), 5, %s3185_s18  ;;  %s228_s0 = scalar_lea.vmem (%p6419_p4), [#allocation7], %s3184_s5 }
  0x77   : > { %p231_p11 = scmp.lt.s32.totalorder (%p6419_p4), %s230_s4, 4 }
  0x7b   : > { %s6747_s4 = smov (!%p231_p11, %s230_s4), 4 }
  0x7c   : > { %s4261_s27 = sshll.u32 %s6747_s4, 4 }
  0x7d   : > { %s235_s8 = ssub.s32 64, %s4261_s27 }
  0x7e   : > { %236 = vsyncadd %s4264_s29, %s235_s8  ;;  %p3187_p3 = scmp.ne.s32.totalorder %s4261_s27, 0  ;;  %s3206_s15 = sshll.u32 %s3983_s24, 6 }
  0x7f   : > { %s4272_s20 = scalar_lea.hbm %s6372_s2, %s3206_s15  ;;  %s241_s11 = sshll.u32 %s228_s0, 4  ;;  %s242_s11 = int_to_ptr.vmem [resolvable:$true] %s241_s11 }
  0x80   : > { %s3805_s6 = scalar_lea.hbm %s4272_s20, %s4261_s27  ;;  %s3809_s10 = scalar_lea.hbm %s6372_s2, 80 }
  0x81   : > { %p3806_p12 = scmp.ne.s32.totalorder %s4272_s20, %s3805_s6  ;;  %p3810_p7 = scmp.lt.u32.totalorder %s4272_s20, %s6372_s2 }
  0x82   : > { %p3811_p1 = scmp.lt.u32.totalorder %s3809_s10, %s3805_s6  ;;  %p3813_p9 = scmp.lt.u32.totalorder %s3805_s6, %s4272_s20 }
  0x83   : > { %p3807_p5 = pnand %p3806_p12, %p3187_p3 }
  0x84   : > { %p3812_p6 = por %p3811_p1, %p3810_p7 }
  0x85   : > { %p3808_p2 = pneg %p3807_p5 }
  0x86   : > { %p3814_p8 = por %p3813_p9, %p3812_p6 }
  0x88   : > { %p3815_p13 = pnand %p3814_p8, %p3808_p2 }
  0x8a   : > { %3818 = shalt.err (!%p3815_p13)
}
  0x8b   : > { %s3819_s4 = scalar_lea.vmem %s242_s11, %s4261_s27  ;;  %s3997_s8 = smov [#allocation7]  }
  0x8c   : > { %p3820_p0 = scmp.ne.s32.totalorder %s242_s11, %s3819_s4  ;;  %s3823_s0 = sshll.u32 %s3997_s8, 4  ;;  %s3824_s0 = int_to_ptr.vmem [resolvable:$false] %s3823_s0 }
  0x8d   : > { %s3825_s15 = scalar_lea.vmem %s3824_s0, 128  ;;  %p3826_p11 = scmp.lt.s32.totalorder %s242_s11, %s3824_s0 }
  0x8e   : > { %p3821_p10 = pnand %p3820_p0, %p3187_p3  ;;  %p3827_p12 = scmp.lt.s32.totalorder %s3825_s15, %s3819_s4 }
  0x90   : > { %p3822_p4 = pneg %p3821_p10  ;;  %p3828_p5 = por %p3827_p12, %p3826_p11 }
  0x92   : > { %p3829_p1 = pnand %p3828_p5, %p3822_p4 }
  0x94   : > { %3832 = shalt.err (!%p3829_p1)
}
  0x95   : > { %244 = dma.hbm_to_vmem [thread:$0]  (%p3187_p3), %s4272_s20, %s4261_s27, %s242_s11, %s4264_s29  }
  0x96 PF: > { %p3189_p2 = scmp.ge.s32.totalorder %s3987_s25, 1  ;;  %p246_p7 = scmp.lt.s32.totalorder %s3987_s25, 5 }
  0x98   : > { %p247_p6 = pnand %p3189_p2, %p246_p7 }
  0x9a   : > { %250 = sbr.rel (%p247_p6) target bundleno = 1062 (0x426), region = 32 }
  0xa1   : > { %s252_s3 = sand.u32 1, %s3963_s19   ;;  %p6420_p9 = scmp.ne.s32.totalorder %s6406_s7, 0 }
  0xa2   : > { %s3617_s22 = smul.u32 1216, %s252_s3  ;;  %s253_s6 = scalar_lea.sflag [#allocation3], %s252_s3 }
  0xa4   : > { %s4298_s12 = scalar_lea.vmem [#allocation2], %s3617_s22 }
  0xa5   : > { %3918 = dma.done.wait (%p6420_p9), %s253_s6, 19456  }
  0xa6   : > { %3920 = vsyncadd (%p6420_p9), %s253_s6, 4294947840  ;;  %s261_s27 = sand.u32 1, %s4090_s26   ;;  %s263_s29 = sand.u32 1, %s3951_s16  }
  0xa7   : > { %s3190_s20 = sshll.u32 %s263_s29, 11  ;;  %s262_s11 = scalar_lea.sflag [#allocation6], %s261_s27 }
  0xa8   : > { %s4306_s28 = scalar_lea.vmem [#allocation5], %s3190_s20  ;;  %p6421_p3 = scmp.ne.s32.totalorder %s6409_s30, 0 }
  0xaa   : > { %3922 = dma.done.wait (%p6421_p3), %s262_s11, 32768  }
  0xab   : > { %3924 = vsyncadd (%p6421_p3), %s262_s11, 4294934528  ;;  %s4313_s10 = sand.u32 1, %s3939_s13   ;;  %p6422_p8 = scmp.ne.s32.totalorder %s6413_s9, 0 }
  0xac   : > { %s3191_s7 = sshll.u32 %s4313_s10, 2 }
  0xad   : > { %s4316_s5 = scalar_lea.vmem [#allocation7], %s3191_s7 }
  0xae   : > { %3926 = dma.done.wait (%p6422_p8), %s262_s11, 64  }
  0xaf   : > { %3928 = vsyncadd (%p6422_p8), %s262_s11, 4294967232  ;;  %s3618_s26 = smul.u32 1216, %s4313_s10  ;;  %v480_v0 = vld [vmem:[%s4306_s28 + $0x8] sm:$0xff]  ;;  %v479_v5 = vld [vmem:[%s4306_s28] sm:$0xff]  ;;  %p3192_p13 = scmp.ne.s32.totalorder %s3971_s21, 0 }
  0xb0   : > { %v484_v1 = vld [vmem:[%s4306_s28 + $0x28] sm:$0xff]  ;;  %v483_v6 = vld [vmem:[%s4306_s28 + $0x20] sm:$0xff] }
  0xb1   : > { %v608_v2 = vld [vmem:[%s4306_s28 + $0x408] sm:$0xff]  ;;  %v3208_v3 = vpack.c.bf16 %v484_v1, %v480_v0  ;;  %v3210_v8 = vpack.c.bf16 %v483_v6, %v479_v5  ;;  %v607_v9 = vld [vmem:[%s4306_s28 + $0x400] sm:$0xff]  ;;  %s5037_s30 = scalar_lea.vmem [#allocation8], %s3618_s26 }
  0xb2   : > { %v612_v4 = vld [vmem:[%s4306_s28 + $0x428] sm:$0xff]  ;;  %v611_v10 = vld [vmem:[%s4306_s28 + $0x420] sm:$0xff] }
  0xb3   : > { %v3336_v7 = vpack.c.bf16 %v612_v4, %v608_v2  ;;  %v488_v11 = vld [vmem:[%s4306_s28 + $0x48] sm:$0xff]  ;;  %3209 = vmatprep.subr.bf16.mxu0 %v3208_v3  ;;  %v3338_v12 = vpack.c.bf16 %v611_v10, %v607_v9  ;;  %v487_v18 = vld [vmem:[%s4306_s28 + $0x40] sm:$0xff] }
  0xb4   : > { %v492_v13 = vld [vmem:[%s4306_s28 + $0x68] sm:$0xff]  ;;  %3211 = vmatpush1.bf16.xpose.msra.mxu0 %v3210_v8  ;;  %v491_v19 = vld [vmem:[%s4306_s28 + $0x60] sm:$0xff] }
  0xb5   : > { %v616_v14 = vld [vmem:[%s4306_s28 + $0x448] sm:$0xff]  ;;  %3337 = vmatprep.subr.bf16.mxu1 %v3336_v7  ;;  %v3212_v16 = vpack.c.bf16 %v492_v13, %v488_v11  ;;  %v615_v20 = vld [vmem:[%s4306_s28 + $0x440] sm:$0xff]  ;;  %v3214_v26 = vpack.c.bf16 %v491_v19, %v487_v18 }
  0xb6   : > { %v620_v15 = vld [vmem:[%s4306_s28 + $0x468] sm:$0xff]  ;;  %3339 = vmatpush1.bf16.xpose.msra.mxu1 %v3338_v12  ;;  %v619_v21 = vld [vmem:[%s4306_s28 + $0x460] sm:$0xff] }
  0xb7   : > { %v3340_v17 = vpack.c.bf16 %v620_v15, %v616_v14  ;;  %3213 = vmatprep.subr.bf16.mxu0 %v3212_v16  ;;  %v496_v22 = vld [vmem:[%s4306_s28 + $0x88] sm:$0xff]  ;;  %v3342_v27 = vpack.c.bf16 %v619_v21, %v615_v20  ;;  %v495_v30 = vld [vmem:[%s4306_s28 + $0x80] sm:$0xff] }
  0xb8   : > { %v500_v23 = vld [vmem:[%s4306_s28 + $0xa8] sm:$0xff]  ;;  %v499_v31 = vld [vmem:[%s4306_s28 + $0xa0] sm:$0xff] }
  0xb9   : > { %3341 = vmatprep.subr.bf16.mxu1 %v3340_v17  ;;  %v624_v24 = vld [vmem:[%s4306_s28 + $0x488] sm:$0xff]  ;;  %v3216_v28 = vpack.c.bf16 %v500_v23, %v496_v22  ;;  %v623_v32 = vld [vmem:[%s4306_s28 + $0x480] sm:$0xff]  ;;  %v3218_v38 = vpack.c.bf16 %v499_v31, %v495_v30 }
  0xba   : > { %v628_v25 = vld [vmem:[%s4306_s28 + $0x4a8] sm:$0xff]  ;;  %v627_v33 = vld [vmem:[%s4306_s28 + $0x4a0] sm:$0xff] }
  0xbb   : > { %v3344_v29 = vpack.c.bf16 %v628_v25, %v624_v24  ;;  %v504_v34 = vld [vmem:[%s4306_s28 + $0xc8] sm:$0xff]  ;;  %v3346_v39 = vpack.c.bf16 %v627_v33, %v623_v32  ;;  %v503_v42 = vld [vmem:[%s4306_s28 + $0xc0] sm:$0xff] }
  0xbc   : > { %3215 = vmatpush1.bf16.xpose.msra.mxu0 %v3214_v26  ;;  %v508_v35 = vld [vmem:[%s4306_s28 + $0xe8] sm:$0xff]  ;;  %v507_v43 = vld [vmem:[%s4306_s28 + $0xe0] sm:$0xff] }
  0xbd   : > { %3217 = vmatprep.subr.bf16.mxu0 %v3216_v28  ;;  %v632_v36 = vld [vmem:[%s4306_s28 + $0x4c8] sm:$0xff]  ;;  %v3220_v40 = vpack.c.bf16 %v508_v35, %v504_v34  ;;  %v631_v44 = vld [vmem:[%s4306_s28 + $0x4c0] sm:$0xff]  ;;  %v3222_v50 = vpack.c.bf16 %v507_v43, %v503_v42 }
  0xbe   : > { %3343 = vmatpush1.bf16.xpose.msra.mxu1 %v3342_v27  ;;  %v636_v37 = vld [vmem:[%s4306_s28 + $0x4e8] sm:$0xff]  ;;  %v635_v45 = vld [vmem:[%s4306_s28 + $0x4e0] sm:$0xff] }
  0xbf   : > { %3345 = vmatprep.subr.bf16.mxu1 %v3344_v29  ;;  %v3348_v41 = vpack.c.bf16 %v636_v37, %v632_v36  ;;  %v512_v46 = vld [vmem:[%s4306_s28 + $0x108] sm:$0xff]  ;;  %v3350_v51 = vpack.c.bf16 %v635_v45, %v631_v44  ;;  %v511_v54 = vld [vmem:[%s4306_s28 + $0x100] sm:$0xff] }
  0xc0   : > { %v516_v47 = vld [vmem:[%s4306_s28 + $0x128] sm:$0xff]  ;;  %v515_v55 = vld [vmem:[%s4306_s28 + $0x120] sm:$0xff] }
  0xc1   : > { %v640_v48 = vld [vmem:[%s4306_s28 + $0x508] sm:$0xff]  ;;  %v3224_v52 = vpack.c.bf16 %v516_v47, %v512_v46  ;;  %v639_v56 = vld [vmem:[%s4306_s28 + $0x500] sm:$0xff]  ;;  %v3226_v62 = vpack.c.bf16 %v515_v55, %v511_v54 }
  0xc2   : > { %v644_v49 = vld [vmem:[%s4306_s28 + $0x528] sm:$0xff]  ;;  %v643_v57 = vld [vmem:[%s4306_s28 + $0x520] sm:$0xff] }
  0xc3   : > { %v3352_v53 = vpack.c.bf16 %v644_v49, %v640_v48  ;;  %v520_v58 = vld [vmem:[%s4306_s28 + $0x148] sm:$0xff]  ;;  %v3354_v63 = vpack.c.bf16 %v643_v57, %v639_v56  ;;  %v519_v2 = vld [vmem:[%s4306_s28 + $0x140] sm:$0xff] }
  0xc4   : > { %3219 = vmatpush1.bf16.xpose.msra.mxu0 %v3218_v38  ;;  %v524_v59 = vld [vmem:[%s4306_s28 + $0x168] sm:$0xff]  ;;  %v523_v3 = vld [vmem:[%s4306_s28 + $0x160] sm:$0xff] }
  0xc5   : > { %3221 = vmatprep.subr.bf16.mxu0 %v3220_v40  ;;  %v648_v60 = vld [vmem:[%s4306_s28 + $0x548] sm:$0xff]  ;;  %v3228_v0 = vpack.c.bf16 %v524_v59, %v520_v58  ;;  %v647_v4 = vld [vmem:[%s4306_s28 + $0x540] sm:$0xff]  ;;  %v3230_v10 = vpack.c.bf16 %v523_v3, %v519_v2 }
  0xc6   : > { %3347 = vmatpush1.bf16.xpose.msra.mxu1 %v3346_v39  ;;  %v652_v61 = vld [vmem:[%s4306_s28 + $0x568] sm:$0xff]  ;;  %v651_v5 = vld [vmem:[%s4306_s28 + $0x560] sm:$0xff] }
  0xc7   : > { %3349 = vmatprep.subr.bf16.mxu1 %v3348_v41  ;;  %v3356_v1 = vpack.c.bf16 %v652_v61, %v648_v60  ;;  %v528_v6 = vld [vmem:[%s4306_s28 + $0x188] sm:$0xff]  ;;  %v3358_v11 = vpack.c.bf16 %v651_v5, %v647_v4  ;;  %v527_v15 = vld [vmem:[%s4306_s28 + $0x180] sm:$0xff] }
  0xc8   : > { %v532_v7 = vld [vmem:[%s4306_s28 + $0x1a8] sm:$0xff]  ;;  %v531_v16 = vld [vmem:[%s4306_s28 + $0x1a0] sm:$0xff] }
  0xc9   : > { %v656_v8 = vld [vmem:[%s4306_s28 + $0x588] sm:$0xff]  ;;  %v3232_v12 = vpack.c.bf16 %v532_v7, %v528_v6  ;;  %v655_v17 = vld [vmem:[%s4306_s28 + $0x580] sm:$0xff]  ;;  %v3234_v23 = vpack.c.bf16 %v531_v16, %v527_v15 }
  0xca   : > { %v660_v9 = vld [vmem:[%s4306_s28 + $0x5a8] sm:$0xff]  ;;  %v659_v18 = vld [vmem:[%s4306_s28 + $0x5a0] sm:$0xff] }
  0xcb   : > { %v3360_v13 = vpack.c.bf16 %v660_v9, %v656_v8  ;;  %v328_v14 = vld [vmem:[%s4298_s12 + $0x8] sm:$0xff]  ;;  %v3362_v24 = vpack.c.bf16 %v659_v18, %v655_v17  ;;  %v535_v27 = vld [vmem:[%s4306_s28 + $0x1c0] sm:$0xff] }
  0xcc   : > { %3223 = vmatpush1.bf16.xpose.msra.mxu0 %v3222_v50  ;;  %799 = vmatprep.mubr.f32.mxu0 %v328_v14  ;;  %v536_v19 = vld [vmem:[%s4306_s28 + $0x1c8] sm:$0xff]  ;;  %v539_v28 = vld [vmem:[%s4306_s28 + $0x1e0] sm:$0xff] }
  0xcd   : > { %3225 = vmatprep.subr.bf16.mxu0 %v3224_v52  ;;  %1385 = vmatprep.mubr.f32.mxu1 %v328_v14  ;;  %v540_v20 = vld [vmem:[%s4306_s28 + $0x1e8] sm:$0xff]  ;;  %v663_v29 = vld [vmem:[%s4306_s28 + $0x5c0] sm:$0xff]  ;;  %v3238_v35 = vpack.c.bf16 %v539_v28, %v535_v27 }
  0xce   : > { %3351 = vmatpush1.bf16.xpose.msra.mxu1 %v3350_v51  ;;  %v664_v21 = vld [vmem:[%s4306_s28 + $0x5c8] sm:$0xff]  ;;  %v3236_v25 = vpack.c.bf16 %v540_v20, %v536_v19  ;;  %v667_v30 = vld [vmem:[%s4306_s28 + $0x5e0] sm:$0xff] }
  0xcf   : > { %3353 = vmatprep.subr.bf16.mxu1 %v3352_v53  ;;  %v668_v22 = vld [vmem:[%s4306_s28 + $0x5e8] sm:$0xff]  ;;  %v3366_v36 = vpack.c.bf16 %v667_v30, %v663_v29  ;;  %v543_v39 = vld [vmem:[%s4306_s28 + $0x200] sm:$0xff] }
  0xd0   : > { %v3364_v26 = vpack.c.bf16 %v668_v22, %v664_v21  ;;  %v544_v31 = vld [vmem:[%s4306_s28 + $0x208] sm:$0xff]  ;;  %v547_v40 = vld [vmem:[%s4306_s28 + $0x220] sm:$0xff] }
  0xd1   : > { %v548_v32 = vld [vmem:[%s4306_s28 + $0x228] sm:$0xff]  ;;  %v671_v41 = vld [vmem:[%s4306_s28 + $0x600] sm:$0xff]  ;;  %v3242_v47 = vpack.c.bf16 %v547_v40, %v543_v39 }
  0xd2   : > { %v672_v33 = vld [vmem:[%s4306_s28 + $0x608] sm:$0xff]  ;;  %v3240_v37 = vpack.c.bf16 %v548_v32, %v544_v31  ;;  %v675_v42 = vld [vmem:[%s4306_s28 + $0x620] sm:$0xff] }
  0xd3   : > { %v676_v34 = vld [vmem:[%s4306_s28 + $0x628] sm:$0xff]  ;;  %v3370_v48 = vpack.c.bf16 %v675_v42, %v671_v41  ;;  %v551_v51 = vld [vmem:[%s4306_s28 + $0x240] sm:$0xff] }
  0xd4   : > { %3227 = vmatpush1.bf16.xpose.msra.mxu0 %v3226_v62  ;;  %v3368_v38 = vpack.c.bf16 %v676_v34, %v672_v33  ;;  %v552_v43 = vld [vmem:[%s4306_s28 + $0x248] sm:$0xff]  ;;  %v555_v52 = vld [vmem:[%s4306_s28 + $0x260] sm:$0xff] }
  0xd5   : > { %3229 = vmatprep.subr.bf16.mxu0 %v3228_v0  ;;  %v556_v44 = vld [vmem:[%s4306_s28 + $0x268] sm:$0xff]  ;;  %v679_v53 = vld [vmem:[%s4306_s28 + $0x640] sm:$0xff]  ;;  %v3246_v59 = vpack.c.bf16 %v555_v52, %v551_v51 }
  0xd6   : > { %3355 = vmatpush1.bf16.xpose.msra.mxu1 %v3354_v63  ;;  %v680_v45 = vld [vmem:[%s4306_s28 + $0x648] sm:$0xff]  ;;  %v3244_v49 = vpack.c.bf16 %v556_v44, %v552_v43  ;;  %v683_v54 = vld [vmem:[%s4306_s28 + $0x660] sm:$0xff] }
  0xd7   : > { %3357 = vmatprep.subr.bf16.mxu1 %v3356_v1  ;;  %v684_v46 = vld [vmem:[%s4306_s28 + $0x668] sm:$0xff]  ;;  %v3374_v60 = vpack.c.bf16 %v683_v54, %v679_v53  ;;  %v559_v63 = vld [vmem:[%s4306_s28 + $0x280] sm:$0xff] }
  0xd8   : > { %v3372_v50 = vpack.c.bf16 %v684_v46, %v680_v45  ;;  %v560_v55 = vld [vmem:[%s4306_s28 + $0x288] sm:$0xff]  ;;  %v563_v0 = vld [vmem:[%s4306_s28 + $0x2a0] sm:$0xff] }
  0xd9   : > { %v564_v56 = vld [vmem:[%s4306_s28 + $0x2a8] sm:$0xff]  ;;  %v687_v1 = vld [vmem:[%s4306_s28 + $0x680] sm:$0xff]  ;;  %v3250_v7 = vpack.c.bf16 %v563_v0, %v559_v63  ;;  %v482_v63 = vld [vmem:[%s4306_s28 + $0x18] sm:$0xff] }
  0xda   : > { %v688_v57 = vld [vmem:[%s4306_s28 + $0x688] sm:$0xff]  ;;  %v3248_v61 = vpack.c.bf16 %v564_v56, %v560_v55  ;;  %v691_v2 = vld [vmem:[%s4306_s28 + $0x6a0] sm:$0xff]  ;;  %v486_v0 = vld [vmem:[%s4306_s28 + $0x38] sm:$0xff] }
  0xdb   : > { %v692_v58 = vld [vmem:[%s4306_s28 + $0x6a8] sm:$0xff]  ;;  %v3378_v8 = vpack.c.bf16 %v691_v2, %v687_v1  ;;  %v699_v14 = vld [vmem:[%s4306_s28 + $0x6e0] sm:$0xff]  ;;  %v610_v1 = vld [vmem:[%s4306_s28 + $0x418] sm:$0xff] }
  0xdc   : > { %3231 = vmatpush1.bf16.xpose.msra.mxu0 %v3230_v10  ;;  %v3376_v62 = vpack.c.bf16 %v692_v58, %v688_v57  ;;  %v568_v3 = vld [vmem:[%s4306_s28 + $0x2c8] sm:$0xff]  ;;  %v614_v2 = vld [vmem:[%s4306_s28 + $0x438] sm:$0xff] }
  0xdd   : > { %3233 = vmatprep.subr.bf16.mxu0 %v3232_v12  ;;  %v572_v4 = vld [vmem:[%s4306_s28 + $0x2e8] sm:$0xff]  ;;  %v571_v12 = vld [vmem:[%s4306_s28 + $0x2e0] sm:$0xff] }
  0xde   : > { %3359 = vmatpush1.bf16.xpose.msra.mxu1 %v3358_v11  ;;  %v696_v5 = vld [vmem:[%s4306_s28 + $0x6c8] sm:$0xff]  ;;  %v3252_v9 = vpack.c.bf16 %v572_v4, %v568_v3  ;;  %v567_v11 = vld [vmem:[%s4306_s28 + $0x2c0] sm:$0xff] }
  0xdf   : > { %3361 = vmatprep.subr.bf16.mxu1 %v3360_v13  ;;  %v700_v6 = vld [vmem:[%s4306_s28 + $0x6e8] sm:$0xff]  ;;  %v695_v13 = vld [vmem:[%s4306_s28 + $0x6c0] sm:$0xff]  ;;  %v3254_v19 = vpack.c.bf16 %v571_v12, %v567_v11  ;;  %v490_v11 = vld [vmem:[%s4306_s28 + $0x58] sm:$0xff] }
  0xe0   : > { %v3380_v10 = vpack.c.bf16 %v700_v6, %v696_v5  ;;  %v576_v15 = vld [vmem:[%s4306_s28 + $0x308] sm:$0xff]  ;;  %v3382_v20 = vpack.c.bf16 %v699_v14, %v695_v13  ;;  %v3272_v5 = vpack.c.bf16 %v486_v0, %v482_v63  ;;  %v3400_v6 = vpack.c.bf16 %v614_v2, %v610_v1  ;;  %v494_v12 = vld [vmem:[%s4306_s28 + $0x78] sm:$0xff]  ;;  %v327_v13 = vld [vmem:[%s4298_s12] sm:$0xff] }
  0xe1   : > { %v580_v16 = vld [vmem:[%s4306_s28 + $0x328] sm:$0xff]  ;;  %v646_v63 = vld [vmem:[%s4306_s28 + $0x538] sm:$0xff] }
  0xe2   : > { %v704_v17 = vld [vmem:[%s4306_s28 + $0x708] sm:$0xff]  ;;  %v3256_v21 = vpack.c.bf16 %v580_v16, %v576_v15  ;;  %v618_v15 = vld [vmem:[%s4306_s28 + $0x458] sm:$0xff] }
  0xe3   : > { %v708_v18 = vld [vmem:[%s4306_s28 + $0x728] sm:$0xff]  ;;  %v622_v16 = vld [vmem:[%s4306_s28 + $0x478] sm:$0xff] }
  0xe4   : > { %3235 = vmatpush1.bf16.xpose.msra.mxu0 %v3234_v23  ;;  %v3384_v22 = vpack.c.bf16 %v708_v18, %v704_v17  ;;  %v575_v23 = vld [vmem:[%s4306_s28 + $0x300] sm:$0xff]  ;;  %v584_v27 = vld [vmem:[%s4306_s28 + $0x348] sm:$0xff] }
  0xe5   : > { %3237 = vmatprep.subr.bf16.mxu0 %v3236_v25  ;;  %v703_v25 = vld [vmem:[%s4306_s28 + $0x700] sm:$0xff]  ;;  %v588_v28 = vld [vmem:[%s4306_s28 + $0x368] sm:$0xff] }
  0xe6   : > { %3363 = vmatpush1.bf16.xpose.msra.mxu1 %v3362_v24  ;;  %v579_v24 = vld [vmem:[%s4306_s28 + $0x320] sm:$0xff]  ;;  %v712_v29 = vld [vmem:[%s4306_s28 + $0x748] sm:$0xff]  ;;  %v3260_v33 = vpack.c.bf16 %v588_v28, %v584_v27  ;;  %v498_v27 = vld [vmem:[%s4306_s28 + $0x98] sm:$0xff] }
  0xe7   : > { %3365 = vmatprep.subr.bf16.mxu1 %v3364_v26  ;;  %v707_v26 = vld [vmem:[%s4306_s28 + $0x720] sm:$0xff]  ;;  %v716_v30 = vld [vmem:[%s4306_s28 + $0x768] sm:$0xff]  ;;  %v3258_v31 = vpack.c.bf16 %v579_v24, %v575_v23  ;;  %v489_v23 = vld [vmem:[%s4306_s28 + $0x50] sm:$0xff] }
  0xe8   : > { %v3386_v32 = vpack.c.bf16 %v707_v26, %v703_v25  ;;  %v3388_v34 = vpack.c.bf16 %v716_v30, %v712_v29  ;;  %v592_v39 = vld [vmem:[%s4306_s28 + $0x388] sm:$0xff]  ;;  %v493_v24 = vld [vmem:[%s4306_s28 + $0x70] sm:$0xff]  ;;  %v502_v28 = vld [vmem:[%s4306_s28 + $0xb8] sm:$0xff] }
  0xe9   : > { %v596_v40 = vld [vmem:[%s4306_s28 + $0x3a8] sm:$0xff]  ;;  %v617_v25 = vld [vmem:[%s4306_s28 + $0x450] sm:$0xff]  ;;  %v335_v29 = vld [vmem:[%s4298_s12 + $0x40] sm:$0xff] }
  0xea   : > { %v720_v41 = vld [vmem:[%s4306_s28 + $0x788] sm:$0xff]  ;;  %v3264_v45 = vpack.c.bf16 %v596_v40, %v592_v39  ;;  %v621_v26 = vld [vmem:[%s4306_s28 + $0x470] sm:$0xff]  ;;  %v626_v30 = vld [vmem:[%s4306_s28 + $0x498] sm:$0xff] }
  0xeb   : > { %v724_v42 = vld [vmem:[%s4306_s28 + $0x7a8] sm:$0xff]  ;;  %v497_v39 = vld [vmem:[%s4306_s28 + $0x90] sm:$0xff] }
  0xec   : > { %3239 = vmatpush1.bf16.xpose.msra.mxu0 %v3238_v35  ;;  %v583_v35 = vld [vmem:[%s4306_s28 + $0x340] sm:$0xff]  ;;  %v3392_v46 = vpack.c.bf16 %v724_v42, %v720_v41  ;;  %v600_v51 = vld [vmem:[%s4306_s28 + $0x3c8] sm:$0xff]  ;;  %v501_v40 = vld [vmem:[%s4306_s28 + $0xb0] sm:$0xff] }
  0xed   : > { %3241 = vmatprep.subr.bf16.mxu0 %v3240_v37  ;;  %v711_v37 = vld [vmem:[%s4306_s28 + $0x740] sm:$0xff]  ;;  %v604_v52 = vld [vmem:[%s4306_s28 + $0x3e8] sm:$0xff]  ;;  %v625_v41 = vld [vmem:[%s4306_s28 + $0x490] sm:$0xff] }
  0xee   : > { %3367 = vmatpush1.bf16.xpose.msra.mxu1 %v3366_v36  ;;  %v587_v36 = vld [vmem:[%s4306_s28 + $0x360] sm:$0xff]  ;;  %v728_v53 = vld [vmem:[%s4306_s28 + $0x7c8] sm:$0xff]  ;;  %v3268_v57 = vpack.c.bf16 %v604_v52, %v600_v51  ;;  %v629_v42 = vld [vmem:[%s4306_s28 + $0x4b0] sm:$0xff] }
  0xef   : > { %3369 = vmatprep.subr.bf16.mxu1 %v3368_v38  ;;  %v715_v38 = vld [vmem:[%s4306_s28 + $0x760] sm:$0xff]  ;;  %v3262_v43 = vpack.c.bf16 %v587_v36, %v583_v35  ;;  %v732_v54 = vld [vmem:[%s4306_s28 + $0x7e8] sm:$0xff]  ;;  %v3280_v35 = vpack.c.bf16 %v502_v28, %v498_v27  ;;  %v530_v27 = vld [vmem:[%s4306_s28 + $0x198] sm:$0xff] }
  0xf0   : > { %v3390_v44 = vpack.c.bf16 %v715_v38, %v711_v37  ;;  %v3396_v58 = vpack.c.bf16 %v732_v54, %v728_v53  ;;  %v332_v18 = vld [vmem:[%s4298_s12 + $0x28] sm:$0xff]  ;;  %v339_v37 = vld [vmem:[%s4298_s12 + $0x60] sm:$0xff]  ;;  %v534_v28 = vld [vmem:[%s4306_s28 + $0x1b8] sm:$0xff] }
  0xf1   : > { %v344_v38 = vld [vmem:[%s4298_s12 + $0x88] sm:$0xff]  ;;  %v347_v53 = vld [vmem:[%s4298_s12 + $0xa0] sm:$0xff] }
  0xf2   : > { %v352_v54 = vld [vmem:[%s4298_s12 + $0xc8] sm:$0xff] }
  0xf3   : > { %v356_v0 = vld [vmem:[%s4298_s12 + $0xe8] sm:$0xff] }
  0xf4   : > { %3243 = vmatpush1.bf16.xpose.msra.mxu0 %v3242_v47  ;;  %v591_v47 = vld [vmem:[%s4306_s28 + $0x380] sm:$0xff] }
  0xf5   : > { %3245 = vmatprep.subr.bf16.mxu0 %v3244_v49  ;;  %v719_v49 = vld [vmem:[%s4306_s28 + $0x780] sm:$0xff] }
  0xf6   : > { %3371 = vmatpush1.bf16.xpose.msra.mxu1 %v3370_v48  ;;  %v595_v48 = vld [vmem:[%s4306_s28 + $0x3a0] sm:$0xff] }
  0xf7   : > { %3373 = vmatprep.subr.bf16.mxu1 %v3372_v50  ;;  %v723_v50 = vld [vmem:[%s4306_s28 + $0x7a0] sm:$0xff]  ;;  %v3266_v55 = vpack.c.bf16 %v595_v48, %v591_v47  ;;  %v638_v47 = vld [vmem:[%s4306_s28 + $0x4f8] sm:$0xff]  ;;  %v348_v48 = vld [vmem:[%s4298_s12 + $0xa8] sm:$0xff] }
  0xf8   : > { %v3394_v56 = vpack.c.bf16 %v723_v50, %v719_v49  ;;  %v3282_v49 = vpack.c.bf16 %v501_v40, %v497_v39  ;;  %v3410_v50 = vpack.c.bf16 %v629_v42, %v625_v41  ;;  %v529_v39 = vld [vmem:[%s4306_s28 + $0x190] sm:$0xff] }
  0xf9   : > { %v533_v40 = vld [vmem:[%s4306_s28 + $0x1b0] sm:$0xff] }
  0xfa   : > { %v657_v41 = vld [vmem:[%s4306_s28 + $0x590] sm:$0xff] }
  0xfb   : > { %v661_v42 = vld [vmem:[%s4306_s28 + $0x5b0] sm:$0xff] }
  0xfc   : > { %3247 = vmatpush1.bf16.xpose.msra.mxu0 %v3246_v59  ;;  %v599_v59 = vld [vmem:[%s4306_s28 + $0x3c0] sm:$0xff] }
  0xfd   : > { %3249 = vmatprep.subr.bf16.mxu0 %v3248_v61  ;;  %v727_v61 = vld [vmem:[%s4306_s28 + $0x7c0] sm:$0xff] }
  0xfe   : > { %3375 = vmatpush1.bf16.xpose.msra.mxu1 %v3374_v60  ;;  %v603_v60 = vld [vmem:[%s4306_s28 + $0x3e0] sm:$0xff] }
  0xff   : > { %3377 = vmatprep.subr.bf16.mxu1 %v3376_v62  ;;  %v731_v62 = vld [vmem:[%s4306_s28 + $0x7e0] sm:$0xff]  ;;  %v3270_v3 = vpack.c.bf16 %v603_v60, %v599_v59  ;;  %v514_v59 = vld [vmem:[%s4306_s28 + $0x118] sm:$0xff] }
 0x100   : > { %v3398_v4 = vpack.c.bf16 %v731_v62, %v727_v61  ;;  %v518_v60 = vld [vmem:[%s4306_s28 + $0x138] sm:$0xff]  ;;  %v351_v61 = vld [vmem:[%s4298_s12 + $0xc0] sm:$0xff] }
 0x101   : > { %v642_v62 = vld [vmem:[%s4306_s28 + $0x518] sm:$0xff] }
 0x104   : > { %3251 = vmatpush1.bf16.xpose.msra.mxu0 %v3250_v7  ;;  %v481_v7 = vld [vmem:[%s4306_s28 + $0x10] sm:$0xff] }
 0x105   : > { %3253 = vmatprep.subr.bf16.mxu0 %v3252_v9  ;;  %v609_v9 = vld [vmem:[%s4306_s28 + $0x410] sm:$0xff] }
 0x106   : > { %3379 = vmatpush1.bf16.xpose.msra.mxu1 %v3378_v8  ;;  %v485_v8 = vld [vmem:[%s4306_s28 + $0x30] sm:$0xff] }
 0x107   : > { %3381 = vmatprep.subr.bf16.mxu1 %v3380_v10  ;;  %v613_v10 = vld [vmem:[%s4306_s28 + $0x430] sm:$0xff]  ;;  %v3274_v14 = vpack.c.bf16 %v485_v8, %v481_v7 }
 0x108   : > { %v3402_v17 = vpack.c.bf16 %v613_v10, %v609_v9  ;;  %v513_v7 = vld [vmem:[%s4306_s28 + $0x110] sm:$0xff] }
 0x109   : > { %v517_v8 = vld [vmem:[%s4306_s28 + $0x130] sm:$0xff] }
 0x10a   : > { %v641_v9 = vld [vmem:[%s4306_s28 + $0x510] sm:$0xff] }
 0x10b   : > { %v645_v10 = vld [vmem:[%s4306_s28 + $0x530] sm:$0xff] }
 0x10c   : > { %3255 = vmatpush1.bf16.xpose.msra.mxu0 %v3254_v19  ;;  %v3276_v19 = vpack.c.bf16 %v494_v12, %v490_v11  ;;  %v522_v11 = vld [vmem:[%s4306_s28 + $0x158] sm:$0xff] }
 0x10d   : > { %3257 = vmatprep.subr.bf16.mxu0 %v3256_v21  ;;  %v331_v21 = vld [vmem:[%s4298_s12 + $0x20] sm:$0xff]  ;;  %v526_v12 = vld [vmem:[%s4306_s28 + $0x178] sm:$0xff] }
 0x10e   : > { %3383 = vmatpush1.bf16.xpose.msra.mxu1 %v3382_v20  ;;  %v3404_v20 = vpack.c.bf16 %v622_v16, %v618_v15  ;;  %v654_v15 = vld [vmem:[%s4306_s28 + $0x578] sm:$0xff]  ;;  %v364_v16 = vld [vmem:[%s4298_s12 + $0x128] sm:$0xff] }
 0x10f   : > { %3385 = vmatprep.subr.bf16.mxu1 %v3384_v22  ;;  %v336_v22 = vld [vmem:[%s4298_s12 + $0x48] sm:$0xff] }
 0x114   : > { %3259 = vmatpush1.bf16.xpose.msra.mxu0 %v3258_v31  ;;  %v630_v31 = vld [vmem:[%s4306_s28 + $0x4b8] sm:$0xff] }
 0x115   : > { %3261 = vmatprep.subr.bf16.mxu0 %v3260_v33  ;;  %v3278_v33 = vpack.c.bf16 %v493_v24, %v489_v23  ;;  %v3408_v36 = vpack.c.bf16 %v630_v31, %v626_v30  ;;  %v521_v23 = vld [vmem:[%s4306_s28 + $0x150] sm:$0xff]  ;;  %v658_v30 = vld [vmem:[%s4306_s28 + $0x598] sm:$0xff] }
 0x116   : > { %3387 = vmatpush1.bf16.xpose.msra.mxu1 %v3386_v32  ;;  %v340_v32 = vld [vmem:[%s4298_s12 + $0x68] sm:$0xff]  ;;  %v525_v24 = vld [vmem:[%s4306_s28 + $0x170] sm:$0xff]  ;;  %v662_v31 = vld [vmem:[%s4306_s28 + $0x5b8] sm:$0xff] }
 0x117   : > { %3389 = vmatprep.subr.bf16.mxu1 %v3388_v34  ;;  %v3406_v34 = vpack.c.bf16 %v621_v26, %v617_v25  ;;  %v649_v25 = vld [vmem:[%s4306_s28 + $0x550] sm:$0xff] }
 0x118   : > { %v653_v26 = vld [vmem:[%s4306_s28 + $0x570] sm:$0xff] }
 0x11c   : > { %3263 = vmatpush1.bf16.xpose.msra.mxu0 %v3262_v43  ;;  %v506_v43 = vld [vmem:[%s4306_s28 + $0xd8] sm:$0xff] }
 0x11d   : > { %3265 = vmatprep.subr.bf16.mxu0 %v3264_v45  ;;  %v343_v45 = vld [vmem:[%s4298_s12 + $0x80] sm:$0xff] }
 0x11e   : > { %3391 = vmatpush1.bf16.xpose.msra.mxu1 %v3390_v44  ;;  %v510_v44 = vld [vmem:[%s4306_s28 + $0xf8] sm:$0xff] }
 0x11f   : > { %3393 = vmatprep.subr.bf16.mxu1 %v3392_v46  ;;  %v634_v46 = vld [vmem:[%s4306_s28 + $0x4d8] sm:$0xff]  ;;  %v3284_v51 = vpack.c.bf16 %v510_v44, %v506_v43 }
 0x120   : > { %v3412_v52 = vpack.c.bf16 %v638_v47, %v634_v46  ;;  %v538_v43 = vld [vmem:[%s4306_s28 + $0x1d8] sm:$0xff] }
 0x121   : > { %v542_v44 = vld [vmem:[%s4306_s28 + $0x1f8] sm:$0xff] }
 0x122   : > { %v666_v46 = vld [vmem:[%s4306_s28 + $0x5d8] sm:$0xff] }
 0x123   : > { %v670_v47 = vld [vmem:[%s4306_s28 + $0x5f8] sm:$0xff] }
 0x124   : > { %3267 = vmatpush1.bf16.xpose.msra.mxu0 %v3266_v55  ;;  %v505_v55 = vld [vmem:[%s4306_s28 + $0xd0] sm:$0xff] }
 0x125   : > { %3269 = vmatprep.subr.bf16.mxu0 %v3268_v57  ;;  %v633_v57 = vld [vmem:[%s4306_s28 + $0x4d0] sm:$0xff] }
 0x126   : > { %3395 = vmatpush1.bf16.xpose.msra.mxu1 %v3394_v56  ;;  %v509_v56 = vld [vmem:[%s4306_s28 + $0xf0] sm:$0xff] }
 0x127   : > { %3397 = vmatprep.subr.bf16.mxu1 %v3396_v58  ;;  %v637_v58 = vld [vmem:[%s4306_s28 + $0x4f0] sm:$0xff]  ;;  %v3286_v1 = vpack.c.bf16 %v509_v56, %v505_v55 }
 0x128   : > { %v3414_v2 = vpack.c.bf16 %v637_v58, %v633_v57  ;;  %v537_v55 = vld [vmem:[%s4306_s28 + $0x1d0] sm:$0xff] }
 0x129   : > { %v541_v56 = vld [vmem:[%s4306_s28 + $0x1f0] sm:$0xff] }
 0x12a   : > { %v665_v57 = vld [vmem:[%s4306_s28 + $0x5d0] sm:$0xff] }
 0x12b   : > { %v669_v58 = vld [vmem:[%s4306_s28 + $0x5f0] sm:$0xff] }
 0x12c   : > { %3271 = vmatpush1.bf16.xpose.msra.mxu0 %v3270_v3  ;;  %v3288_v3 = vpack.c.bf16 %v518_v60, %v514_v59  ;;  %v546_v59 = vld [vmem:[%s4306_s28 + $0x218] sm:$0xff] }
 0x12d   : > { %3273 = vmatprep.subr.bf16.mxu0 %v3272_v5  ;;  %v355_v5 = vld [vmem:[%s4298_s12 + $0xe0] sm:$0xff]  ;;  %v550_v60 = vld [vmem:[%s4306_s28 + $0x238] sm:$0xff] }
 0x12e   : > { %3399 = vmatpush1.bf16.xpose.msra.mxu1 %v3398_v4  ;;  %v3416_v4 = vpack.c.bf16 %v646_v63, %v642_v62  ;;  %v674_v62 = vld [vmem:[%s4306_s28 + $0x618] sm:$0xff] }
 0x12f   : > { %3401 = vmatprep.subr.bf16.mxu1 %v3400_v6  ;;  %v360_v6 = vld [vmem:[%s4298_s12 + $0x108] sm:$0xff]  ;;  %v678_v63 = vld [vmem:[%s4306_s28 + $0x638] sm:$0xff] }
 0x133   : > { %800 = vmatmul.mubr.f32.vlgmr.msra.gmra.mrb[0].mxu0 %v327_v13 }
 0x134   : > { %3275 = vmatpush1.bf16.xpose.msra.mxu0 %v3274_v14  ;;  %805 = vmatprep.mubr.f32.mxu0 %v332_v18  ;;  %v650_v14 = vld [vmem:[%s4306_s28 + $0x558] sm:$0xff] }
 0x135   : > { %1386 = vmatmul.mubr.f32.vlgmr.msra.gmra.mrb[0].mxu1 %v327_v13  ;;  %3277 = vmatprep.subr.bf16.mxu0 %v3276_v19  ;;  %v359_v13 = vld [vmem:[%s4298_s12 + $0x100] sm:$0xff]  ;;  %v3292_v19 = vpack.c.bf16 %v526_v12, %v522_v11  ;;  %v554_v11 = vld [vmem:[%s4306_s28 + $0x258] sm:$0xff] }
 0x136   : > { %3403 = vmatpush1.bf16.xpose.msra.mxu1 %v3402_v17  ;;  %1391 = vmatprep.mubr.f32.mxu1 %v332_v18  ;;  %v3290_v17 = vpack.c.bf16 %v517_v8, %v513_v7  ;;  %v3418_v18 = vpack.c.bf16 %v645_v10, %v641_v9  ;;  %v545_v7 = vld [vmem:[%s4306_s28 + $0x210] sm:$0xff]  ;;  %v558_v12 = vld [vmem:[%s4306_s28 + $0x278] sm:$0xff] }
 0x137   : > { %806 = vmatmul.mubr.f32.gmra.mrb[2].mxu0 %v331_v21  ;;  %3405 = vmatprep.subr.bf16.mxu1 %v3404_v20  ;;  %v3420_v20 = vpack.c.bf16 %v654_v15, %v650_v14  ;;  %v549_v8 = vld [vmem:[%s4306_s28 + $0x230] sm:$0xff]  ;;  %v682_v14 = vld [vmem:[%s4306_s28 + $0x658] sm:$0xff] }
 0x138   : > { %811 = vmatprep.mubr.f32.mxu0 %v336_v22  ;;  %v673_v9 = vld [vmem:[%s4306_s28 + $0x610] sm:$0xff]  ;;  %v686_v15 = vld [vmem:[%s4306_s28 + $0x678] sm:$0xff] }
 0x139   : > { %1392 = vmatmul.mubr.f32.gmra.mrb[2].mxu1 %v331_v21  ;;  %v363_v21 = vld [vmem:[%s4298_s12 + $0x120] sm:$0xff]  ;;  %v677_v10 = vld [vmem:[%s4306_s28 + $0x630] sm:$0xff] }
 0x13a   : > { %1397 = vmatprep.mubr.f32.mxu1 %v336_v22  ;;  %v368_v22 = vld [vmem:[%s4298_s12 + $0x148] sm:$0xff] }
 0x13b   : > { %812 = vmatmul.mubr.f32.gmra.mrb[4].mxu0 %v335_v29 }
 0x13c   : > { %817 = vmatprep.mubr.f32.mxu0 %v340_v32  ;;  %3279 = vmatpush1.bf16.xpose.msra.mxu0 %v3278_v33  ;;  %v3294_v33 = vpack.c.bf16 %v525_v24, %v521_v23  ;;  %v553_v23 = vld [vmem:[%s4306_s28 + $0x250] sm:$0xff] }
 0x13d   : > { %1398 = vmatmul.mubr.f32.gmra.mrb[4].mxu1 %v335_v29  ;;  %3281 = vmatprep.subr.bf16.mxu0 %v3280_v35  ;;  %v367_v29 = vld [vmem:[%s4298_s12 + $0x140] sm:$0xff]  ;;  %v3296_v35 = vpack.c.bf16 %v534_v28, %v530_v27  ;;  %v557_v24 = vld [vmem:[%s4306_s28 + $0x270] sm:$0xff]  ;;  %v562_v27 = vld [vmem:[%s4306_s28 + $0x298] sm:$0xff] }
 0x13e   : > { %1403 = vmatprep.mubr.f32.mxu1 %v340_v32  ;;  %3407 = vmatpush1.bf16.xpose.msra.mxu1 %v3406_v34  ;;  %v372_v32 = vld [vmem:[%s4298_s12 + $0x168] sm:$0xff]  ;;  %v3422_v34 = vpack.c.bf16 %v653_v26, %v649_v25  ;;  %v681_v25 = vld [vmem:[%s4306_s28 + $0x650] sm:$0xff]  ;;  %v566_v28 = vld [vmem:[%s4306_s28 + $0x2b8] sm:$0xff] }
 0x13f   : > { %818 = vmatmul.mubr.f32.gmra.mrb[6].mxu0 %v339_v37  ;;  %3409 = vmatprep.subr.bf16.mxu1 %v3408_v36  ;;  %v3424_v36 = vpack.c.bf16 %v662_v31, %v658_v30  ;;  %v685_v26 = vld [vmem:[%s4306_s28 + $0x670] sm:$0xff]  ;;  %v690_v30 = vld [vmem:[%s4306_s28 + $0x698] sm:$0xff] }
 0x140   : > { %823 = vmatprep.mubr.f32.mxu0 %v344_v38  ;;  %v694_v31 = vld [vmem:[%s4306_s28 + $0x6b8] sm:$0xff] }
 0x141   : > { %1404 = vmatmul.mubr.f32.gmra.mrb[6].mxu1 %v339_v37  ;;  %v371_v37 = vld [vmem:[%s4298_s12 + $0x160] sm:$0xff] }
 0x142   : > { %1409 = vmatprep.mubr.f32.mxu1 %v344_v38  ;;  %v376_v38 = vld [vmem:[%s4298_s12 + $0x188] sm:$0xff] }
 0x143   : > { %824 = vmatmul.mubr.f32.gmra.mrb[8].mxu0 %v343_v45 }
 0x144   : > { %829 = vmatprep.mubr.f32.mxu0 %v348_v48  ;;  %3283 = vmatpush1.bf16.xpose.msra.mxu0 %v3282_v49  ;;  %v3298_v49 = vpack.c.bf16 %v533_v40, %v529_v39  ;;  %v561_v39 = vld [vmem:[%s4306_s28 + $0x290] sm:$0xff] }
 0x145   : > { %1410 = vmatmul.mubr.f32.gmra.mrb[8].mxu1 %v343_v45  ;;  %3285 = vmatprep.subr.bf16.mxu0 %v3284_v51  ;;  %v375_v45 = vld [vmem:[%s4298_s12 + $0x180] sm:$0xff]  ;;  %v3300_v51 = vpack.c.bf16 %v542_v44, %v538_v43  ;;  %v565_v40 = vld [vmem:[%s4306_s28 + $0x2b0] sm:$0xff]  ;;  %v570_v43 = vld [vmem:[%s4306_s28 + $0x2d8] sm:$0xff] }
 0x146   : > { %1415 = vmatprep.mubr.f32.mxu1 %v348_v48  ;;  %3411 = vmatpush1.bf16.xpose.msra.mxu1 %v3410_v50  ;;  %v380_v48 = vld [vmem:[%s4298_s12 + $0x1a8] sm:$0xff]  ;;  %v3426_v50 = vpack.c.bf16 %v661_v42, %v657_v41  ;;  %v689_v41 = vld [vmem:[%s4306_s28 + $0x690] sm:$0xff]  ;;  %v574_v44 = vld [vmem:[%s4306_s28 + $0x2f8] sm:$0xff] }
 0x147   : > { %830 = vmatmul.mubr.f32.gmra.mrb[10].mxu0 %v347_v53  ;;  %3413 = vmatprep.subr.bf16.mxu1 %v3412_v52  ;;  %v3428_v52 = vpack.c.bf16 %v670_v47, %v666_v46  ;;  %v693_v42 = vld [vmem:[%s4306_s28 + $0x6b0] sm:$0xff]  ;;  %v698_v46 = vld [vmem:[%s4306_s28 + $0x6d8] sm:$0xff] }
 0x148   : > { %835 = vmatprep.mubr.f32.mxu0 %v352_v54  ;;  %v702_v47 = vld [vmem:[%s4306_s28 + $0x6f8] sm:$0xff] }
 0x149   : > { %1416 = vmatmul.mubr.f32.gmra.mrb[10].mxu1 %v347_v53  ;;  %v379_v53 = vld [vmem:[%s4298_s12 + $0x1a0] sm:$0xff] }
 0x14a   : > { %1421 = vmatprep.mubr.f32.mxu1 %v352_v54  ;;  %v384_v54 = vld [vmem:[%s4298_s12 + $0x1c8] sm:$0xff] }
 0x14b   : > { %836 = vmatmul.mubr.f32.gmra.mrb[12].mxu0 %v351_v61 }
 0x14c   : > { %841 = vmatprep.mubr.f32.mxu0 %v356_v0  ;;  %3287 = vmatpush1.bf16.xpose.msra.mxu0 %v3286_v1  ;;  %v3302_v1 = vpack.c.bf16 %v541_v56, %v537_v55  ;;  %v569_v55 = vld [vmem:[%s4306_s28 + $0x2d0] sm:$0xff] }
 0x14d   : > { %1422 = vmatmul.mubr.f32.gmra.mrb[12].mxu1 %v351_v61  ;;  %3289 = vmatprep.subr.bf16.mxu0 %v3288_v3  ;;  %v383_v61 = vld [vmem:[%s4298_s12 + $0x1c0] sm:$0xff]  ;;  %v3304_v3 = vpack.c.bf16 %v550_v60, %v546_v59  ;;  %v573_v56 = vld [vmem:[%s4306_s28 + $0x2f0] sm:$0xff]  ;;  %v578_v59 = vld [vmem:[%s4306_s28 + $0x318] sm:$0xff] }
 0x14e   : > { %1427 = vmatprep.mubr.f32.mxu1 %v356_v0  ;;  %3415 = vmatpush1.bf16.xpose.msra.mxu1 %v3414_v2  ;;  %v388_v0 = vld [vmem:[%s4298_s12 + $0x1e8] sm:$0xff]  ;;  %v3430_v2 = vpack.c.bf16 %v669_v58, %v665_v57  ;;  %v697_v57 = vld [vmem:[%s4306_s28 + $0x6d0] sm:$0xff]  ;;  %v582_v60 = vld [vmem:[%s4306_s28 + $0x338] sm:$0xff] }
 0x14f   : > { %842 = vmatmul.mubr.f32.gmra.mrb[14].mxu0 %v355_v5  ;;  %3417 = vmatprep.subr.bf16.mxu1 %v3416_v4  ;;  %v3432_v4 = vpack.c.bf16 %v678_v63, %v674_v62  ;;  %v701_v58 = vld [vmem:[%s4306_s28 + $0x6f0] sm:$0xff]  ;;  %v706_v62 = vld [vmem:[%s4306_s28 + $0x718] sm:$0xff] }
 0x150   : > { %847 = vmatprep.mubr.f32.mxu0 %v360_v6  ;;  %v710_v63 = vld [vmem:[%s4306_s28 + $0x738] sm:$0xff] }
 0x151   : > { %1428 = vmatmul.mubr.f32.gmra.mrb[14].mxu1 %v355_v5  ;;  %v387_v5 = vld [vmem:[%s4298_s12 + $0x1e0] sm:$0xff] }
 0x152   : > { %1433 = vmatprep.mubr.f32.mxu1 %v360_v6  ;;  %v392_v6 = vld [vmem:[%s4298_s12 + $0x208] sm:$0xff] }
 0x153   : > { %848 = vmatmul.mubr.f32.gmra.mrb[16].mxu0 %v359_v13 }
 0x154   : > { %853 = vmatprep.mubr.f32.mxu0 %v364_v16  ;;  %3291 = vmatpush1.bf16.xpose.msra.mxu0 %v3290_v17  ;;  %v3306_v17 = vpack.c.bf16 %v549_v8, %v545_v7  ;;  %v577_v7 = vld [vmem:[%s4306_s28 + $0x310] sm:$0xff] }
 0x155   : > { %1434 = vmatmul.mubr.f32.gmra.mrb[16].mxu1 %v359_v13  ;;  %3293 = vmatprep.subr.bf16.mxu0 %v3292_v19  ;;  %v391_v13 = vld [vmem:[%s4298_s12 + $0x200] sm:$0xff]  ;;  %v3308_v19 = vpack.c.bf16 %v558_v12, %v554_v11  ;;  %v581_v8 = vld [vmem:[%s4306_s28 + $0x330] sm:$0xff]  ;;  %v586_v11 = vld [vmem:[%s4306_s28 + $0x358] sm:$0xff] }
 0x156   : > { %1439 = vmatprep.mubr.f32.mxu1 %v364_v16  ;;  %3419 = vmatpush1.bf16.xpose.msra.mxu1 %v3418_v18  ;;  %v396_v16 = vld [vmem:[%s4298_s12 + $0x228] sm:$0xff]  ;;  %v3434_v18 = vpack.c.bf16 %v677_v10, %v673_v9  ;;  %v705_v9 = vld [vmem:[%s4306_s28 + $0x710] sm:$0xff]  ;;  %v590_v12 = vld [vmem:[%s4306_s28 + $0x378] sm:$0xff] }
 0x157   : > { %854 = vmatmul.mubr.f32.gmra.mrb[18].mxu0 %v363_v21  ;;  %3421 = vmatprep.subr.bf16.mxu1 %v3420_v20  ;;  %v3436_v20 = vpack.c.bf16 %v686_v15, %v682_v14  ;;  %v709_v10 = vld [vmem:[%s4306_s28 + $0x730] sm:$0xff]  ;;  %v714_v14 = vld [vmem:[%s4306_s28 + $0x758] sm:$0xff] }
 0x158   : > { %859 = vmatprep.mubr.f32.mxu0 %v368_v22  ;;  %v718_v15 = vld [vmem:[%s4306_s28 + $0x778] sm:$0xff] }
 0x159   : > { %1440 = vmatmul.mubr.f32.gmra.mrb[18].mxu1 %v363_v21  ;;  %v395_v21 = vld [vmem:[%s4298_s12 + $0x220] sm:$0xff] }
 0x15a   : > { %1445 = vmatprep.mubr.f32.mxu1 %v368_v22  ;;  %v400_v22 = vld [vmem:[%s4298_s12 + $0x248] sm:$0xff] }
 0x15b   : > { %860 = vmatmul.mubr.f32.gmra.mrb[20].mxu0 %v367_v29 }
 0x15c   : > { %865 = vmatprep.mubr.f32.mxu0 %v372_v32  ;;  %3295 = vmatpush1.bf16.xpose.msra.mxu0 %v3294_v33  ;;  %v3310_v33 = vpack.c.bf16 %v557_v24, %v553_v23  ;;  %v585_v23 = vld [vmem:[%s4306_s28 + $0x350] sm:$0xff] }
 0x15d   : > { %1446 = vmatmul.mubr.f32.gmra.mrb[20].mxu1 %v367_v29  ;;  %3297 = vmatprep.subr.bf16.mxu0 %v3296_v35  ;;  %v399_v29 = vld [vmem:[%s4298_s12 + $0x240] sm:$0xff]  ;;  %v3312_v35 = vpack.c.bf16 %v566_v28, %v562_v27  ;;  %v589_v24 = vld [vmem:[%s4306_s28 + $0x370] sm:$0xff]  ;;  %v594_v27 = vld [vmem:[%s4306_s28 + $0x398] sm:$0xff] }
 0x15e   : > { %1451 = vmatprep.mubr.f32.mxu1 %v372_v32  ;;  %3423 = vmatpush1.bf16.xpose.msra.mxu1 %v3422_v34  ;;  %v404_v32 = vld [vmem:[%s4298_s12 + $0x268] sm:$0xff]  ;;  %v3438_v34 = vpack.c.bf16 %v685_v26, %v681_v25  ;;  %v713_v25 = vld [vmem:[%s4306_s28 + $0x750] sm:$0xff]  ;;  %v598_v28 = vld [vmem:[%s4306_s28 + $0x3b8] sm:$0xff] }
 0x15f   : > { %866 = vmatmul.mubr.f32.gmra.mrb[22].mxu0 %v371_v37  ;;  %3425 = vmatprep.subr.bf16.mxu1 %v3424_v36  ;;  %v3440_v36 = vpack.c.bf16 %v694_v31, %v690_v30  ;;  %v717_v26 = vld [vmem:[%s4306_s28 + $0x770] sm:$0xff]  ;;  %v722_v30 = vld [vmem:[%s4306_s28 + $0x798] sm:$0xff] }
 0x160   : > { %871 = vmatprep.mubr.f32.mxu0 %v376_v38  ;;  %v726_v31 = vld [vmem:[%s4306_s28 + $0x7b8] sm:$0xff] }
 0x161   : > { %1452 = vmatmul.mubr.f32.gmra.mrb[22].mxu1 %v371_v37  ;;  %v403_v37 = vld [vmem:[%s4298_s12 + $0x260] sm:$0xff] }
 0x162   : > { %1457 = vmatprep.mubr.f32.mxu1 %v376_v38  ;;  %v408_v38 = vld [vmem:[%s4298_s12 + $0x288] sm:$0xff] }
 0x163   : > { %872 = vmatmul.mubr.f32.gmra.mrb[24].mxu0 %v375_v45 }
 0x164   : > { %877 = vmatprep.mubr.f32.mxu0 %v380_v48  ;;  %3299 = vmatpush1.bf16.xpose.msra.mxu0 %v3298_v49  ;;  %v3314_v49 = vpack.c.bf16 %v565_v40, %v561_v39  ;;  %v593_v39 = vld [vmem:[%s4306_s28 + $0x390] sm:$0xff] }
 0x165   : > { %1458 = vmatmul.mubr.f32.gmra.mrb[24].mxu1 %v375_v45  ;;  %3301 = vmatprep.subr.bf16.mxu0 %v3300_v51  ;;  %v407_v45 = vld [vmem:[%s4298_s12 + $0x280] sm:$0xff]  ;;  %v3316_v51 = vpack.c.bf16 %v574_v44, %v570_v43  ;;  %v597_v40 = vld [vmem:[%s4306_s28 + $0x3b0] sm:$0xff]  ;;  %v602_v43 = vld [vmem:[%s4306_s28 + $0x3d8] sm:$0xff] }
 0x166   : > { %1463 = vmatprep.mubr.f32.mxu1 %v380_v48  ;;  %3427 = vmatpush1.bf16.xpose.msra.mxu1 %v3426_v50  ;;  %v412_v48 = vld [vmem:[%s4298_s12 + $0x2a8] sm:$0xff]  ;;  %v3442_v50 = vpack.c.bf16 %v693_v42, %v689_v41  ;;  %v721_v41 = vld [vmem:[%s4306_s28 + $0x790] sm:$0xff]  ;;  %v606_v44 = vld [vmem:[%s4306_s28 + $0x3f8] sm:$0xff] }
 0x167   : > { %878 = vmatmul.mubr.f32.gmra.mrb[26].mxu0 %v379_v53  ;;  %3429 = vmatprep.subr.bf16.mxu1 %v3428_v52  ;;  %v3444_v52 = vpack.c.bf16 %v702_v47, %v698_v46  ;;  %v725_v42 = vld [vmem:[%s4306_s28 + $0x7b0] sm:$0xff]  ;;  %v730_v46 = vld [vmem:[%s4306_s28 + $0x7d8] sm:$0xff] }
 0x168   : > { %883 = vmatprep.mubr.f32.mxu0 %v384_v54  ;;  %v734_v47 = vld [vmem:[%s4306_s28 + $0x7f8] sm:$0xff] }
 0x169   : > { %1464 = vmatmul.mubr.f32.gmra.mrb[26].mxu1 %v379_v53  ;;  %v411_v53 = vld [vmem:[%s4298_s12 + $0x2a0] sm:$0xff] }
 0x16a   : > { %1469 = vmatprep.mubr.f32.mxu1 %v384_v54  ;;  %v416_v54 = vld [vmem:[%s4298_s12 + $0x2c8] sm:$0xff] }
 0x16b   : > { %884 = vmatmul.mubr.f32.gmra.mrb[28].mxu0 %v383_v61 }
 0x16c   : > { %889 = vmatprep.mubr.f32.mxu0 %v388_v0  ;;  %3303 = vmatpush1.bf16.xpose.msra.mxu0 %v3302_v1  ;;  %v3318_v1 = vpack.c.bf16 %v573_v56, %v569_v55  ;;  %v601_v55 = vld [vmem:[%s4306_s28 + $0x3d0] sm:$0xff] }
 0x16d   : > { %1470 = vmatmul.mubr.f32.gmra.mrb[28].mxu1 %v383_v61  ;;  %3305 = vmatprep.subr.bf16.mxu0 %v3304_v3  ;;  %v415_v61 = vld [vmem:[%s4298_s12 + $0x2c0] sm:$0xff]  ;;  %v3320_v3 = vpack.c.bf16 %v582_v60, %v578_v59  ;;  %v605_v56 = vld [vmem:[%s4306_s28 + $0x3f0] sm:$0xff]  ;;  %v452_v60 = vld [vmem:[%s4298_s12 + $0x3e8] sm:$0xff] }
 0x16e   : > { %1475 = vmatprep.mubr.f32.mxu1 %v388_v0  ;;  %3431 = vmatpush1.bf16.xpose.msra.mxu1 %v3430_v2  ;;  %v420_v0 = vld [vmem:[%s4298_s12 + $0x2e8] sm:$0xff]  ;;  %v3446_v2 = vpack.c.bf16 %v701_v58, %v697_v57  ;;  %v729_v57 = vld [vmem:[%s4306_s28 + $0x7d0] sm:$0xff]  ;;  %v447_v59 = vld [vmem:[%s4298_s12 + $0x3c0] sm:$0xff] }
 0x16f   : > { %890 = vmatmul.mubr.f32.gmra.mrb[30].mxu0 %v387_v5  ;;  %3433 = vmatprep.subr.bf16.mxu1 %v3432_v4  ;;  %v3448_v4 = vpack.c.bf16 %v710_v63, %v706_v62  ;;  %v733_v58 = vld [vmem:[%s4306_s28 + $0x7f0] sm:$0xff]  ;;  %v451_v63 = vld [vmem:[%s4298_s12 + $0x3e0] sm:$0xff] }
 0x170   : > { %895 = vmatprep.mubr.f32.mxu0 %v392_v6  ;;  %v3462_v62 = vpack.c.bf16 %v733_v58, %v729_v57  ;;  %v417_v57 = vld [vmem:[%s4298_s12 + $0x2d0] sm:$0xff]  ;;  %v422_v58 = vld [vmem:[%s4298_s12 + $0x2f8] sm:$0xff] }
 0x171   : > { %1476 = vmatmul.mubr.f32.gmra.mrb[30].mxu1 %v387_v5  ;;  %v419_v5 = vld [vmem:[%s4298_s12 + $0x2e0] sm:$0xff] }
 0x172   : > { %1481 = vmatprep.mubr.f32.mxu1 %v392_v6  ;;  %v424_v6 = vld [vmem:[%s4298_s12 + $0x308] sm:$0xff] }
 0x173   : > { %896 = vmatmul.mubr.f32.gmra.mrb[32].mxu0 %v391_v13 }
 0x174   : > { %901 = vmatprep.mubr.f32.mxu0 %v396_v16  ;;  %3307 = vmatpush1.bf16.xpose.msra.mxu0 %v3306_v17  ;;  %v3322_v17 = vpack.c.bf16 %v581_v8, %v577_v7  ;;  %v467_v7 = vld [vmem:[%s4298_s12 + $0x460] sm:$0xff]  ;;  %v472_v8 = vld [vmem:[%s4298_s12 + $0x488] sm:$0xff] }
 0x175   : > { %1482 = vmatmul.mubr.f32.gmra.mrb[32].mxu1 %v391_v13  ;;  %3309 = vmatprep.subr.bf16.mxu0 %v3308_v19  ;;  %v423_v13 = vld [vmem:[%s4298_s12 + $0x300] sm:$0xff]  ;;  %v3324_v19 = vpack.c.bf16 %v590_v12, %v586_v11  ;;  %v330_v12 = vld [vmem:[%s4298_s12 + $0x18] sm:$0xff] }
 0x176   : > { %1487 = vmatprep.mubr.f32.mxu1 %v396_v16  ;;  %3435 = vmatpush1.bf16.xpose.msra.mxu1 %v3434_v18  ;;  %v428_v16 = vld [vmem:[%s4298_s12 + $0x328] sm:$0xff]  ;;  %v3450_v18 = vpack.c.bf16 %v709_v10, %v705_v9  ;;  %v471_v9 = vld [vmem:[%s4298_s12 + $0x480] sm:$0xff] }
 0x177   : > { %902 = vmatmul.mubr.f32.gmra.mrb[34].mxu0 %v395_v21  ;;  %3437 = vmatprep.subr.bf16.mxu1 %v3436_v20  ;;  %v3452_v20 = vpack.c.bf16 %v718_v15, %v714_v14  ;;  %v476_v10 = vld [vmem:[%s4298_s12 + $0x4a8] sm:$0xff]  ;;  %v475_v11 = vld [vmem:[%s4298_s12 + $0x4a0] sm:$0xff]  ;;  %v334_v14 = vld [vmem:[%s4298_s12 + $0x38] sm:$0xff] }
 0x178   : > { %907 = vmatprep.mubr.f32.mxu0 %v400_v22  ;;  %v333_v15 = vld [vmem:[%s4298_s12 + $0x30] sm:$0xff] }
 0x179   : > { %1488 = vmatmul.mubr.f32.gmra.mrb[34].mxu1 %v395_v21  ;;  %v427_v21 = vld [vmem:[%s4298_s12 + $0x320] sm:$0xff] }
 0x17a   : > { %1493 = vmatprep.mubr.f32.mxu1 %v400_v22  ;;  %v432_v22 = vld [vmem:[%s4298_s12 + $0x348] sm:$0xff] }
 0x17b   : > { %908 = vmatmul.mubr.f32.gmra.mrb[36].mxu0 %v399_v29 }
 0x17c   : > { %913 = vmatprep.mubr.f32.mxu0 %v404_v32  ;;  %3311 = vmatpush1.bf16.xpose.msra.mxu0 %v3310_v33  ;;  %v3326_v33 = vpack.c.bf16 %v589_v24, %v585_v23  ;;  %v349_v23 = vld [vmem:[%s4298_s12 + $0xb0] sm:$0xff]  ;;  %v354_v24 = vld [vmem:[%s4298_s12 + $0xd8] sm:$0xff] }
 0x17d   : > { %1494 = vmatmul.mubr.f32.gmra.mrb[36].mxu1 %v399_v29  ;;  %3313 = vmatprep.subr.bf16.mxu0 %v3312_v35  ;;  %v431_v29 = vld [vmem:[%s4298_s12 + $0x340] sm:$0xff]  ;;  %v3328_v35 = vpack.c.bf16 %v598_v28, %v594_v27  ;;  %v357_v27 = vld [vmem:[%s4298_s12 + $0xf0] sm:$0xff]  ;;  %v362_v28 = vld [vmem:[%s4298_s12 + $0x118] sm:$0xff] }
 0x17e   : > { %1499 = vmatprep.mubr.f32.mxu1 %v404_v32  ;;  %3439 = vmatpush1.bf16.xpose.msra.mxu1 %v3438_v34  ;;  %v436_v32 = vld [vmem:[%s4298_s12 + $0x368] sm:$0xff]  ;;  %v3454_v34 = vpack.c.bf16 %v717_v26, %v713_v25  ;;  %v353_v25 = vld [vmem:[%s4298_s12 + $0xd0] sm:$0xff]  ;;  %v358_v26 = vld [vmem:[%s4298_s12 + $0xf8] sm:$0xff] }
 0x17f   : > { %914 = vmatmul.mubr.f32.gmra.mrb[38].mxu0 %v403_v37  ;;  %3441 = vmatprep.subr.bf16.mxu1 %v3440_v36  ;;  %v3456_v36 = vpack.c.bf16 %v726_v31, %v722_v30  ;;  %v366_v30 = vld [vmem:[%s4298_s12 + $0x138] sm:$0xff]  ;;  %v365_v31 = vld [vmem:[%s4298_s12 + $0x130] sm:$0xff] }
 0x180   : > { %919 = vmatprep.mubr.f32.mxu0 %v408_v38 }
 0x181   : > { %1500 = vmatmul.mubr.f32.gmra.mrb[38].mxu1 %v403_v37  ;;  %v435_v37 = vld [vmem:[%s4298_s12 + $0x360] sm:$0xff] }
 0x182   : > { %1505 = vmatprep.mubr.f32.mxu1 %v408_v38  ;;  %v440_v38 = vld [vmem:[%s4298_s12 + $0x388] sm:$0xff] }
 0x183   : > { %920 = vmatmul.mubr.f32.gmra.mrb[40].mxu0 %v407_v45 }
 0x184   : > { %925 = vmatprep.mubr.f32.mxu0 %v412_v48  ;;  %3315 = vmatpush1.bf16.xpose.msra.mxu0 %v3314_v49  ;;  %v3330_v49 = vpack.c.bf16 %v597_v40, %v593_v39  ;;  %v381_v39 = vld [vmem:[%s4298_s12 + $0x1b0] sm:$0xff]  ;;  %v386_v40 = vld [vmem:[%s4298_s12 + $0x1d8] sm:$0xff] }
 0x185   : > { %1506 = vmatmul.mubr.f32.gmra.mrb[40].mxu1 %v407_v45  ;;  %3317 = vmatprep.subr.bf16.mxu0 %v3316_v51  ;;  %v439_v45 = vld [vmem:[%s4298_s12 + $0x380] sm:$0xff]  ;;  %v3332_v51 = vpack.c.bf16 %v606_v44, %v602_v43  ;;  %v389_v43 = vld [vmem:[%s4298_s12 + $0x1f0] sm:$0xff]  ;;  %v394_v44 = vld [vmem:[%s4298_s12 + $0x218] sm:$0xff] }
 0x186   : > { %1511 = vmatprep.mubr.f32.mxu1 %v412_v48  ;;  %3443 = vmatpush1.bf16.xpose.msra.mxu1 %v3442_v50  ;;  %v444_v48 = vld [vmem:[%s4298_s12 + $0x3a8] sm:$0xff]  ;;  %v3458_v50 = vpack.c.bf16 %v725_v42, %v721_v41  ;;  %v385_v41 = vld [vmem:[%s4298_s12 + $0x1d0] sm:$0xff]  ;;  %v390_v42 = vld [vmem:[%s4298_s12 + $0x1f8] sm:$0xff] }
 0x187   : > { %926 = vmatmul.mubr.f32.gmra.mrb[42].mxu0 %v411_v53  ;;  %3445 = vmatprep.subr.bf16.mxu1 %v3444_v52  ;;  %v3460_v52 = vpack.c.bf16 %v734_v47, %v730_v46  ;;  %v398_v46 = vld [vmem:[%s4298_s12 + $0x238] sm:$0xff]  ;;  %v397_v47 = vld [vmem:[%s4298_s12 + $0x230] sm:$0xff] }
 0x188   : > { %931 = vmatprep.mubr.f32.mxu0 %v416_v54 }
 0x189   : > { %1512 = vmatmul.mubr.f32.gmra.mrb[42].mxu1 %v411_v53  ;;  %v443_v53 = vld [vmem:[%s4298_s12 + $0x3a0] sm:$0xff] }
 0x18a   : > { %1517 = vmatprep.mubr.f32.mxu1 %v416_v54  ;;  %v448_v54 = vld [vmem:[%s4298_s12 + $0x3c8] sm:$0xff] }
 0x18b   : > { %932 = vmatmul.mubr.f32.gmra.mrb[44].mxu0 %v415_v61 }
 0x18c   : > { %937 = vmatprep.mubr.f32.mxu0 %v420_v0  ;;  %3319 = vmatpush1.bf16.xpose.msra.mxu0 %v3318_v1  ;;  %v455_v1 = vld [vmem:[%s4298_s12 + $0x400] sm:$0xff] }
 0x18d   : > { %1518 = vmatmul.mubr.f32.gmra.mrb[44].mxu1 %v415_v61  ;;  %3321 = vmatprep.subr.bf16.mxu0 %v3320_v3  ;;  %v3334_v61 = vpack.c.bf16 %v605_v56, %v601_v55  ;;  %v459_v3 = vld [vmem:[%s4298_s12 + $0x420] sm:$0xff]  ;;  %v413_v55 = vld [vmem:[%s4298_s12 + $0x2b0] sm:$0xff]  ;;  %v418_v56 = vld [vmem:[%s4298_s12 + $0x2d8] sm:$0xff] }
 0x18e   : > { %1523 = vmatprep.mubr.f32.mxu1 %v420_v0  ;;  %3447 = vmatpush1.bf16.xpose.msra.mxu1 %v3446_v2  ;;  %v456_v0 = vld [vmem:[%s4298_s12 + $0x408] sm:$0xff] }
 0x18f   : > { %938 = vmatmul.mubr.f32.gmra.mrb[46].mxu0 %v419_v5  ;;  %3449 = vmatprep.subr.bf16.mxu1 %v3448_v4  ;;  %v460_v2 = vld [vmem:[%s4298_s12 + $0x428] sm:$0xff] }
 0x190   : > { %943 = vmatprep.mubr.f32.mxu0 %v424_v6  ;;  %v464_v4 = vld [vmem:[%s4298_s12 + $0x448] sm:$0xff] }
 0x191   : > { %1524 = vmatmul.mubr.f32.gmra.mrb[46].mxu1 %v419_v5  ;;  %v463_v5 = vld [vmem:[%s4298_s12 + $0x440] sm:$0xff] }
 0x192   : > { %1529 = vmatprep.mubr.f32.mxu1 %v424_v6  ;;  %v468_v6 = vld [vmem:[%s4298_s12 + $0x468] sm:$0xff] }
 0x193   : > { %944 = vmatmul.mubr.f32.gmra.mrb[48].mxu0 %v423_v13 }
 0x194   : > { %949 = vmatprep.mubr.f32.mxu0 %v428_v16  ;;  %3323 = vmatpush1.bf16.xpose.msra.mxu0 %v3322_v17  ;;  %v337_v17 = vld [vmem:[%s4298_s12 + $0x50] sm:$0xff] }
 0x195   : > { %1530 = vmatmul.mubr.f32.gmra.mrb[48].mxu1 %v423_v13  ;;  %3325 = vmatprep.subr.bf16.mxu0 %v3324_v19  ;;  %v329_v13 = vld [vmem:[%s4298_s12 + $0x10] sm:$0xff] }
 0x196   : > { %1535 = vmatprep.mubr.f32.mxu1 %v428_v16  ;;  %3451 = vmatpush1.bf16.xpose.msra.mxu1 %v3450_v18  ;;  %v338_v16 = vld [vmem:[%s4298_s12 + $0x58] sm:$0xff]  ;;  %v341_v19 = vld [vmem:[%s4298_s12 + $0x70] sm:$0xff] }
 0x197   : > { %950 = vmatmul.mubr.f32.gmra.mrb[50].mxu0 %v427_v21  ;;  %3453 = vmatprep.subr.bf16.mxu1 %v3452_v20  ;;  %v342_v18 = vld [vmem:[%s4298_s12 + $0x78] sm:$0xff] }
 0x198   : > { %955 = vmatprep.mubr.f32.mxu0 %v432_v22  ;;  %v346_v20 = vld [vmem:[%s4298_s12 + $0x98] sm:$0xff] }
 0x199   : > { %1536 = vmatmul.mubr.f32.gmra.mrb[50].mxu1 %v427_v21  ;;  %v345_v21 = vld [vmem:[%s4298_s12 + $0x90] sm:$0xff] }
 0x19a   : > { %1541 = vmatprep.mubr.f32.mxu1 %v432_v22  ;;  %v350_v22 = vld [vmem:[%s4298_s12 + $0xb8] sm:$0xff] }
 0x19b   : > { %956 = vmatmul.mubr.f32.gmra.mrb[52].mxu0 %v431_v29 }
 0x19c   : > { %961 = vmatprep.mubr.f32.mxu0 %v436_v32  ;;  %3327 = vmatpush1.bf16.xpose.msra.mxu0 %v3326_v33  ;;  %v369_v33 = vld [vmem:[%s4298_s12 + $0x150] sm:$0xff] }
 0x19d   : > { %1542 = vmatmul.mubr.f32.gmra.mrb[52].mxu1 %v431_v29  ;;  %3329 = vmatprep.subr.bf16.mxu0 %v3328_v35  ;;  %v361_v29 = vld [vmem:[%s4298_s12 + $0x110] sm:$0xff] }
 0x19e   : > { %1547 = vmatprep.mubr.f32.mxu1 %v436_v32  ;;  %3455 = vmatpush1.bf16.xpose.msra.mxu1 %v3454_v34  ;;  %v370_v32 = vld [vmem:[%s4298_s12 + $0x158] sm:$0xff]  ;;  %v373_v35 = vld [vmem:[%s4298_s12 + $0x170] sm:$0xff] }
 0x19f   : > { %962 = vmatmul.mubr.f32.gmra.mrb[54].mxu0 %v435_v37  ;;  %3457 = vmatprep.subr.bf16.mxu1 %v3456_v36  ;;  %v374_v34 = vld [vmem:[%s4298_s12 + $0x178] sm:$0xff] }
 0x1a0   : > { %967 = vmatprep.mubr.f32.mxu0 %v440_v38  ;;  %v378_v36 = vld [vmem:[%s4298_s12 + $0x198] sm:$0xff] }
 0x1a1   : > { %1548 = vmatmul.mubr.f32.gmra.mrb[54].mxu1 %v435_v37  ;;  %v377_v37 = vld [vmem:[%s4298_s12 + $0x190] sm:$0xff] }
 0x1a2   : > { %1553 = vmatprep.mubr.f32.mxu1 %v440_v38  ;;  %v382_v38 = vld [vmem:[%s4298_s12 + $0x1b8] sm:$0xff] }
 0x1a3   : > { %968 = vmatmul.mubr.f32.gmra.mrb[56].mxu0 %v439_v45 }
 0x1a4   : > { %973 = vmatprep.mubr.f32.mxu0 %v444_v48  ;;  %3331 = vmatpush1.bf16.xpose.msra.mxu0 %v3330_v49  ;;  %v401_v49 = vld [vmem:[%s4298_s12 + $0x250] sm:$0xff] }
 0x1a5   : > { %1554 = vmatmul.mubr.f32.gmra.mrb[56].mxu1 %v439_v45  ;;  %3333 = vmatprep.subr.bf16.mxu0 %v3332_v51  ;;  %v393_v45 = vld [vmem:[%s4298_s12 + $0x210] sm:$0xff] }
 0x1a6   : > { %1559 = vmatprep.mubr.f32.mxu1 %v444_v48  ;;  %3459 = vmatpush1.bf16.xpose.msra.mxu1 %v3458_v50  ;;  %v402_v48 = vld [vmem:[%s4298_s12 + $0x258] sm:$0xff]  ;;  %v405_v51 = vld [vmem:[%s4298_s12 + $0x270] sm:$0xff] }
 0x1a7   : > { %974 = vmatmul.mubr.f32.gmra.mrb[58].mxu0 %v443_v53  ;;  %3461 = vmatprep.subr.bf16.mxu1 %v3460_v52  ;;  %v406_v50 = vld [vmem:[%s4298_s12 + $0x278] sm:$0xff] }
 0x1a8   : > { %979 = vmatprep.mubr.f32.mxu0 %v448_v54  ;;  %v410_v52 = vld [vmem:[%s4298_s12 + $0x298] sm:$0xff] }
 0x1a9   : > { %1560 = vmatmul.mubr.f32.gmra.mrb[58].mxu1 %v443_v53  ;;  %v409_v53 = vld [vmem:[%s4298_s12 + $0x290] sm:$0xff] }
 0x1aa   : > { %1565 = vmatprep.mubr.f32.mxu1 %v448_v54  ;;  %v414_v54 = vld [vmem:[%s4298_s12 + $0x2b8] sm:$0xff] }
 0x1ab   : > { %980 = vmatmul.mubr.f32.gmra.mrb[60].mxu0 %v447_v59 }
 0x1ac   : > { %985 = vmatprep.mubr.f32.mxu0 %v452_v60  ;;  %3335 = vmatpush1.bf16.xpose.msra.mxu0 %v3334_v61  ;;  %v425_v61 = vld [vmem:[%s4298_s12 + $0x310] sm:$0xff] }
 0x1ad   : > { %1566 = vmatmul.mubr.f32.gmra.mrb[60].mxu1 %v447_v59  ;;  %v421_v59 = vld [vmem:[%s4298_s12 + $0x2f0] sm:$0xff] }
 0x1ae   : > { %1571 = vmatprep.mubr.f32.mxu1 %v452_v60  ;;  %3463 = vmatpush1.bf16.xpose.msra.mxu1 %v3462_v62  ;;  %v426_v60 = vld [vmem:[%s4298_s12 + $0x318] sm:$0xff] }
 0x1af   : > { %986 = vmatmul.mubr.f32.gmra.mrb[62].mxu0 %v451_v63  ;;  %v430_v62 = vld [vmem:[%s4298_s12 + $0x338] sm:$0xff] }
 0x1b0   : > { %991 = vmatprep.mubr.f32.mxu0 %v456_v0 }
 0x1b1   : > { %1572 = vmatmul.mubr.f32.gmra.mrb[62].mxu1 %v451_v63  ;;  %v429_v63 = vld [vmem:[%s4298_s12 + $0x330] sm:$0xff] }
 0x1b2   : > { %1577 = vmatprep.mubr.f32.mxu1 %v456_v0  ;;  %v434_v0 = vld [vmem:[%s4298_s12 + $0x358] sm:$0xff] }
 0x1b3   : > { %992 = vmatmul.mubr.f32.gmra.mrb[64].mxu0 %v455_v1 }
 0x1b4   : > { %997 = vmatprep.mubr.f32.mxu0 %v460_v2 }
 0x1b5   : > { %1578 = vmatmul.mubr.f32.gmra.mrb[64].mxu1 %v455_v1  ;;  %v433_v1 = vld [vmem:[%s4298_s12 + $0x350] sm:$0xff] }
 0x1b6   : > { %1583 = vmatprep.mubr.f32.mxu1 %v460_v2  ;;  %v438_v2 = vld [vmem:[%s4298_s12 + $0x378] sm:$0xff] }
 0x1b7   : > { %998 = vmatmul.mubr.f32.gmra.mrb[66].mxu0 %v459_v3 }
 0x1b8   : > { %1003 = vmatprep.mubr.f32.mxu0 %v464_v4 }
 0x1b9   : > { %1584 = vmatmul.mubr.f32.gmra.mrb[66].mxu1 %v459_v3  ;;  %v437_v3 = vld [vmem:[%s4298_s12 + $0x370] sm:$0xff] }
 0x1ba   : > { %1589 = vmatprep.mubr.f32.mxu1 %v464_v4  ;;  %v442_v4 = vld [vmem:[%s4298_s12 + $0x398] sm:$0xff] }
 0x1bb   : > { %1004 = vmatmul.mubr.f32.gmra.mrb[68].mxu0 %v463_v5 }
 0x1bc   : > { %1009 = vmatprep.mubr.f32.mxu0 %v468_v6 }
 0x1bd   : > { %1590 = vmatmul.mubr.f32.gmra.mrb[68].mxu1 %v463_v5  ;;  %v441_v5 = vld [vmem:[%s4298_s12 + $0x390] sm:$0xff] }
 0x1be   : > { %1595 = vmatprep.mubr.f32.mxu1 %v468_v6  ;;  %v446_v6 = vld [vmem:[%s4298_s12 + $0x3b8] sm:$0xff] }
 0x1bf   : > { %1010 = vmatmul.mubr.f32.gmra.mrb[70].mxu0 %v467_v7 }
 0x1c0   : > { %1015 = vmatprep.mubr.f32.mxu0 %v472_v8 }
 0x1c1   : > { %1596 = vmatmul.mubr.f32.gmra.mrb[70].mxu1 %v467_v7  ;;  %v445_v7 = vld [vmem:[%s4298_s12 + $0x3b0] sm:$0xff] }
 0x1c2   : > { %1601 = vmatprep.mubr.f32.mxu1 %v472_v8  ;;  %v450_v8 = vld [vmem:[%s4298_s12 + $0x3d8] sm:$0xff] }
 0x1c3   : > { %1016 = vmatmul.mubr.f32.gmra.mrb[72].mxu0 %v471_v9 }
 0x1c4   : > { %1021 = vmatprep.mubr.f32.mxu0 %v476_v10 }
 0x1c5   : > { %1602 = vmatmul.mubr.f32.gmra.mrb[72].mxu1 %v471_v9  ;;  %v449_v9 = vld [vmem:[%s4298_s12 + $0x3d0] sm:$0xff] }
 0x1c6   : > { %1607 = vmatprep.mubr.f32.mxu1 %v476_v10  ;;  %v454_v10 = vld [vmem:[%s4298_s12 + $0x3f8] sm:$0xff] }
 0x1c7   : > { %1022 = vmatmul.mubr.f32.gmra.mrb[74].mxu0 %v475_v11 }
 0x1c8   : > { %1092 = vmatprep.mubr.f32.mxu0 %v330_v12 }
 0x1c9   : > { %1608 = vmatmul.mubr.f32.gmra.mrb[74].mxu1 %v475_v11  ;;  %v453_v11 = vld [vmem:[%s4298_s12 + $0x3f0] sm:$0xff] }
 0x1ca   : > { %1678 = vmatprep.mubr.f32.mxu1 %v330_v12  ;;  %v458_v12 = vld [vmem:[%s4298_s12 + $0x418] sm:$0xff] }
 0x1cb   : > { %1093 = vmatmul.mubr.f32.vlgmr.msra.gmra.mrb[0].mxu0 %v329_v13 }
 0x1cc   : > { %1098 = vmatprep.mubr.f32.mxu0 %v334_v14 }
 0x1cd   : > { %1679 = vmatmul.mubr.f32.vlgmr.msra.gmra.mrb[0].mxu1 %v329_v13  ;;  %v457_v13 = vld [vmem:[%s4298_s12 + $0x410] sm:$0xff] }
 0x1ce   : > { %1684 = vmatprep.mubr.f32.mxu1 %v334_v14  ;;  %v462_v14 = vld [vmem:[%s4298_s12 + $0x438] sm:$0xff] }
 0x1cf   : > { %1099 = vmatmul.mubr.f32.gmra.mrb[2].mxu0 %v333_v15 }
 0x1d0   : > { %1104 = vmatprep.mubr.f32.mxu0 %v338_v16 }
 0x1d1   : > { %1685 = vmatmul.mubr.f32.gmra.mrb[2].mxu1 %v333_v15  ;;  %v461_v15 = vld [vmem:[%s4298_s12 + $0x430] sm:$0xff] }
 0x1d2   : > { %1690 = vmatprep.mubr.f32.mxu1 %v338_v16  ;;  %v466_v16 = vld [vmem:[%s4298_s12 + $0x458] sm:$0xff] }
 0x1d3   : > { %1105 = vmatmul.mubr.f32.gmra.mrb[4].mxu0 %v337_v17 }
 0x1d4   : > { %1110 = vmatprep.mubr.f32.mxu0 %v342_v18 }
 0x1d5   : > { %1691 = vmatmul.mubr.f32.gmra.mrb[4].mxu1 %v337_v17  ;;  %v465_v17 = vld [vmem:[%s4298_s12 + $0x450] sm:$0xff] }
 0x1d6   : > { %1696 = vmatprep.mubr.f32.mxu1 %v342_v18  ;;  %v470_v18 = vld [vmem:[%s4298_s12 + $0x478] sm:$0xff] }
 0x1d7   : > { %1111 = vmatmul.mubr.f32.gmra.mrb[6].mxu0 %v341_v19 }
 0x1d8   : > { %1116 = vmatprep.mubr.f32.mxu0 %v346_v20 }
 0x1d9   : > { %1697 = vmatmul.mubr.f32.gmra.mrb[6].mxu1 %v341_v19  ;;  %v469_v19 = vld [vmem:[%s4298_s12 + $0x470] sm:$0xff] }
 0x1da   : > { %1702 = vmatprep.mubr.f32.mxu1 %v346_v20  ;;  %v474_v20 = vld [vmem:[%s4298_s12 + $0x498] sm:$0xff] }
 0x1db   : > { %1117 = vmatmul.mubr.f32.gmra.mrb[8].mxu0 %v345_v21 }
 0x1dc   : > { %1122 = vmatprep.mubr.f32.mxu0 %v350_v22 }
 0x1dd   : > { %1703 = vmatmul.mubr.f32.gmra.mrb[8].mxu1 %v345_v21  ;;  %v473_v21 = vld [vmem:[%s4298_s12 + $0x490] sm:$0xff] }
 0x1de   : > { %1708 = vmatprep.mubr.f32.mxu1 %v350_v22  ;;  %v478_v22 = vld [vmem:[%s4298_s12 + $0x4b8] sm:$0xff] }
 0x1df   : > { %1123 = vmatmul.mubr.f32.gmra.mrb[10].mxu0 %v349_v23 }
 0x1e0   : > { %1128 = vmatprep.mubr.f32.mxu0 %v354_v24 }
 0x1e1   : > { %1709 = vmatmul.mubr.f32.gmra.mrb[10].mxu1 %v349_v23  ;;  %v477_v23 = vld [vmem:[%s4298_s12 + $0x4b0] sm:$0xff] }
 0x1e2   : > { %1714 = vmatprep.mubr.f32.mxu1 %v354_v24 }
 0x1e3   : > { %1129 = vmatmul.mubr.f32.gmra.mrb[12].mxu0 %v353_v25 }
 0x1e4   : > { %1134 = vmatprep.mubr.f32.mxu0 %v358_v26 }
 0x1e5   : > { %1715 = vmatmul.mubr.f32.gmra.mrb[12].mxu1 %v353_v25 }
 0x1e6   : > { %1720 = vmatprep.mubr.f32.mxu1 %v358_v26 }
 0x1e7   : > { %1135 = vmatmul.mubr.f32.gmra.mrb[14].mxu0 %v357_v27 }
 0x1e8   : > { %1140 = vmatprep.mubr.f32.mxu0 %v362_v28 }
 0x1e9   : > { %1721 = vmatmul.mubr.f32.gmra.mrb[14].mxu1 %v357_v27 }
 0x1ea   : > { %1726 = vmatprep.mubr.f32.mxu1 %v362_v28 }
 0x1eb   : > { %1141 = vmatmul.mubr.f32.gmra.mrb[16].mxu0 %v361_v29 }
 0x1ec   : > { %1146 = vmatprep.mubr.f32.mxu0 %v366_v30 }
 0x1ed   : > { %1727 = vmatmul.mubr.f32.gmra.mrb[16].mxu1 %v361_v29 }
 0x1ee   : > { %1732 = vmatprep.mubr.f32.mxu1 %v366_v30 }
 0x1ef   : > { %1147 = vmatmul.mubr.f32.gmra.mrb[18].mxu0 %v365_v31 }
 0x1f0   : > { %1152 = vmatprep.mubr.f32.mxu0 %v370_v32 }
 0x1f1   : > { %1733 = vmatmul.mubr.f32.gmra.mrb[18].mxu1 %v365_v31 }
 0x1f2   : > { %1738 = vmatprep.mubr.f32.mxu1 %v370_v32 }
 0x1f3   : > { %1153 = vmatmul.mubr.f32.gmra.mrb[20].mxu0 %v369_v33 }
 0x1f4   : > { %1158 = vmatprep.mubr.f32.mxu0 %v374_v34 }
 0x1f5   : > { %1739 = vmatmul.mubr.f32.gmra.mrb[20].mxu1 %v369_v33 }
 0x1f6   : > { %1744 = vmatprep.mubr.f32.mxu1 %v374_v34 }
 0x1f7   : > { %1159 = vmatmul.mubr.f32.gmra.mrb[22].mxu0 %v373_v35 }
 0x1f8   : > { %1164 = vmatprep.mubr.f32.mxu0 %v378_v36 }
 0x1f9   : > { %1745 = vmatmul.mubr.f32.gmra.mrb[22].mxu1 %v373_v35 }
 0x1fa   : > { %1750 = vmatprep.mubr.f32.mxu1 %v378_v36 }
 0x1fb   : > { %1165 = vmatmul.mubr.f32.gmra.mrb[24].mxu0 %v377_v37 }
 0x1fc   : > { %1170 = vmatprep.mubr.f32.mxu0 %v382_v38 }
 0x1fd   : > { %1751 = vmatmul.mubr.f32.gmra.mrb[24].mxu1 %v377_v37 }
 0x1fe   : > { %1756 = vmatprep.mubr.f32.mxu1 %v382_v38 }
 0x1ff   : > { %1171 = vmatmul.mubr.f32.gmra.mrb[26].mxu0 %v381_v39 }
 0x200   : > { %1176 = vmatprep.mubr.f32.mxu0 %v386_v40 }
 0x201   : > { %1757 = vmatmul.mubr.f32.gmra.mrb[26].mxu1 %v381_v39 }
 0x202   : > { %1762 = vmatprep.mubr.f32.mxu1 %v386_v40 }
 0x203   : > { %1177 = vmatmul.mubr.f32.gmra.mrb[28].mxu0 %v385_v41 }
 0x204   : > { %1182 = vmatprep.mubr.f32.mxu0 %v390_v42 }
 0x205   : > { %1763 = vmatmul.mubr.f32.gmra.mrb[28].mxu1 %v385_v41 }
 0x206   : > { %1768 = vmatprep.mubr.f32.mxu1 %v390_v42 }
 0x207   : > { %1183 = vmatmul.mubr.f32.gmra.mrb[30].mxu0 %v389_v43 }
 0x208   : > { %1188 = vmatprep.mubr.f32.mxu0 %v394_v44 }
 0x209   : > { %1769 = vmatmul.mubr.f32.gmra.mrb[30].mxu1 %v389_v43 }
 0x20a   : > { %1774 = vmatprep.mubr.f32.mxu1 %v394_v44 }
 0x20b   : > { %1189 = vmatmul.mubr.f32.gmra.mrb[32].mxu0 %v393_v45 }
 0x20c   : > { %1194 = vmatprep.mubr.f32.mxu0 %v398_v46 }
 0x20d   : > { %1775 = vmatmul.mubr.f32.gmra.mrb[32].mxu1 %v393_v45 }
 0x20e   : > { %1780 = vmatprep.mubr.f32.mxu1 %v398_v46 }
 0x20f   : > { %1195 = vmatmul.mubr.f32.gmra.mrb[34].mxu0 %v397_v47 }
 0x210   : > { %1200 = vmatprep.mubr.f32.mxu0 %v402_v48 }
 0x211   : > { %1781 = vmatmul.mubr.f32.gmra.mrb[34].mxu1 %v397_v47 }
 0x212   : > { %1786 = vmatprep.mubr.f32.mxu1 %v402_v48 }
 0x213   : > { %1201 = vmatmul.mubr.f32.gmra.mrb[36].mxu0 %v401_v49 }
 0x214   : > { %1206 = vmatprep.mubr.f32.mxu0 %v406_v50 }
 0x215   : > { %1787 = vmatmul.mubr.f32.gmra.mrb[36].mxu1 %v401_v49 }
 0x216   : > { %1792 = vmatprep.mubr.f32.mxu1 %v406_v50 }
 0x217   : > { %1207 = vmatmul.mubr.f32.gmra.mrb[38].mxu0 %v405_v51 }
 0x218   : > { %1212 = vmatprep.mubr.f32.mxu0 %v410_v52 }
 0x219   : > { %1793 = vmatmul.mubr.f32.gmra.mrb[38].mxu1 %v405_v51 }
 0x21a   : > { %1798 = vmatprep.mubr.f32.mxu1 %v410_v52 }
 0x21b   : > { %1213 = vmatmul.mubr.f32.gmra.mrb[40].mxu0 %v409_v53 }
 0x21c   : > { %1218 = vmatprep.mubr.f32.mxu0 %v414_v54 }
 0x21d   : > { %1799 = vmatmul.mubr.f32.gmra.mrb[40].mxu1 %v409_v53 }
 0x21e   : > { %1804 = vmatprep.mubr.f32.mxu1 %v414_v54 }
 0x21f   : > { %1219 = vmatmul.mubr.f32.gmra.mrb[42].mxu0 %v413_v55 }
 0x220   : > { %1224 = vmatprep.mubr.f32.mxu0 %v418_v56 }
 0x221   : > { %1805 = vmatmul.mubr.f32.gmra.mrb[42].mxu1 %v413_v55 }
 0x222   : > { %1810 = vmatprep.mubr.f32.mxu1 %v418_v56 }
 0x223   : > { %1225 = vmatmul.mubr.f32.gmra.mrb[44].mxu0 %v417_v57 }
 0x224   : > { %1230 = vmatprep.mubr.f32.mxu0 %v422_v58 }
 0x225   : > { %1811 = vmatmul.mubr.f32.gmra.mrb[44].mxu1 %v417_v57 }
 0x226   : > { %1816 = vmatprep.mubr.f32.mxu1 %v422_v58 }
 0x227   : > { %1231 = vmatmul.mubr.f32.gmra.mrb[46].mxu0 %v421_v59 }
 0x228   : > { %1236 = vmatprep.mubr.f32.mxu0 %v426_v60 }
 0x229   : > { %1817 = vmatmul.mubr.f32.gmra.mrb[46].mxu1 %v421_v59 }
 0x22a   : > { %1822 = vmatprep.mubr.f32.mxu1 %v426_v60 }
 0x22b   : > { %1237 = vmatmul.mubr.f32.gmra.mrb[48].mxu0 %v425_v61 }
 0x22c   : > { %1242 = vmatprep.mubr.f32.mxu0 %v430_v62 }
 0x22d   : > { %1823 = vmatmul.mubr.f32.gmra.mrb[48].mxu1 %v425_v61 }
 0x22e   : > { %1828 = vmatprep.mubr.f32.mxu1 %v430_v62 }
 0x22f   : > { %1243 = vmatmul.mubr.f32.gmra.mrb[50].mxu0 %v429_v63 }
 0x230   : > { %1248 = vmatprep.mubr.f32.mxu0 %v434_v0 }
 0x231   : > { %1829 = vmatmul.mubr.f32.gmra.mrb[50].mxu1 %v429_v63 }
 0x232   : > { %1834 = vmatprep.mubr.f32.mxu1 %v434_v0 }
 0x233   : > { %1249 = vmatmul.mubr.f32.gmra.mrb[52].mxu0 %v433_v1 }
 0x234   : > { %1254 = vmatprep.mubr.f32.mxu0 %v438_v2 }
 0x235   : > { %1835 = vmatmul.mubr.f32.gmra.mrb[52].mxu1 %v433_v1 }
 0x236   : > { %1840 = vmatprep.mubr.f32.mxu1 %v438_v2 }
 0x237   : > { %1255 = vmatmul.mubr.f32.gmra.mrb[54].mxu0 %v437_v3 }
 0x238   : > { %1260 = vmatprep.mubr.f32.mxu0 %v442_v4 }
 0x239   : > { %1841 = vmatmul.mubr.f32.gmra.mrb[54].mxu1 %v437_v3 }
 0x23a   : > { %1846 = vmatprep.mubr.f32.mxu1 %v442_v4 }
 0x23b   : > { %1261 = vmatmul.mubr.f32.gmra.mrb[56].mxu0 %v441_v5 }
 0x23c   : > { %1266 = vmatprep.mubr.f32.mxu0 %v446_v6 }
 0x23d   : > { %1847 = vmatmul.mubr.f32.gmra.mrb[56].mxu1 %v441_v5 }
 0x23e   : > { %1852 = vmatprep.mubr.f32.mxu1 %v446_v6 }
 0x23f   : > { %1267 = vmatmul.mubr.f32.gmra.mrb[58].mxu0 %v445_v7 }
 0x240   : > { %1272 = vmatprep.mubr.f32.mxu0 %v450_v8 }
 0x241   : > { %1853 = vmatmul.mubr.f32.gmra.mrb[58].mxu1 %v445_v7 }
 0x242   : > { %1858 = vmatprep.mubr.f32.mxu1 %v450_v8 }
 0x243   : > { %1273 = vmatmul.mubr.f32.gmra.mrb[60].mxu0 %v449_v9 }
 0x244   : > { %1278 = vmatprep.mubr.f32.mxu0 %v454_v10 }
 0x245   : > { %1859 = vmatmul.mubr.f32.gmra.mrb[60].mxu1 %v449_v9 }
 0x246   : > { %1864 = vmatprep.mubr.f32.mxu1 %v454_v10 }
 0x247   : > { %1279 = vmatmul.mubr.f32.gmra.mrb[62].mxu0 %v453_v11 }
 0x248   : > { %1284 = vmatprep.mubr.f32.mxu0 %v458_v12 }
 0x249   : > { %1865 = vmatmul.mubr.f32.gmra.mrb[62].mxu1 %v453_v11 }
 0x24a   : > { %1870 = vmatprep.mubr.f32.mxu1 %v458_v12 }
 0x24b   : > { %1285 = vmatmul.mubr.f32.gmra.mrb[64].mxu0 %v457_v13 }
 0x24c   : > { %1290 = vmatprep.mubr.f32.mxu0 %v462_v14 }
 0x24d   : > { %1871 = vmatmul.mubr.f32.gmra.mrb[64].mxu1 %v457_v13 }
 0x24e   : > { %1876 = vmatprep.mubr.f32.mxu1 %v462_v14 }
 0x24f   : > { %1291 = vmatmul.mubr.f32.gmra.mrb[66].mxu0 %v461_v15 }
 0x250   : > { %1296 = vmatprep.mubr.f32.mxu0 %v466_v16 }
 0x251   : > { %1877 = vmatmul.mubr.f32.gmra.mrb[66].mxu1 %v461_v15 }
 0x252   : > { %1882 = vmatprep.mubr.f32.mxu1 %v466_v16 }
 0x253   : > { %1297 = vmatmul.mubr.f32.gmra.mrb[68].mxu0 %v465_v17 }
 0x254   : > { %1302 = vmatprep.mubr.f32.mxu0 %v470_v18 }
 0x255   : > { %1883 = vmatmul.mubr.f32.gmra.mrb[68].mxu1 %v465_v17 }
 0x256   : > { %1888 = vmatprep.mubr.f32.mxu1 %v470_v18 }
 0x257   : > { %1303 = vmatmul.mubr.f32.gmra.mrb[70].mxu0 %v469_v19 }
 0x258   : > { %1308 = vmatprep.mubr.f32.mxu0 %v474_v20 }
 0x259   : > { %1889 = vmatmul.mubr.f32.gmra.mrb[70].mxu1 %v469_v19 }
 0x25a   : > { %1894 = vmatprep.mubr.f32.mxu1 %v474_v20 }
 0x25b   : > { %1309 = vmatmul.mubr.f32.gmra.mrb[72].mxu0 %v473_v21 }
 0x25c   : > { %1314 = vmatprep.mubr.f32.mxu0 %v478_v22 }
 0x25d   : > { %1895 = vmatmul.mubr.f32.gmra.mrb[72].mxu1 %v473_v21 }
 0x25e   : > { %1900 = vmatprep.mubr.f32.mxu1 %v478_v22 }
 0x25f   : > { %1315 = vmatmul.mubr.f32.gmra.mrb[74].mxu0 %v477_v23 }
 0x261   : > { %1901 = vmatmul.mubr.f32.gmra.mrb[74].mxu1 %v477_v23 }
 0x29e   : > { %v4731_v24 = vpop.f32.mrb[0].mxu0 }
 0x29f   : > { %v4735_v26 = vpop.f32.mrb[1].mxu0  ;;  %1911 = vst [vmem:[%s5037_s30] sm:$0xff] (!%p3192_p13), %v4731_v24 }
 0x2a0   : > { %v4733_v25 = vpop.f32.mrb[0].mxu1  ;;  %1912 = vst [vmem:[%s5037_s30 + $0x8] sm:$0xff] (!%p3192_p13), %v4735_v26 }
 0x2a1   : > { %v4737_v27 = vpop.f32.mrb[1].mxu1  ;;  %1913 = vst [vmem:[%s5037_s30 + $0x10] sm:$0xff] (!%p3192_p13), %v4733_v25 }
 0x2a2   : > { %v4739_v28 = vpop.f32.mrb[2].mxu0  ;;  %1914 = vst [vmem:[%s5037_s30 + $0x18] sm:$0xff] (!%p3192_p13), %v4737_v27 }
 0x2a3   : > { %v4743_v30 = vpop.f32.mrb[3].mxu0  ;;  %1915 = vst [vmem:[%s5037_s30 + $0x20] sm:$0xff] (!%p3192_p13), %v4739_v28 }
 0x2a4   : > { %v4741_v29 = vpop.f32.mrb[2].mxu1  ;;  %1916 = vst [vmem:[%s5037_s30 + $0x28] sm:$0xff] (!%p3192_p13), %v4743_v30 }
 0x2a5   : > { %v4745_v31 = vpop.f32.mrb[3].mxu1  ;;  %1917 = vst [vmem:[%s5037_s30 + $0x30] sm:$0xff] (!%p3192_p13), %v4741_v29 }
 0x2a6   : > { %v4747_v32 = vpop.f32.mrb[4].mxu0  ;;  %1918 = vst [vmem:[%s5037_s30 + $0x38] sm:$0xff] (!%p3192_p13), %v4745_v31 }
 0x2a7   : > { %v4751_v34 = vpop.f32.mrb[5].mxu0  ;;  %1919 = vst [vmem:[%s5037_s30 + $0x40] sm:$0xff] (!%p3192_p13), %v4747_v32 }
 0x2a8   : > { %v4749_v33 = vpop.f32.mrb[4].mxu1  ;;  %1920 = vst [vmem:[%s5037_s30 + $0x48] sm:$0xff] (!%p3192_p13), %v4751_v34 }
 0x2a9   : > { %v4753_v35 = vpop.f32.mrb[5].mxu1  ;;  %1921 = vst [vmem:[%s5037_s30 + $0x50] sm:$0xff] (!%p3192_p13), %v4749_v33 }
 0x2aa   : > { %v4755_v36 = vpop.f32.mrb[6].mxu0  ;;  %1922 = vst [vmem:[%s5037_s30 + $0x58] sm:$0xff] (!%p3192_p13), %v4753_v35 }
 0x2ab   : > { %v4759_v38 = vpop.f32.mrb[7].mxu0  ;;  %1923 = vst [vmem:[%s5037_s30 + $0x60] sm:$0xff] (!%p3192_p13), %v4755_v36 }
 0x2ac   : > { %v4757_v37 = vpop.f32.mrb[6].mxu1  ;;  %1924 = vst [vmem:[%s5037_s30 + $0x68] sm:$0xff] (!%p3192_p13), %v4759_v38 }
 0x2ad   : > { %v4761_v39 = vpop.f32.mrb[7].mxu1  ;;  %1925 = vst [vmem:[%s5037_s30 + $0x70] sm:$0xff] (!%p3192_p13), %v4757_v37 }
 0x2ae   : > { %v4763_v40 = vpop.f32.mrb[8].mxu0  ;;  %1926 = vst [vmem:[%s5037_s30 + $0x78] sm:$0xff] (!%p3192_p13), %v4761_v39 }
 0x2af   : > { %v4767_v42 = vpop.f32.mrb[9].mxu0  ;;  %1927 = vst [vmem:[%s5037_s30 + $0x80] sm:$0xff] (!%p3192_p13), %v4763_v40 }
 0x2b0   : > { %v4765_v41 = vpop.f32.mrb[8].mxu1  ;;  %1928 = vst [vmem:[%s5037_s30 + $0x88] sm:$0xff] (!%p3192_p13), %v4767_v42 }
 0x2b1   : > { %v4769_v43 = vpop.f32.mrb[9].mxu1  ;;  %1929 = vst [vmem:[%s5037_s30 + $0x90] sm:$0xff] (!%p3192_p13), %v4765_v41 }
 0x2b2   : > { %v4771_v44 = vpop.f32.mrb[10].mxu0  ;;  %1930 = vst [vmem:[%s5037_s30 + $0x98] sm:$0xff] (!%p3192_p13), %v4769_v43 }
 0x2b3   : > { %v4775_v46 = vpop.f32.mrb[11].mxu0  ;;  %1931 = vst [vmem:[%s5037_s30 + $0xa0] sm:$0xff] (!%p3192_p13), %v4771_v44 }
 0x2b4   : > { %v4773_v45 = vpop.f32.mrb[10].mxu1  ;;  %1932 = vst [vmem:[%s5037_s30 + $0xa8] sm:$0xff] (!%p3192_p13), %v4775_v46 }
 0x2b5   : > { %v4777_v47 = vpop.f32.mrb[11].mxu1  ;;  %1933 = vst [vmem:[%s5037_s30 + $0xb0] sm:$0xff] (!%p3192_p13), %v4773_v45 }
 0x2b6   : > { %v4779_v48 = vpop.f32.mrb[12].mxu0  ;;  %1934 = vst [vmem:[%s5037_s30 + $0xb8] sm:$0xff] (!%p3192_p13), %v4777_v47 }
 0x2b7   : > { %v4783_v50 = vpop.f32.mrb[13].mxu0  ;;  %1935 = vst [vmem:[%s5037_s30 + $0xc0] sm:$0xff] (!%p3192_p13), %v4779_v48 }
 0x2b8   : > { %v4781_v49 = vpop.f32.mrb[12].mxu1  ;;  %1936 = vst [vmem:[%s5037_s30 + $0xc8] sm:$0xff] (!%p3192_p13), %v4783_v50 }
 0x2b9   : > { %v4785_v51 = vpop.f32.mrb[13].mxu1  ;;  %1937 = vst [vmem:[%s5037_s30 + $0xd0] sm:$0xff] (!%p3192_p13), %v4781_v49 }
 0x2ba   : > { %v4787_v52 = vpop.f32.mrb[14].mxu0  ;;  %1938 = vst [vmem:[%s5037_s30 + $0xd8] sm:$0xff] (!%p3192_p13), %v4785_v51 }
 0x2bb   : > { %v4791_v54 = vpop.f32.mrb[15].mxu0  ;;  %1939 = vst [vmem:[%s5037_s30 + $0xe0] sm:$0xff] (!%p3192_p13), %v4787_v52 }
 0x2bc   : > { %v4789_v53 = vpop.f32.mrb[14].mxu1  ;;  %1940 = vst [vmem:[%s5037_s30 + $0xe8] sm:$0xff] (!%p3192_p13), %v4791_v54 }
 0x2bd   : > { %v4793_v55 = vpop.f32.mrb[15].mxu1  ;;  %1941 = vst [vmem:[%s5037_s30 + $0xf0] sm:$0xff] (!%p3192_p13), %v4789_v53 }
 0x2be   : > { %v4795_v56 = vpop.f32.mrb[16].mxu0  ;;  %1942 = vst [vmem:[%s5037_s30 + $0xf8] sm:$0xff] (!%p3192_p13), %v4793_v55 }
 0x2bf   : > { %v4799_v58 = vpop.f32.mrb[17].mxu0  ;;  %1943 = vst [vmem:[%s5037_s30 + $0x100] sm:$0xff] (!%p3192_p13), %v4795_v56 }
 0x2c0   : > { %v4797_v57 = vpop.f32.mrb[16].mxu1  ;;  %1944 = vst [vmem:[%s5037_s30 + $0x108] sm:$0xff] (!%p3192_p13), %v4799_v58 }
 0x2c1   : > { %v4801_v59 = vpop.f32.mrb[17].mxu1  ;;  %1945 = vst [vmem:[%s5037_s30 + $0x110] sm:$0xff] (!%p3192_p13), %v4797_v57 }
 0x2c2   : > { %v4803_v60 = vpop.f32.mrb[18].mxu0  ;;  %1946 = vst [vmem:[%s5037_s30 + $0x118] sm:$0xff] (!%p3192_p13), %v4801_v59 }
 0x2c3   : > { %v4807_v62 = vpop.f32.mrb[19].mxu0  ;;  %1947 = vst [vmem:[%s5037_s30 + $0x120] sm:$0xff] (!%p3192_p13), %v4803_v60 }
 0x2c4   : > { %v4805_v61 = vpop.f32.mrb[18].mxu1  ;;  %1948 = vst [vmem:[%s5037_s30 + $0x128] sm:$0xff] (!%p3192_p13), %v4807_v62 }
 0x2c5   : > { %v4809_v63 = vpop.f32.mrb[19].mxu1  ;;  %1949 = vst [vmem:[%s5037_s30 + $0x130] sm:$0xff] (!%p3192_p13), %v4805_v61 }
 0x2c6   : > { %v4811_v0 = vpop.f32.mrb[20].mxu0  ;;  %1950 = vst [vmem:[%s5037_s30 + $0x138] sm:$0xff] (!%p3192_p13), %v4809_v63 }
 0x2c7   : > { %v4815_v2 = vpop.f32.mrb[21].mxu0  ;;  %1951 = vst [vmem:[%s5037_s30 + $0x140] sm:$0xff] (!%p3192_p13), %v4811_v0 }
 0x2c8   : > { %v4813_v1 = vpop.f32.mrb[20].mxu1  ;;  %1952 = vst [vmem:[%s5037_s30 + $0x148] sm:$0xff] (!%p3192_p13), %v4815_v2 }
 0x2c9   : > { %v4817_v3 = vpop.f32.mrb[21].mxu1  ;;  %1953 = vst [vmem:[%s5037_s30 + $0x150] sm:$0xff] (!%p3192_p13), %v4813_v1 }
 0x2ca   : > { %v4819_v4 = vpop.f32.mrb[22].mxu0  ;;  %1954 = vst [vmem:[%s5037_s30 + $0x158] sm:$0xff] (!%p3192_p13), %v4817_v3 }
 0x2cb   : > { %6423 = vst [vmem:[#allocation23_spill] sm:$0xff] %v4819_v4  ;;  %v4823_v6 = vpop.f32.mrb[23].mxu0  ;;  %1955 = vst [vmem:[%s5037_s30 + $0x160] sm:$0xff] (!%p3192_p13), %v4819_v4 }
 0x2cc   : > { %v4821_v5 = vpop.f32.mrb[22].mxu1  ;;  %6425 = vst [vmem:[#allocation25_spill] sm:$0xff] %v4823_v6  ;;  %1956 = vst [vmem:[%s5037_s30 + $0x168] sm:$0xff] (!%p3192_p13), %v4823_v6 }
 0x2cd   : > { %6424 = vst [vmem:[#allocation24_spill] sm:$0xff] %v4821_v5  ;;  %v4825_v7 = vpop.f32.mrb[23].mxu1  ;;  %1957 = vst [vmem:[%s5037_s30 + $0x170] sm:$0xff] (!%p3192_p13), %v4821_v5 }
 0x2ce   : > { %6426 = vst [vmem:[#allocation26_spill] sm:$0xff] %v4825_v7  ;;  %v4827_v8 = vpop.f32.mrb[24].mxu0  ;;  %1958 = vst [vmem:[%s5037_s30 + $0x178] sm:$0xff] (!%p3192_p13), %v4825_v7 }
 0x2cf   : > { %6427 = vst [vmem:[#allocation27_spill] sm:$0xff] %v4827_v8  ;;  %v4831_v10 = vpop.f32.mrb[25].mxu0  ;;  %1959 = vst [vmem:[%s5037_s30 + $0x180] sm:$0xff] (!%p3192_p13), %v4827_v8 }
 0x2d0   : > { %v4829_v9 = vpop.f32.mrb[24].mxu1  ;;  %6429 = vst [vmem:[#allocation29_spill] sm:$0xff] %v4831_v10  ;;  %1960 = vst [vmem:[%s5037_s30 + $0x188] sm:$0xff] (!%p3192_p13), %v4831_v10 }
 0x2d1   : > { %6428 = vst [vmem:[#allocation28_spill] sm:$0xff] %v4829_v9  ;;  %v4833_v11 = vpop.f32.mrb[25].mxu1  ;;  %1961 = vst [vmem:[%s5037_s30 + $0x190] sm:$0xff] (!%p3192_p13), %v4829_v9 }
 0x2d2   : > { %6430 = vst [vmem:[#allocation30_spill] sm:$0xff] %v4833_v11  ;;  %v4835_v12 = vpop.f32.mrb[26].mxu0  ;;  %1962 = vst [vmem:[%s5037_s30 + $0x198] sm:$0xff] (!%p3192_p13), %v4833_v11 }
 0x2d3   : > { %6431 = vst [vmem:[#allocation31_spill] sm:$0xff] %v4835_v12  ;;  %v4839_v14 = vpop.f32.mrb[27].mxu0  ;;  %1963 = vst [vmem:[%s5037_s30 + $0x1a0] sm:$0xff] (!%p3192_p13), %v4835_v12 }
 0x2d4   : > { %v4837_v13 = vpop.f32.mrb[26].mxu1  ;;  %6433 = vst [vmem:[#allocation33_spill] sm:$0xff] %v4839_v14 }
 0x2d5   : > { %6432 = vst [vmem:[#allocation32_spill] sm:$0xff] %v4837_v13  ;;  %v4841_v15 = vpop.f32.mrb[27].mxu1 }
 0x2d6   : > { %6434 = vst [vmem:[#allocation34_spill] sm:$0xff] %v4841_v15  ;;  %v4843_v16 = vpop.f32.mrb[28].mxu0 }
 0x2d7   : > { %6435 = vst [vmem:[#allocation35_spill] sm:$0xff] %v4843_v16  ;;  %v4847_v18 = vpop.f32.mrb[29].mxu0 }
 0x2d8   : > { %v4845_v17 = vpop.f32.mrb[28].mxu1  ;;  %6437 = vst [vmem:[#allocation37_spill] sm:$0xff] %v4847_v18 }
 0x2d9   : > { %6436 = vst [vmem:[#allocation36_spill] sm:$0xff] %v4845_v17  ;;  %v4849_v19 = vpop.f32.mrb[29].mxu1 }
 0x2da   : > { %6438 = vst [vmem:[#allocation38_spill] sm:$0xff] %v4849_v19  ;;  %v4851_v20 = vpop.f32.mrb[30].mxu0 }
 0x2db   : > { %6439 = vst [vmem:[#allocation39_spill] sm:$0xff] %v4851_v20  ;;  %v4855_v22 = vpop.f32.mrb[31].mxu0  ;;  %v6523_v6 = vld [vmem:[#allocation33_spill] sm:$0xff] (!%p3192_p13) }
 0x2dc   : > { %v4853_v21 = vpop.f32.mrb[30].mxu1  ;;  %6441 = vst [vmem:[#allocation41_spill] sm:$0xff] %v4855_v22  ;;  %1964 = vst [vmem:[%s5037_s30 + $0x1a8] sm:$0xff] (!%p3192_p13), %v6523_v6  ;;  %v6524_v5 = vld [vmem:[#allocation32_spill] sm:$0xff] (!%p3192_p13) }
 0x2dd   : > { %6440 = vst [vmem:[#allocation40_spill] sm:$0xff] %v4853_v21  ;;  %v4857_v23 = vpop.f32.mrb[31].mxu1  ;;  %1965 = vst [vmem:[%s5037_s30 + $0x1b0] sm:$0xff] (!%p3192_p13), %v6524_v5  ;;  %v6525_v7 = vld [vmem:[#allocation34_spill] sm:$0xff] (!%p3192_p13) }
 0x2de   : > { %6442 = vst [vmem:[#allocation42_spill] sm:$0xff] %v4857_v23  ;;  %v4859_v13 = vpop.f32.mrb[32].mxu0  ;;  %1966 = vst [vmem:[%s5037_s30 + $0x1b8] sm:$0xff] (!%p3192_p13), %v6525_v7  ;;  %v6526_v8 = vld [vmem:[#allocation35_spill] sm:$0xff] (!%p3192_p13) }
 0x2df   : > { %6443 = vst [vmem:[#allocation43_spill] sm:$0xff] %v4859_v13  ;;  %v4863_v15 = vpop.f32.mrb[33].mxu0  ;;  %1967 = vst [vmem:[%s5037_s30 + $0x1c0] sm:$0xff] (!%p3192_p13), %v6526_v8  ;;  %v6527_v10 = vld [vmem:[#allocation37_spill] sm:$0xff] (!%p3192_p13) }
 0x2e0   : > { %v4861_v14 = vpop.f32.mrb[32].mxu1  ;;  %6445 = vst [vmem:[#allocation45_spill] sm:$0xff] %v4863_v15  ;;  %1968 = vst [vmem:[%s5037_s30 + $0x1c8] sm:$0xff] (!%p3192_p13), %v6527_v10  ;;  %v6528_v9 = vld [vmem:[#allocation36_spill] sm:$0xff] (!%p3192_p13) }
 0x2e1   : > { %6444 = vst [vmem:[#allocation44_spill] sm:$0xff] %v4861_v14  ;;  %v4865_v16 = vpop.f32.mrb[33].mxu1  ;;  %1969 = vst [vmem:[%s5037_s30 + $0x1d0] sm:$0xff] (!%p3192_p13), %v6528_v9  ;;  %v6529_v11 = vld [vmem:[#allocation38_spill] sm:$0xff] (!%p3192_p13) }
 0x2e2   : > { %6446 = vst [vmem:[#allocation46_spill] sm:$0xff] %v4865_v16  ;;  %v4867_v17 = vpop.f32.mrb[34].mxu0  ;;  %1970 = vst [vmem:[%s5037_s30 + $0x1d8] sm:$0xff] (!%p3192_p13), %v6529_v11  ;;  %v6530_v12 = vld [vmem:[#allocation39_spill] sm:$0xff] (!%p3192_p13) }
 0x2e3   : > { %6447 = vst [vmem:[#allocation47_spill] sm:$0xff] %v4867_v17  ;;  %v4871_v19 = vpop.f32.mrb[35].mxu0  ;;  %1971 = vst [vmem:[%s5037_s30 + $0x1e0] sm:$0xff] (!%p3192_p13), %v6530_v12  ;;  %v6531_v6 = vld [vmem:[#allocation41_spill] sm:$0xff] (!%p3192_p13) }
 0x2e4   : > { %v4869_v18 = vpop.f32.mrb[34].mxu1  ;;  %6449 = vst [vmem:[#allocation49_spill] sm:$0xff] %v4871_v19  ;;  %1972 = vst [vmem:[%s5037_s30 + $0x1e8] sm:$0xff] (!%p3192_p13), %v6531_v6  ;;  %v6532_v5 = vld [vmem:[#allocation40_spill] sm:$0xff] (!%p3192_p13) }
 0x2e5   : > { %6448 = vst [vmem:[#allocation48_spill] sm:$0xff] %v4869_v18  ;;  %v4873_v20 = vpop.f32.mrb[35].mxu1  ;;  %1973 = vst [vmem:[%s5037_s30 + $0x1f0] sm:$0xff] (!%p3192_p13), %v6532_v5  ;;  %v6533_v7 = vld [vmem:[#allocation42_spill] sm:$0xff] (!%p3192_p13) }
 0x2e6   : > { %6450 = vst [vmem:[#allocation50_spill] sm:$0xff] %v4873_v20  ;;  %v4875_v21 = vpop.f32.mrb[36].mxu0  ;;  %1974 = vst [vmem:[%s5037_s30 + $0x1f8] sm:$0xff] (!%p3192_p13), %v6533_v7  ;;  %v6534_v8 = vld [vmem:[#allocation43_spill] sm:$0xff] (!%p3192_p13) }
 0x2e7   : > { %6451 = vst [vmem:[#allocation51_spill] sm:$0xff] %v4875_v21  ;;  %v4879_v23 = vpop.f32.mrb[37].mxu0  ;;  %1975 = vst [vmem:[%s5037_s30 + $0x200] sm:$0xff] (!%p3192_p13), %v6534_v8  ;;  %v6535_v10 = vld [vmem:[#allocation45_spill] sm:$0xff] (!%p3192_p13) }
 0x2e8   : > { %v4877_v22 = vpop.f32.mrb[36].mxu1  ;;  %6453 = vst [vmem:[#allocation53_spill] sm:$0xff] %v4879_v23  ;;  %1976 = vst [vmem:[%s5037_s30 + $0x208] sm:$0xff] (!%p3192_p13), %v6535_v10  ;;  %v6536_v9 = vld [vmem:[#allocation44_spill] sm:$0xff] (!%p3192_p13) }
 0x2e9   : > { %6452 = vst [vmem:[#allocation52_spill] sm:$0xff] %v4877_v22  ;;  %v4881_v13 = vpop.f32.mrb[37].mxu1  ;;  %1977 = vst [vmem:[%s5037_s30 + $0x210] sm:$0xff] (!%p3192_p13), %v6536_v9  ;;  %v6537_v11 = vld [vmem:[#allocation46_spill] sm:$0xff] (!%p3192_p13) }
 0x2ea   : > { %6454 = vst [vmem:[#allocation54_spill] sm:$0xff] %v4881_v13  ;;  %v4883_v14 = vpop.f32.mrb[38].mxu0  ;;  %1978 = vst [vmem:[%s5037_s30 + $0x218] sm:$0xff] (!%p3192_p13), %v6537_v11  ;;  %v6538_v12 = vld [vmem:[#allocation47_spill] sm:$0xff] (!%p3192_p13) }
 0x2eb   : > { %6455 = vst [vmem:[#allocation55_spill] sm:$0xff] %v4883_v14  ;;  %v4887_v16 = vpop.f32.mrb[39].mxu0  ;;  %1979 = vst [vmem:[%s5037_s30 + $0x220] sm:$0xff] (!%p3192_p13), %v6538_v12  ;;  %v6539_v6 = vld [vmem:[#allocation49_spill] sm:$0xff] (!%p3192_p13) }
 0x2ec   : > { %v4885_v15 = vpop.f32.mrb[38].mxu1  ;;  %6457 = vst [vmem:[#allocation57_spill] sm:$0xff] %v4887_v16  ;;  %1980 = vst [vmem:[%s5037_s30 + $0x228] sm:$0xff] (!%p3192_p13), %v6539_v6  ;;  %v6540_v5 = vld [vmem:[#allocation48_spill] sm:$0xff] (!%p3192_p13) }
 0x2ed   : > { %6456 = vst [vmem:[#allocation56_spill] sm:$0xff] %v4885_v15  ;;  %v4889_v17 = vpop.f32.mrb[39].mxu1  ;;  %1981 = vst [vmem:[%s5037_s30 + $0x230] sm:$0xff] (!%p3192_p13), %v6540_v5  ;;  %v6541_v7 = vld [vmem:[#allocation50_spill] sm:$0xff] (!%p3192_p13) }
 0x2ee   : > { %6458 = vst [vmem:[#allocation58_spill] sm:$0xff] %v4889_v17  ;;  %v4891_v18 = vpop.f32.mrb[40].mxu0  ;;  %1982 = vst [vmem:[%s5037_s30 + $0x238] sm:$0xff] (!%p3192_p13), %v6541_v7  ;;  %v6542_v8 = vld [vmem:[#allocation51_spill] sm:$0xff] (!%p3192_p13) }
 0x2ef   : > { %6459 = vst [vmem:[#allocation59_spill] sm:$0xff] %v4891_v18  ;;  %v4895_v20 = vpop.f32.mrb[41].mxu0  ;;  %1983 = vst [vmem:[%s5037_s30 + $0x240] sm:$0xff] (!%p3192_p13), %v6542_v8  ;;  %v6543_v10 = vld [vmem:[#allocation53_spill] sm:$0xff] (!%p3192_p13) }
 0x2f0   : > { %v4893_v19 = vpop.f32.mrb[40].mxu1  ;;  %6461 = vst [vmem:[#allocation61_spill] sm:$0xff] %v4895_v20  ;;  %1984 = vst [vmem:[%s5037_s30 + $0x248] sm:$0xff] (!%p3192_p13), %v6543_v10  ;;  %v6544_v9 = vld [vmem:[#allocation52_spill] sm:$0xff] (!%p3192_p13) }
 0x2f1   : > { %6460 = vst [vmem:[#allocation60_spill] sm:$0xff] %v4893_v19  ;;  %v4897_v21 = vpop.f32.mrb[41].mxu1  ;;  %1985 = vst [vmem:[%s5037_s30 + $0x250] sm:$0xff] (!%p3192_p13), %v6544_v9  ;;  %v6545_v11 = vld [vmem:[#allocation54_spill] sm:$0xff] (!%p3192_p13) }
 0x2f2   : > { %6462 = vst [vmem:[#allocation62_spill] sm:$0xff] %v4897_v21  ;;  %v4899_v22 = vpop.f32.mrb[42].mxu0  ;;  %1986 = vst [vmem:[%s5037_s30 + $0x258] sm:$0xff] (!%p3192_p13), %v6545_v11  ;;  %v6546_v12 = vld [vmem:[#allocation55_spill] sm:$0xff] (!%p3192_p13) }
 0x2f3   : > { %6463 = vst [vmem:[#allocation63_spill] sm:$0xff] %v4899_v22  ;;  %v4903_v13 = vpop.f32.mrb[43].mxu0  ;;  %1987 = vst [vmem:[%s5037_s30 + $0x260] sm:$0xff] (!%p3192_p13), %v6546_v12  ;;  %v6547_v6 = vld [vmem:[#allocation57_spill] sm:$0xff] (!%p3192_p13) }
 0x2f4   : > { %v4901_v23 = vpop.f32.mrb[42].mxu1  ;;  %6465 = vst [vmem:[#allocation65_spill] sm:$0xff] %v4903_v13  ;;  %1988 = vst [vmem:[%s5037_s30 + $0x268] sm:$0xff] (!%p3192_p13), %v6547_v6  ;;  %v6548_v5 = vld [vmem:[#allocation56_spill] sm:$0xff] (!%p3192_p13) }
 0x2f5   : > { %6464 = vst [vmem:[#allocation64_spill] sm:$0xff] %v4901_v23  ;;  %v4905_v14 = vpop.f32.mrb[43].mxu1  ;;  %1989 = vst [vmem:[%s5037_s30 + $0x270] sm:$0xff] (!%p3192_p13), %v6548_v5  ;;  %v6549_v7 = vld [vmem:[#allocation58_spill] sm:$0xff] (!%p3192_p13) }
 0x2f6   : > { %6466 = vst [vmem:[#allocation66_spill] sm:$0xff] %v4905_v14  ;;  %v4907_v15 = vpop.f32.mrb[44].mxu0  ;;  %1990 = vst [vmem:[%s5037_s30 + $0x278] sm:$0xff] (!%p3192_p13), %v6549_v7  ;;  %v6550_v8 = vld [vmem:[#allocation59_spill] sm:$0xff] (!%p3192_p13) }
 0x2f7   : > { %6467 = vst [vmem:[#allocation67_spill] sm:$0xff] %v4907_v15  ;;  %v4911_v17 = vpop.f32.mrb[45].mxu0  ;;  %1991 = vst [vmem:[%s5037_s30 + $0x280] sm:$0xff] (!%p3192_p13), %v6550_v8  ;;  %v6551_v10 = vld [vmem:[#allocation61_spill] sm:$0xff] (!%p3192_p13) }
 0x2f8   : > { %v4909_v16 = vpop.f32.mrb[44].mxu1  ;;  %6469 = vst [vmem:[#allocation69_spill] sm:$0xff] %v4911_v17  ;;  %1992 = vst [vmem:[%s5037_s30 + $0x288] sm:$0xff] (!%p3192_p13), %v6551_v10  ;;  %v6552_v9 = vld [vmem:[#allocation60_spill] sm:$0xff] (!%p3192_p13) }
 0x2f9   : > { %6468 = vst [vmem:[#allocation68_spill] sm:$0xff] %v4909_v16  ;;  %v4913_v18 = vpop.f32.mrb[45].mxu1  ;;  %1993 = vst [vmem:[%s5037_s30 + $0x290] sm:$0xff] (!%p3192_p13), %v6552_v9  ;;  %v6553_v11 = vld [vmem:[#allocation62_spill] sm:$0xff] (!%p3192_p13) }
 0x2fa   : > { %6470 = vst [vmem:[#allocation70_spill] sm:$0xff] %v4913_v18  ;;  %v4915_v19 = vpop.f32.mrb[46].mxu0  ;;  %1994 = vst [vmem:[%s5037_s30 + $0x298] sm:$0xff] (!%p3192_p13), %v6553_v11  ;;  %v6554_v12 = vld [vmem:[#allocation63_spill] sm:$0xff] (!%p3192_p13) }
 0x2fb   : > { %6471 = vst [vmem:[#allocation71_spill] sm:$0xff] %v4915_v19  ;;  %v4919_v21 = vpop.f32.mrb[47].mxu0  ;;  %1995 = vst [vmem:[%s5037_s30 + $0x2a0] sm:$0xff] (!%p3192_p13), %v6554_v12  ;;  %v6555_v6 = vld [vmem:[#allocation65_spill] sm:$0xff] (!%p3192_p13) }
 0x2fc   : > { %v4917_v20 = vpop.f32.mrb[46].mxu1  ;;  %6473 = vst [vmem:[#allocation73_spill] sm:$0xff] %v4919_v21  ;;  %1996 = vst [vmem:[%s5037_s30 + $0x2a8] sm:$0xff] (!%p3192_p13), %v6555_v6  ;;  %v6556_v5 = vld [vmem:[#allocation64_spill] sm:$0xff] (!%p3192_p13) }
 0x2fd   : > { %6472 = vst [vmem:[#allocation72_spill] sm:$0xff] %v4917_v20  ;;  %v4921_v22 = vpop.f32.mrb[47].mxu1  ;;  %1997 = vst [vmem:[%s5037_s30 + $0x2b0] sm:$0xff] (!%p3192_p13), %v6556_v5  ;;  %v6557_v7 = vld [vmem:[#allocation66_spill] sm:$0xff] (!%p3192_p13) }
 0x2fe   : > { %6474 = vst [vmem:[#allocation74_spill] sm:$0xff] %v4921_v22  ;;  %v4923_v23 = vpop.f32.mrb[48].mxu0  ;;  %1998 = vst [vmem:[%s5037_s30 + $0x2b8] sm:$0xff] (!%p3192_p13), %v6557_v7  ;;  %v6558_v8 = vld [vmem:[#allocation67_spill] sm:$0xff] (!%p3192_p13) }
 0x2ff   : > { %6475 = vst [vmem:[#allocation75_spill] sm:$0xff] %v4923_v23  ;;  %v4927_v14 = vpop.f32.mrb[49].mxu0  ;;  %1999 = vst [vmem:[%s5037_s30 + $0x2c0] sm:$0xff] (!%p3192_p13), %v6558_v8  ;;  %v6559_v10 = vld [vmem:[#allocation69_spill] sm:$0xff] (!%p3192_p13) }
 0x300   : > { %v4925_v13 = vpop.f32.mrb[48].mxu1  ;;  %6477 = vst [vmem:[#allocation77_spill] sm:$0xff] %v4927_v14  ;;  %2000 = vst [vmem:[%s5037_s30 + $0x2c8] sm:$0xff] (!%p3192_p13), %v6559_v10  ;;  %v6560_v9 = vld [vmem:[#allocation68_spill] sm:$0xff] (!%p3192_p13) }
 0x301   : > { %6476 = vst [vmem:[#allocation76_spill] sm:$0xff] %v4925_v13  ;;  %v4929_v15 = vpop.f32.mrb[49].mxu1  ;;  %2001 = vst [vmem:[%s5037_s30 + $0x2d0] sm:$0xff] (!%p3192_p13), %v6560_v9  ;;  %v6561_v11 = vld [vmem:[#allocation70_spill] sm:$0xff] (!%p3192_p13) }
 0x302   : > { %6478 = vst [vmem:[#allocation78_spill] sm:$0xff] %v4929_v15  ;;  %v4931_v16 = vpop.f32.mrb[50].mxu0  ;;  %2002 = vst [vmem:[%s5037_s30 + $0x2d8] sm:$0xff] (!%p3192_p13), %v6561_v11  ;;  %v6562_v12 = vld [vmem:[#allocation71_spill] sm:$0xff] (!%p3192_p13) }
 0x303   : > { %6479 = vst [vmem:[#allocation79_spill] sm:$0xff] %v4931_v16  ;;  %v4935_v18 = vpop.f32.mrb[51].mxu0  ;;  %2003 = vst [vmem:[%s5037_s30 + $0x2e0] sm:$0xff] (!%p3192_p13), %v6562_v12  ;;  %v6563_v6 = vld [vmem:[#allocation73_spill] sm:$0xff] (!%p3192_p13) }
 0x304   : > { %v4933_v17 = vpop.f32.mrb[50].mxu1  ;;  %6481 = vst [vmem:[#allocation81_spill] sm:$0xff] %v4935_v18  ;;  %2004 = vst [vmem:[%s5037_s30 + $0x2e8] sm:$0xff] (!%p3192_p13), %v6563_v6  ;;  %v6564_v5 = vld [vmem:[#allocation72_spill] sm:$0xff] (!%p3192_p13) }
 0x305   : > { %6480 = vst [vmem:[#allocation80_spill] sm:$0xff] %v4933_v17  ;;  %v4937_v19 = vpop.f32.mrb[51].mxu1  ;;  %2005 = vst [vmem:[%s5037_s30 + $0x2f0] sm:$0xff] (!%p3192_p13), %v6564_v5  ;;  %v6565_v7 = vld [vmem:[#allocation74_spill] sm:$0xff] (!%p3192_p13) }
 0x306   : > { %6482 = vst [vmem:[#allocation82_spill] sm:$0xff] %v4937_v19  ;;  %v4939_v20 = vpop.f32.mrb[52].mxu0  ;;  %2006 = vst [vmem:[%s5037_s30 + $0x2f8] sm:$0xff] (!%p3192_p13), %v6565_v7  ;;  %v6566_v8 = vld [vmem:[#allocation75_spill] sm:$0xff] (!%p3192_p13) }
 0x307   : > { %6483 = vst [vmem:[#allocation83_spill] sm:$0xff] %v4939_v20  ;;  %v4943_v22 = vpop.f32.mrb[53].mxu0  ;;  %2007 = vst [vmem:[%s5037_s30 + $0x300] sm:$0xff] (!%p3192_p13), %v6566_v8  ;;  %v6567_v10 = vld [vmem:[#allocation77_spill] sm:$0xff] (!%p3192_p13) }
 0x308   : > { %v4941_v21 = vpop.f32.mrb[52].mxu1  ;;  %6485 = vst [vmem:[#allocation85_spill] sm:$0xff] %v4943_v22  ;;  %2008 = vst [vmem:[%s5037_s30 + $0x308] sm:$0xff] (!%p3192_p13), %v6567_v10  ;;  %v6568_v9 = vld [vmem:[#allocation76_spill] sm:$0xff] (!%p3192_p13) }
 0x309   : > { %6484 = vst [vmem:[#allocation84_spill] sm:$0xff] %v4941_v21  ;;  %v4945_v23 = vpop.f32.mrb[53].mxu1  ;;  %2009 = vst [vmem:[%s5037_s30 + $0x310] sm:$0xff] (!%p3192_p13), %v6568_v9  ;;  %v6569_v11 = vld [vmem:[#allocation78_spill] sm:$0xff] (!%p3192_p13) }
 0x30a   : > { %6486 = vst [vmem:[#allocation86_spill] sm:$0xff] %v4945_v23  ;;  %v4947_v13 = vpop.f32.mrb[54].mxu0  ;;  %2010 = vst [vmem:[%s5037_s30 + $0x318] sm:$0xff] (!%p3192_p13), %v6569_v11  ;;  %v6570_v12 = vld [vmem:[#allocation79_spill] sm:$0xff] (!%p3192_p13) }
 0x30b   : > { %6487 = vst [vmem:[#allocation87_spill] sm:$0xff] %v4947_v13  ;;  %v4951_v15 = vpop.f32.mrb[55].mxu0  ;;  %2011 = vst [vmem:[%s5037_s30 + $0x320] sm:$0xff] (!%p3192_p13), %v6570_v12  ;;  %v6571_v6 = vld [vmem:[#allocation81_spill] sm:$0xff] (!%p3192_p13) }
 0x30c   : > { %v4949_v14 = vpop.f32.mrb[54].mxu1  ;;  %6489 = vst [vmem:[#allocation89_spill] sm:$0xff] %v4951_v15  ;;  %2012 = vst [vmem:[%s5037_s30 + $0x328] sm:$0xff] (!%p3192_p13), %v6571_v6  ;;  %v6572_v5 = vld [vmem:[#allocation80_spill] sm:$0xff] (!%p3192_p13) }
 0x30d   : > { %6488 = vst [vmem:[#allocation88_spill] sm:$0xff] %v4949_v14  ;;  %v4953_v16 = vpop.f32.mrb[55].mxu1  ;;  %2013 = vst [vmem:[%s5037_s30 + $0x330] sm:$0xff] (!%p3192_p13), %v6572_v5  ;;  %v6573_v7 = vld [vmem:[#allocation82_spill] sm:$0xff] (!%p3192_p13) }
 0x30e   : > { %6490 = vst [vmem:[#allocation90_spill] sm:$0xff] %v4953_v16  ;;  %v4955_v17 = vpop.f32.mrb[56].mxu0  ;;  %2014 = vst [vmem:[%s5037_s30 + $0x338] sm:$0xff] (!%p3192_p13), %v6573_v7  ;;  %v6574_v8 = vld [vmem:[#allocation83_spill] sm:$0xff] (!%p3192_p13) }
 0x30f   : > { %6491 = vst [vmem:[#allocation91_spill] sm:$0xff] %v4955_v17  ;;  %v4959_v19 = vpop.f32.mrb[57].mxu0  ;;  %2015 = vst [vmem:[%s5037_s30 + $0x340] sm:$0xff] (!%p3192_p13), %v6574_v8  ;;  %v6575_v10 = vld [vmem:[#allocation85_spill] sm:$0xff] (!%p3192_p13) }
 0x310   : > { %v4957_v18 = vpop.f32.mrb[56].mxu1  ;;  %6493 = vst [vmem:[#allocation93_spill] sm:$0xff] %v4959_v19  ;;  %2016 = vst [vmem:[%s5037_s30 + $0x348] sm:$0xff] (!%p3192_p13), %v6575_v10  ;;  %v6576_v9 = vld [vmem:[#allocation84_spill] sm:$0xff] (!%p3192_p13) }
 0x311   : > { %6492 = vst [vmem:[#allocation92_spill] sm:$0xff] %v4957_v18  ;;  %v4961_v20 = vpop.f32.mrb[57].mxu1  ;;  %2017 = vst [vmem:[%s5037_s30 + $0x350] sm:$0xff] (!%p3192_p13), %v6576_v9  ;;  %v6577_v11 = vld [vmem:[#allocation86_spill] sm:$0xff] (!%p3192_p13) }
 0x312   : > { %6494 = vst [vmem:[#allocation94_spill] sm:$0xff] %v4961_v20  ;;  %v4963_v21 = vpop.f32.mrb[58].mxu0  ;;  %2018 = vst [vmem:[%s5037_s30 + $0x358] sm:$0xff] (!%p3192_p13), %v6577_v11  ;;  %v6578_v12 = vld [vmem:[#allocation87_spill] sm:$0xff] (!%p3192_p13) }
 0x313   : > { %6495 = vst [vmem:[#allocation95_spill] sm:$0xff] %v4963_v21  ;;  %v4967_v23 = vpop.f32.mrb[59].mxu0  ;;  %2019 = vst [vmem:[%s5037_s30 + $0x360] sm:$0xff] (!%p3192_p13), %v6578_v12  ;;  %v6579_v6 = vld [vmem:[#allocation89_spill] sm:$0xff] (!%p3192_p13) }
 0x314   : > { %v4965_v22 = vpop.f32.mrb[58].mxu1  ;;  %6497 = vst [vmem:[#allocation97_spill] sm:$0xff] %v4967_v23  ;;  %2020 = vst [vmem:[%s5037_s30 + $0x368] sm:$0xff] (!%p3192_p13), %v6579_v6  ;;  %v6580_v5 = vld [vmem:[#allocation88_spill] sm:$0xff] (!%p3192_p13) }
 0x315   : > { %6496 = vst [vmem:[#allocation96_spill] sm:$0xff] %v4965_v22  ;;  %v4969_v13 = vpop.f32.mrb[59].mxu1  ;;  %2021 = vst [vmem:[%s5037_s30 + $0x370] sm:$0xff] (!%p3192_p13), %v6580_v5  ;;  %v6581_v7 = vld [vmem:[#allocation90_spill] sm:$0xff] (!%p3192_p13) }
 0x316   : > { %6498 = vst [vmem:[#allocation98_spill] sm:$0xff] %v4969_v13  ;;  %v4971_v14 = vpop.f32.mrb[60].mxu0  ;;  %2022 = vst [vmem:[%s5037_s30 + $0x378] sm:$0xff] (!%p3192_p13), %v6581_v7  ;;  %v6582_v8 = vld [vmem:[#allocation91_spill] sm:$0xff] (!%p3192_p13) }
 0x317   : > { %6499 = vst [vmem:[#allocation99_spill] sm:$0xff] %v4971_v14  ;;  %v4975_v16 = vpop.f32.mrb[61].mxu0  ;;  %2023 = vst [vmem:[%s5037_s30 + $0x380] sm:$0xff] (!%p3192_p13), %v6582_v8  ;;  %v6583_v10 = vld [vmem:[#allocation93_spill] sm:$0xff] (!%p3192_p13) }
 0x318   : > { %v4973_v15 = vpop.f32.mrb[60].mxu1  ;;  %6501 = vst [vmem:[#allocation101_spill] sm:$0xff] %v4975_v16  ;;  %2024 = vst [vmem:[%s5037_s30 + $0x388] sm:$0xff] (!%p3192_p13), %v6583_v10  ;;  %v6584_v9 = vld [vmem:[#allocation92_spill] sm:$0xff] (!%p3192_p13) }
 0x319   : > { %6500 = vst [vmem:[#allocation100_spill] sm:$0xff] %v4973_v15  ;;  %v4977_v17 = vpop.f32.mrb[61].mxu1  ;;  %2025 = vst [vmem:[%s5037_s30 + $0x390] sm:$0xff] (!%p3192_p13), %v6584_v9  ;;  %v6585_v11 = vld [vmem:[#allocation94_spill] sm:$0xff] (!%p3192_p13) }
 0x31a   : > { %6502 = vst [vmem:[#allocation102_spill] sm:$0xff] %v4977_v17  ;;  %v4979_v18 = vpop.f32.mrb[62].mxu0  ;;  %2026 = vst [vmem:[%s5037_s30 + $0x398] sm:$0xff] (!%p3192_p13), %v6585_v11  ;;  %v6586_v12 = vld [vmem:[#allocation95_spill] sm:$0xff] (!%p3192_p13) }
 0x31b   : > { %6503 = vst [vmem:[#allocation103_spill] sm:$0xff] %v4979_v18  ;;  %v4983_v20 = vpop.f32.mrb[63].mxu0  ;;  %2027 = vst [vmem:[%s5037_s30 + $0x3a0] sm:$0xff] (!%p3192_p13), %v6586_v12  ;;  %v6587_v6 = vld [vmem:[#allocation97_spill] sm:$0xff] (!%p3192_p13) }
 0x31c   : > { %v4981_v19 = vpop.f32.mrb[62].mxu1  ;;  %6505 = vst [vmem:[#allocation105_spill] sm:$0xff] %v4983_v20  ;;  %2028 = vst [vmem:[%s5037_s30 + $0x3a8] sm:$0xff] (!%p3192_p13), %v6587_v6  ;;  %v6588_v5 = vld [vmem:[#allocation96_spill] sm:$0xff] (!%p3192_p13) }
 0x31d   : > { %6504 = vst [vmem:[#allocation104_spill] sm:$0xff] %v4981_v19  ;;  %v4985_v21 = vpop.f32.mrb[63].mxu1  ;;  %2029 = vst [vmem:[%s5037_s30 + $0x3b0] sm:$0xff] (!%p3192_p13), %v6588_v5  ;;  %v6589_v7 = vld [vmem:[#allocation98_spill] sm:$0xff] (!%p3192_p13) }
 0x31e   : > { %6506 = vst [vmem:[#allocation106_spill] sm:$0xff] %v4985_v21  ;;  %v4987_v22 = vpop.f32.mrb[64].mxu0  ;;  %2030 = vst [vmem:[%s5037_s30 + $0x3b8] sm:$0xff] (!%p3192_p13), %v6589_v7  ;;  %v6590_v8 = vld [vmem:[#allocation99_spill] sm:$0xff] (!%p3192_p13) }
 0x31f   : > { %6507 = vst [vmem:[#allocation107_spill] sm:$0xff] %v4987_v22  ;;  %v4991_v13 = vpop.f32.mrb[65].mxu0  ;;  %2031 = vst [vmem:[%s5037_s30 + $0x3c0] sm:$0xff] (!%p3192_p13), %v6590_v8  ;;  %v6591_v10 = vld [vmem:[#allocation101_spill] sm:$0xff] (!%p3192_p13) }
 0x320   : > { %v4989_v23 = vpop.f32.mrb[64].mxu1  ;;  %6509 = vst [vmem:[#allocation109_spill] sm:$0xff] %v4991_v13  ;;  %2032 = vst [vmem:[%s5037_s30 + $0x3c8] sm:$0xff] (!%p3192_p13), %v6591_v10  ;;  %v6592_v9 = vld [vmem:[#allocation100_spill] sm:$0xff] (!%p3192_p13) }
 0x321   : > { %6508 = vst [vmem:[#allocation108_spill] sm:$0xff] %v4989_v23  ;;  %v4993_v14 = vpop.f32.mrb[65].mxu1  ;;  %2033 = vst [vmem:[%s5037_s30 + $0x3d0] sm:$0xff] (!%p3192_p13), %v6592_v9  ;;  %v6593_v11 = vld [vmem:[#allocation102_spill] sm:$0xff] (!%p3192_p13) }
 0x322   : > { %6510 = vst [vmem:[#allocation110_spill] sm:$0xff] %v4993_v14  ;;  %v4995_v15 = vpop.f32.mrb[66].mxu0  ;;  %2034 = vst [vmem:[%s5037_s30 + $0x3d8] sm:$0xff] (!%p3192_p13), %v6593_v11  ;;  %v6594_v12 = vld [vmem:[#allocation103_spill] sm:$0xff] (!%p3192_p13) }
 0x323   : > { %6511 = vst [vmem:[#allocation111_spill] sm:$0xff] %v4995_v15  ;;  %v4999_v17 = vpop.f32.mrb[67].mxu0  ;;  %2035 = vst [vmem:[%s5037_s30 + $0x3e0] sm:$0xff] (!%p3192_p13), %v6594_v12  ;;  %v6595_v6 = vld [vmem:[#allocation105_spill] sm:$0xff] (!%p3192_p13) }
 0x324   : > { %v4997_v16 = vpop.f32.mrb[66].mxu1  ;;  %6513 = vst [vmem:[#allocation113_spill] sm:$0xff] %v4999_v17  ;;  %2036 = vst [vmem:[%s5037_s30 + $0x3e8] sm:$0xff] (!%p3192_p13), %v6595_v6  ;;  %v6596_v5 = vld [vmem:[#allocation104_spill] sm:$0xff] (!%p3192_p13) }
 0x325   : > { %6512 = vst [vmem:[#allocation112_spill] sm:$0xff] %v4997_v16  ;;  %v5001_v18 = vpop.f32.mrb[67].mxu1  ;;  %2037 = vst [vmem:[%s5037_s30 + $0x3f0] sm:$0xff] (!%p3192_p13), %v6596_v5  ;;  %v6597_v7 = vld [vmem:[#allocation106_spill] sm:$0xff] (!%p3192_p13) }
 0x326   : > { %6514 = vst [vmem:[#allocation114_spill] sm:$0xff] %v5001_v18  ;;  %v5003_v19 = vpop.f32.mrb[68].mxu0  ;;  %2038 = vst [vmem:[%s5037_s30 + $0x3f8] sm:$0xff] (!%p3192_p13), %v6597_v7  ;;  %v6598_v8 = vld [vmem:[#allocation107_spill] sm:$0xff] (!%p3192_p13) }
 0x327   : > { %6515 = vst [vmem:[#allocation115_spill] sm:$0xff] %v5003_v19  ;;  %v5007_v22 = vpop.f32.mrb[69].mxu0  ;;  %2039 = vst [vmem:[%s5037_s30 + $0x400] sm:$0xff] (!%p3192_p13), %v6598_v8  ;;  %v6599_v10 = vld [vmem:[#allocation109_spill] sm:$0xff] (!%p3192_p13) }
 0x328   : > { %v5005_v21 = vpop.f32.mrb[68].mxu1  ;;  %6517 = vst [vmem:[#allocation117_spill] sm:$0xff] %v5007_v22  ;;  %2040 = vst [vmem:[%s5037_s30 + $0x408] sm:$0xff] (!%p3192_p13), %v6599_v10  ;;  %v6600_v9 = vld [vmem:[#allocation108_spill] sm:$0xff] (!%p3192_p13) }
 0x329   : > { %6516 = vst [vmem:[#allocation116_spill] sm:$0xff] %v5005_v21  ;;  %v5009_v23 = vpop.f32.mrb[69].mxu1  ;;  %2041 = vst [vmem:[%s5037_s30 + $0x410] sm:$0xff] (!%p3192_p13), %v6600_v9  ;;  %v6601_v11 = vld [vmem:[#allocation110_spill] sm:$0xff] (!%p3192_p13) }
 0x32a   : > { %6518 = vst [vmem:[#allocation118_spill] sm:$0xff] %v5009_v23  ;;  %v5011_v13 = vpop.f32.mrb[70].mxu0  ;;  %2042 = vst [vmem:[%s5037_s30 + $0x418] sm:$0xff] (!%p3192_p13), %v6601_v11  ;;  %v6602_v12 = vld [vmem:[#allocation111_spill] sm:$0xff] (!%p3192_p13) }
 0x32b   : > { %6519 = vst [vmem:[#allocation119_spill] sm:$0xff] %v5011_v13  ;;  %v5015_v15 = vpop.f32.mrb[71].mxu0  ;;  %2043 = vst [vmem:[%s5037_s30 + $0x420] sm:$0xff] (!%p3192_p13), %v6602_v12  ;;  %v6603_v6 = vld [vmem:[#allocation113_spill] sm:$0xff] (!%p3192_p13) }
 0x32c   : > { %v5013_v14 = vpop.f32.mrb[70].mxu1  ;;  %2044 = vst [vmem:[%s5037_s30 + $0x428] sm:$0xff] (!%p3192_p13), %v6603_v6  ;;  %v6604_v5 = vld [vmem:[#allocation112_spill] sm:$0xff] (!%p3192_p13)  ;;  %2052 = vst [vmem:[%s5037_s30 + $0x468] sm:$0xff] (!%p3192_p13), %v5015_v15 }
 0x32d   : > { %v5017_v16 = vpop.f32.mrb[71].mxu1  ;;  %2045 = vst [vmem:[%s5037_s30 + $0x430] sm:$0xff] (!%p3192_p13), %v6604_v5  ;;  %v6605_v7 = vld [vmem:[#allocation114_spill] sm:$0xff] (!%p3192_p13)  ;;  %2053 = vst [vmem:[%s5037_s30 + $0x470] sm:$0xff] (!%p3192_p13), %v5013_v14 }
 0x32e   : > { %v5019_v17 = vpop.f32.mrb[72].mxu0  ;;  %2046 = vst [vmem:[%s5037_s30 + $0x438] sm:$0xff] (!%p3192_p13), %v6605_v7  ;;  %v6606_v8 = vld [vmem:[#allocation115_spill] sm:$0xff] (!%p3192_p13)  ;;  %2054 = vst [vmem:[%s5037_s30 + $0x478] sm:$0xff] (!%p3192_p13), %v5017_v16 }
 0x32f   : > { %v5023_v19 = vpop.f32.mrb[73].mxu0  ;;  %2047 = vst [vmem:[%s5037_s30 + $0x440] sm:$0xff] (!%p3192_p13), %v6606_v8  ;;  %v6607_v10 = vld [vmem:[#allocation117_spill] sm:$0xff] (!%p3192_p13)  ;;  %2055 = vst [vmem:[%s5037_s30 + $0x480] sm:$0xff] (!%p3192_p13), %v5019_v17 }
 0x330   : > { %v5021_v18 = vpop.f32.mrb[72].mxu1  ;;  %1910 = sbr.rel (%p3192_p13) target bundleno = 823 (0x337), region = 48  ;;  %2048 = vst [vmem:[%s5037_s30 + $0x448] sm:$0xff] (!%p3192_p13), %v6607_v10  ;;  %v6608_v9 = vld [vmem:[#allocation116_spill] sm:$0xff] (!%p3192_p13)  ;;  %2056 = vst [vmem:[%s5037_s30 + $0x488] sm:$0xff] (!%p3192_p13), %v5023_v19 }
 0x331   : > { %v5025_v20 = vpop.f32.mrb[73].mxu1  ;;  %2049 = vst [vmem:[%s5037_s30 + $0x450] sm:$0xff] (!%p3192_p13), %v6608_v9  ;;  %v6609_v11 = vld [vmem:[#allocation118_spill] sm:$0xff] (!%p3192_p13)  ;;  %2057 = vst [vmem:[%s5037_s30 + $0x490] sm:$0xff] (!%p3192_p13), %v5021_v18 }
 0x332   : > { %v5027_v21 = vpop.f32.mrb[74].mxu0  ;;  %2050 = vst [vmem:[%s5037_s30 + $0x458] sm:$0xff] (!%p3192_p13), %v6609_v11  ;;  %v6610_v4 = vld [vmem:[#allocation119_spill] sm:$0xff] (!%p3192_p13)  ;;  %2058 = vst [vmem:[%s5037_s30 + $0x498] sm:$0xff] (!%p3192_p13), %v5025_v20 }
 0x333   : > { %v5031_v23 = vpop.f32.mrb[75].mxu0  ;;  %2051 = vst [vmem:[%s5037_s30 + $0x460] sm:$0xff] (!%p3192_p13), %v6610_v4  ;;  %2059 = vst [vmem:[%s5037_s30 + $0x4a0] sm:$0xff] (!%p3192_p13), %v5027_v21 }
 0x334   : > { %v5029_v22 = vpop.f32.mrb[74].mxu1  ;;  %6521 = vst [vmem:[#allocation121_spill] sm:$0xff] %v5031_v23  ;;  %2060 = vst [vmem:[%s5037_s30 + $0x4a8] sm:$0xff] (!%p3192_p13), %v5031_v23 }
 0x335   : > { %6520 = vst [vmem:[#allocation120_spill] sm:$0xff] %v5029_v22  ;;  %v5033_v13 = vpop.f32.mrb[75].mxu1  ;;  %2061 = vst [vmem:[%s5037_s30 + $0x4b0] sm:$0xff] (!%p3192_p13), %v5029_v22 }
 0x336   : > { %6522 = vst [vmem:[#allocation122_spill] sm:$0xff] %v5033_v13  ;;  %2062 = vst [vmem:[%s5037_s30 + $0x4b8] sm:$0xff] (!%p3192_p13), %v5033_v13 }
 0x337 PF: > { %p3193_p0 = scmp.le.s32.totalorder %s3971_s21, 0 }
 0x338   : > { %v2067_v4 = vld [vmem:[%s5037_s30] sm:$0xff] (!%p3193_p0)  ;;  %v2068_v12 = vld [vmem:[%s5037_s30 + $0x8] sm:$0xff] (!%p3193_p0)  ;;  %v2069_v6 = vld [vmem:[%s5037_s30 + $0x10] sm:$0xff] (!%p3193_p0) }
 0x339   : > { %2066 = sbr.rel (%p3193_p0) target bundleno = 928 (0x3a0), region = 52  ;;  %v2219_v5 = vadd.f32 (!%p3193_p0), %v2067_v4, %v4731_v24  ;;  %v2220_v7 = vadd.f32 (!%p3193_p0), %v2068_v12, %v4735_v26  ;;  %v2221_v8 = vadd.f32 (!%p3193_p0), %v2069_v6, %v4733_v25  ;;  %v2070_v10 = vld [vmem:[%s5037_s30 + $0x18] sm:$0xff] (!%p3193_p0)  ;;  %v2071_v9 = vld [vmem:[%s5037_s30 + $0x20] sm:$0xff] (!%p3193_p0)  ;;  %v2072_v11 = vld [vmem:[%s5037_s30 + $0x28] sm:$0xff] (!%p3193_p0) }
 0x33a   : > { %v2222_v13 = vadd.f32 (!%p3193_p0), %v2070_v10, %v4737_v27  ;;  %v2223_v22 = vadd.f32 (!%p3193_p0), %v2071_v9, %v4739_v28  ;;  %v2224_v23 = vadd.f32 (!%p3193_p0), %v2072_v11, %v4743_v30  ;;  %v2073_v24 = vld [vmem:[%s5037_s30 + $0x30] sm:$0xff] (!%p3193_p0)  ;;  %v2074_v4 = vld [vmem:[%s5037_s30 + $0x38] sm:$0xff] (!%p3193_p0)  ;;  %v2075_v26 = vld [vmem:[%s5037_s30 + $0x40] sm:$0xff] (!%p3193_p0) }
 0x33b   : > { %2371 = vst [vmem:[%s5037_s30] sm:$0xff] (!%p3193_p0), %v2219_v5  ;;  %2372 = vst [vmem:[%s5037_s30 + $0x8] sm:$0xff] (!%p3193_p0), %v2220_v7  ;;  %v2225_v25 = vadd.f32 (!%p3193_p0), %v2073_v24, %v4741_v29  ;;  %v2226_v27 = vadd.f32 (!%p3193_p0), %v2074_v4, %v4745_v31  ;;  %v2227_v28 = vadd.f32 (!%p3193_p0), %v2075_v26, %v4747_v32  ;;  %v2076_v12 = vld [vmem:[%s5037_s30 + $0x48] sm:$0xff] (!%p3193_p0)  ;;  %v2077_v30 = vld [vmem:[%s5037_s30 + $0x50] sm:$0xff] (!%p3193_p0) }
 0x33c   : > { %2373 = vst [vmem:[%s5037_s30 + $0x10] sm:$0xff] (!%p3193_p0), %v2221_v8  ;;  %v2078_v6 = vld [vmem:[%s5037_s30 + $0x58] sm:$0xff] (!%p3193_p0)  ;;  %2374 = vst [vmem:[%s5037_s30 + $0x18] sm:$0xff] (!%p3193_p0), %v2222_v13  ;;  %v2228_v5 = vadd.f32 (!%p3193_p0), %v2076_v12, %v4751_v34  ;;  %v2229_v29 = vadd.f32 (!%p3193_p0), %v2077_v30, %v4749_v33  ;;  %v2079_v7 = vld [vmem:[%s5037_s30 + $0x60] sm:$0xff] (!%p3193_p0) }
 0x33d   : > { %2375 = vst [vmem:[%s5037_s30 + $0x20] sm:$0xff] (!%p3193_p0), %v2223_v22  ;;  %2376 = vst [vmem:[%s5037_s30 + $0x28] sm:$0xff] (!%p3193_p0), %v2224_v23  ;;  %v2230_v31 = vadd.f32 (!%p3193_p0), %v2078_v6, %v4753_v35  ;;  %v2080_v32 = vld [vmem:[%s5037_s30 + $0x68] sm:$0xff] (!%p3193_p0)  ;;  %v2081_v8 = vld [vmem:[%s5037_s30 + $0x70] sm:$0xff] (!%p3193_p0)  ;;  %v2231_v13 = vadd.f32 (!%p3193_p0), %v2079_v7, %v4755_v36 }
 0x33e   : > { %2377 = vst [vmem:[%s5037_s30 + $0x30] sm:$0xff] (!%p3193_p0), %v2225_v25  ;;  %2378 = vst [vmem:[%s5037_s30 + $0x38] sm:$0xff] (!%p3193_p0), %v2226_v27  ;;  %v2232_v34 = vadd.f32 (!%p3193_p0), %v2080_v32, %v4759_v38  ;;  %v2233_v33 = vadd.f32 (!%p3193_p0), %v2081_v8, %v4757_v37  ;;  %v2082_v22 = vld [vmem:[%s5037_s30 + $0x78] sm:$0xff] (!%p3193_p0)  ;;  %v2083_v35 = vld [vmem:[%s5037_s30 + $0x80] sm:$0xff] (!%p3193_p0) }
 0x33f   : > { %2379 = vst [vmem:[%s5037_s30 + $0x40] sm:$0xff] (!%p3193_p0), %v2227_v28  ;;  %v2084_v23 = vld [vmem:[%s5037_s30 + $0x88] sm:$0xff] (!%p3193_p0)  ;;  %2380 = vst [vmem:[%s5037_s30 + $0x48] sm:$0xff] (!%p3193_p0), %v2228_v5  ;;  %v2234_v10 = vadd.f32 (!%p3193_p0), %v2082_v22, %v4761_v39  ;;  %v2235_v36 = vadd.f32 (!%p3193_p0), %v2083_v35, %v4763_v40  ;;  %v2085_v9 = vld [vmem:[%s5037_s30 + $0x90] sm:$0xff] (!%p3193_p0) }
 0x340   : > { %2381 = vst [vmem:[%s5037_s30 + $0x50] sm:$0xff] %v2229_v29  ;;  %2382 = vst [vmem:[%s5037_s30 + $0x58] sm:$0xff] %v2230_v31  ;;  %v2236_v38 = vadd.f32 %v2084_v23, %v4767_v42  ;;  %v2086_v37 = vld [vmem:[%s5037_s30 + $0x98] sm:$0xff]  ;;  %v2087_v11 = vld [vmem:[%s5037_s30 + $0xa0] sm:$0xff]  ;;  %v2237_v24 = vadd.f32 %v2085_v9, %v4765_v41 }
 0x341   : > { %2383 = vst [vmem:[%s5037_s30 + $0x60] sm:$0xff] %v2231_v13  ;;  %2384 = vst [vmem:[%s5037_s30 + $0x68] sm:$0xff] %v2232_v34  ;;  %v2238_v39 = vadd.f32 %v2086_v37, %v4769_v43  ;;  %v2239_v40 = vadd.f32 %v2087_v11, %v4771_v44  ;;  %v2088_v4 = vld [vmem:[%s5037_s30 + $0xa8] sm:$0xff]  ;;  %v2089_v42 = vld [vmem:[%s5037_s30 + $0xb0] sm:$0xff] }
 0x342   : > { %2385 = vst [vmem:[%s5037_s30 + $0x70] sm:$0xff] %v2233_v33  ;;  %v2090_v26 = vld [vmem:[%s5037_s30 + $0xb8] sm:$0xff]  ;;  %2386 = vst [vmem:[%s5037_s30 + $0x78] sm:$0xff] %v2234_v10  ;;  %v2240_v25 = vadd.f32 %v2088_v4, %v4775_v46  ;;  %v2241_v41 = vadd.f32 %v2089_v42, %v4773_v45  ;;  %v2091_v27 = vld [vmem:[%s5037_s30 + $0xc0] sm:$0xff] }
 0x343   : > { %2387 = vst [vmem:[%s5037_s30 + $0x80] sm:$0xff] %v2235_v36  ;;  %2388 = vst [vmem:[%s5037_s30 + $0x88] sm:$0xff] %v2236_v38  ;;  %v2242_v43 = vadd.f32 %v2090_v26, %v4777_v47  ;;  %v2092_v44 = vld [vmem:[%s5037_s30 + $0xc8] sm:$0xff]  ;;  %v2093_v28 = vld [vmem:[%s5037_s30 + $0xd0] sm:$0xff]  ;;  %v2243_v12 = vadd.f32 %v2091_v27, %v4779_v48 }
 0x344   : > { %2389 = vst [vmem:[%s5037_s30 + $0x90] sm:$0xff] %v2237_v24  ;;  %2390 = vst [vmem:[%s5037_s30 + $0x98] sm:$0xff] %v2238_v39  ;;  %v2244_v46 = vadd.f32 %v2092_v44, %v4783_v50  ;;  %v2245_v45 = vadd.f32 %v2093_v28, %v4781_v49  ;;  %v2094_v30 = vld [vmem:[%s5037_s30 + $0xd8] sm:$0xff]  ;;  %v2095_v47 = vld [vmem:[%s5037_s30 + $0xe0] sm:$0xff] }
 0x345   : > { %2391 = vst [vmem:[%s5037_s30 + $0xa0] sm:$0xff] %v2239_v40  ;;  %v2096_v6 = vld [vmem:[%s5037_s30 + $0xe8] sm:$0xff]  ;;  %2392 = vst [vmem:[%s5037_s30 + $0xa8] sm:$0xff] %v2240_v25  ;;  %v2246_v5 = vadd.f32 %v2094_v30, %v4785_v51  ;;  %v2247_v48 = vadd.f32 %v2095_v47, %v4787_v52  ;;  %v2097_v29 = vld [vmem:[%s5037_s30 + $0xf0] sm:$0xff] }
 0x346   : > { %2393 = vst [vmem:[%s5037_s30 + $0xb0] sm:$0xff] %v2241_v41  ;;  %2394 = vst [vmem:[%s5037_s30 + $0xb8] sm:$0xff] %v2242_v43  ;;  %v2248_v50 = vadd.f32 %v2096_v6, %v4791_v54  ;;  %v2098_v49 = vld [vmem:[%s5037_s30 + $0xf8] sm:$0xff]  ;;  %v2099_v31 = vld [vmem:[%s5037_s30 + $0x100] sm:$0xff]  ;;  %v2249_v7 = vadd.f32 %v2097_v29, %v4789_v53 }
 0x347   : > { %2395 = vst [vmem:[%s5037_s30 + $0xc0] sm:$0xff] %v2243_v12  ;;  %2396 = vst [vmem:[%s5037_s30 + $0xc8] sm:$0xff] %v2244_v46  ;;  %v2250_v51 = vadd.f32 %v2098_v49, %v4793_v55  ;;  %v2251_v52 = vadd.f32 %v2099_v31, %v4795_v56  ;;  %v2100_v32 = vld [vmem:[%s5037_s30 + $0x108] sm:$0xff]  ;;  %v2101_v54 = vld [vmem:[%s5037_s30 + $0x110] sm:$0xff] }
 0x348   : > { %2397 = vst [vmem:[%s5037_s30 + $0xd0] sm:$0xff] %v2245_v45  ;;  %v2102_v8 = vld [vmem:[%s5037_s30 + $0x118] sm:$0xff]  ;;  %2398 = vst [vmem:[%s5037_s30 + $0xd8] sm:$0xff] %v2246_v5  ;;  %v2252_v13 = vadd.f32 %v2100_v32, %v4799_v58  ;;  %v2253_v53 = vadd.f32 %v2101_v54, %v4797_v57  ;;  %v2103_v34 = vld [vmem:[%s5037_s30 + $0x120] sm:$0xff] }
 0x349   : > { %2399 = vst [vmem:[%s5037_s30 + $0xe0] sm:$0xff] %v2247_v48  ;;  %2400 = vst [vmem:[%s5037_s30 + $0xe8] sm:$0xff] %v2248_v50  ;;  %v2254_v55 = vadd.f32 %v2102_v8, %v4801_v59  ;;  %v2104_v56 = vld [vmem:[%s5037_s30 + $0x128] sm:$0xff]  ;;  %v2105_v33 = vld [vmem:[%s5037_s30 + $0x130] sm:$0xff]  ;;  %v2255_v22 = vadd.f32 %v2103_v34, %v4803_v60 }
 0x34a   : > { %2401 = vst [vmem:[%s5037_s30 + $0xf0] sm:$0xff] %v2249_v7  ;;  %2402 = vst [vmem:[%s5037_s30 + $0xf8] sm:$0xff] %v2250_v51  ;;  %v2256_v58 = vadd.f32 %v2104_v56, %v4807_v62  ;;  %v2257_v57 = vadd.f32 %v2105_v33, %v4805_v61  ;;  %v2106_v35 = vld [vmem:[%s5037_s30 + $0x138] sm:$0xff]  ;;  %v2107_v59 = vld [vmem:[%s5037_s30 + $0x140] sm:$0xff] }
 0x34b   : > { %2403 = vst [vmem:[%s5037_s30 + $0x100] sm:$0xff] %v2251_v52  ;;  %v2108_v23 = vld [vmem:[%s5037_s30 + $0x148] sm:$0xff]  ;;  %2404 = vst [vmem:[%s5037_s30 + $0x108] sm:$0xff] %v2252_v13  ;;  %v2258_v10 = vadd.f32 %v2106_v35, %v4809_v63  ;;  %v2259_v60 = vadd.f32 %v2107_v59, %v4811_v0  ;;  %v2109_v36 = vld [vmem:[%s5037_s30 + $0x150] sm:$0xff] }
 0x34c   : > { %2405 = vst [vmem:[%s5037_s30 + $0x110] sm:$0xff] %v2253_v53  ;;  %2406 = vst [vmem:[%s5037_s30 + $0x118] sm:$0xff] %v2254_v55  ;;  %v2260_v62 = vadd.f32 %v2108_v23, %v4815_v2  ;;  %v2110_v61 = vld [vmem:[%s5037_s30 + $0x158] sm:$0xff]  ;;  %v2111_v38 = vld [vmem:[%s5037_s30 + $0x160] sm:$0xff]  ;;  %v2261_v9 = vadd.f32 %v2109_v36, %v4813_v1 }
 0x34d   : > { %2407 = vst [vmem:[%s5037_s30 + $0x120] sm:$0xff] %v2255_v22  ;;  %2408 = vst [vmem:[%s5037_s30 + $0x128] sm:$0xff] %v2256_v58  ;;  %v2262_v63 = vadd.f32 %v2110_v61, %v4817_v3  ;;  %v6611_v37 = vld [vmem:[#allocation23_spill] sm:$0xff]  ;;  %v2112_v11 = vld [vmem:[%s5037_s30 + $0x168] sm:$0xff] }
 0x34e   : > { %2409 = vst [vmem:[%s5037_s30 + $0x130] sm:$0xff] %v2257_v57  ;;  %v2263_v0 = vadd.f32 %v2111_v38, %v6611_v37  ;;  %v2113_v2 = vld [vmem:[%s5037_s30 + $0x170] sm:$0xff]  ;;  %v2114_v24 = vld [vmem:[%s5037_s30 + $0x178] sm:$0xff]  ;;  %2410 = vst [vmem:[%s5037_s30 + $0x138] sm:$0xff] %v2258_v10 }
 0x34f   : > { %2411 = vst [vmem:[%s5037_s30 + $0x140] sm:$0xff] %v2259_v60  ;;  %2412 = vst [vmem:[%s5037_s30 + $0x148] sm:$0xff] %v2260_v62  ;;  %v6612_v39 = vld [vmem:[#allocation25_spill] sm:$0xff]  ;;  %v6613_v4 = vld [vmem:[#allocation24_spill] sm:$0xff] }
 0x350   : > { %v2264_v40 = vadd.f32 %v2112_v11, %v6612_v39  ;;  %v2265_v1 = vadd.f32 %v2113_v2, %v6613_v4  ;;  %v6614_v42 = vld [vmem:[#allocation26_spill] sm:$0xff]  ;;  %v2115_v26 = vld [vmem:[%s5037_s30 + $0x180] sm:$0xff]  ;;  %v2116_v25 = vld [vmem:[%s5037_s30 + $0x188] sm:$0xff]  ;;  %2413 = vst [vmem:[%s5037_s30 + $0x150] sm:$0xff] %v2261_v9 }
 0x351   : > { %v2266_v3 = vadd.f32 %v2114_v24, %v6614_v42  ;;  %v2117_v41 = vld [vmem:[%s5037_s30 + $0x190] sm:$0xff]  ;;  %2414 = vst [vmem:[%s5037_s30 + $0x158] sm:$0xff] %v2262_v63  ;;  %2415 = vst [vmem:[%s5037_s30 + $0x160] sm:$0xff] %v2263_v0  ;;  %v6615_v43 = vld [vmem:[#allocation27_spill] sm:$0xff] }
 0x352   : > { %v2267_v27 = vadd.f32 %v2115_v26, %v6615_v43  ;;  %v6616_v44 = vld [vmem:[#allocation29_spill] sm:$0xff]  ;;  %v6617_v12 = vld [vmem:[#allocation28_spill] sm:$0xff]  ;;  %v2118_v45 = vld [vmem:[%s5037_s30 + $0x198] sm:$0xff]  ;;  %2416 = vst [vmem:[%s5037_s30 + $0x168] sm:$0xff] %v2264_v40 }
 0x353   : > { %v2268_v28 = vadd.f32 %v2116_v25, %v6616_v44  ;;  %v2269_v46 = vadd.f32 %v2117_v41, %v6617_v12  ;;  %v2119_v30 = vld [vmem:[%s5037_s30 + $0x1a0] sm:$0xff]  ;;  %v2120_v47 = vld [vmem:[%s5037_s30 + $0x1a8] sm:$0xff]  ;;  %2417 = vst [vmem:[%s5037_s30 + $0x170] sm:$0xff] %v2265_v1  ;;  %2418 = vst [vmem:[%s5037_s30 + $0x178] sm:$0xff] %v2266_v3 }
 0x354   : > { %v6618_v6 = vld [vmem:[#allocation30_spill] sm:$0xff]  ;;  %v6619_v48 = vld [vmem:[#allocation31_spill] sm:$0xff]  ;;  %v6620_v29 = vld [vmem:[#allocation33_spill] sm:$0xff]  ;;  %2419 = vst [vmem:[%s5037_s30 + $0x180] sm:$0xff] %v2267_v27 }
 0x355   : > { %v2270_v5 = vadd.f32 %v2118_v45, %v6618_v6  ;;  %v2271_v50 = vadd.f32 %v2119_v30, %v6619_v48  ;;  %v2272_v49 = vadd.f32 %v2120_v47, %v6620_v29  ;;  %v2121_v31 = vld [vmem:[%s5037_s30 + $0x1b0] sm:$0xff]  ;;  %v2122_v7 = vld [vmem:[%s5037_s30 + $0x1b8] sm:$0xff]  ;;  %v2123_v51 = vld [vmem:[%s5037_s30 + $0x1c0] sm:$0xff]  ;;  %2420 = vst [vmem:[%s5037_s30 + $0x188] sm:$0xff] %v2268_v28 }
 0x356   : > { %2421 = vst [vmem:[%s5037_s30 + $0x190] sm:$0xff] %v2269_v46  ;;  %v6621_v52 = vld [vmem:[#allocation32_spill] sm:$0xff]  ;;  %v6622_v54 = vld [vmem:[#allocation34_spill] sm:$0xff]  ;;  %v6623_v13 = vld [vmem:[#allocation35_spill] sm:$0xff] }
 0x357   : > { %v2273_v32 = vadd.f32 %v2121_v31, %v6621_v52  ;;  %v2274_v8 = vadd.f32 %v2122_v7, %v6622_v54  ;;  %v2275_v53 = vadd.f32 %v2123_v51, %v6623_v13  ;;  %v2124_v55 = vld [vmem:[%s5037_s30 + $0x1c8] sm:$0xff]  ;;  %v2125_v34 = vld [vmem:[%s5037_s30 + $0x1d0] sm:$0xff]  ;;  %v2126_v56 = vld [vmem:[%s5037_s30 + $0x1d8] sm:$0xff]  ;;  %2422 = vst [vmem:[%s5037_s30 + $0x198] sm:$0xff] %v2270_v5 }
 0x358   : > { %2423 = vst [vmem:[%s5037_s30 + $0x1a0] sm:$0xff] %v2271_v50  ;;  %2424 = vst [vmem:[%s5037_s30 + $0x1a8] sm:$0xff] %v2272_v49  ;;  %v6624_v33 = vld [vmem:[#allocation37_spill] sm:$0xff]  ;;  %v6625_v58 = vld [vmem:[#allocation36_spill] sm:$0xff] }
 0x359   : > { %v2276_v22 = vadd.f32 %v2124_v55, %v6624_v33  ;;  %v2277_v57 = vadd.f32 %v2125_v34, %v6625_v58  ;;  %v6626_v35 = vld [vmem:[#allocation38_spill] sm:$0xff]  ;;  %v2127_v23 = vld [vmem:[%s5037_s30 + $0x1e0] sm:$0xff]  ;;  %v2128_v10 = vld [vmem:[%s5037_s30 + $0x1e8] sm:$0xff]  ;;  %2425 = vst [vmem:[%s5037_s30 + $0x1b0] sm:$0xff] %v2273_v32 }
 0x35a   : > { %v2278_v59 = vadd.f32 %v2126_v56, %v6626_v35  ;;  %v2129_v60 = vld [vmem:[%s5037_s30 + $0x1f0] sm:$0xff]  ;;  %2426 = vst [vmem:[%s5037_s30 + $0x1b8] sm:$0xff] %v2274_v8  ;;  %2427 = vst [vmem:[%s5037_s30 + $0x1c0] sm:$0xff] %v2275_v53  ;;  %v6627_v62 = vld [vmem:[#allocation39_spill] sm:$0xff] }
 0x35b   : > { %v2279_v36 = vadd.f32 %v2127_v23, %v6627_v62  ;;  %v6628_v61 = vld [vmem:[#allocation41_spill] sm:$0xff]  ;;  %v6629_v9 = vld [vmem:[#allocation40_spill] sm:$0xff]  ;;  %v2130_v37 = vld [vmem:[%s5037_s30 + $0x1f8] sm:$0xff]  ;;  %2428 = vst [vmem:[%s5037_s30 + $0x1c8] sm:$0xff] %v2276_v22 }
 0x35c   : > { %v2280_v38 = vadd.f32 %v2128_v10, %v6628_v61  ;;  %v2281_v63 = vadd.f32 %v2129_v60, %v6629_v9  ;;  %v2131_v0 = vld [vmem:[%s5037_s30 + $0x200] sm:$0xff]  ;;  %v2132_v11 = vld [vmem:[%s5037_s30 + $0x208] sm:$0xff]  ;;  %2429 = vst [vmem:[%s5037_s30 + $0x1d0] sm:$0xff] %v2277_v57  ;;  %2430 = vst [vmem:[%s5037_s30 + $0x1d8] sm:$0xff] %v2278_v59 }
 0x35d   : > { %v6630_v2 = vld [vmem:[#allocation42_spill] sm:$0xff]  ;;  %v6631_v39 = vld [vmem:[#allocation43_spill] sm:$0xff]  ;;  %v6632_v4 = vld [vmem:[#allocation45_spill] sm:$0xff]  ;;  %2431 = vst [vmem:[%s5037_s30 + $0x1e0] sm:$0xff] %v2279_v36 }
 0x35e   : > { %v2282_v24 = vadd.f32 %v2130_v37, %v6630_v2  ;;  %v2283_v40 = vadd.f32 %v2131_v0, %v6631_v39  ;;  %v2284_v1 = vadd.f32 %v2132_v11, %v6632_v4  ;;  %v2133_v42 = vld [vmem:[%s5037_s30 + $0x210] sm:$0xff]  ;;  %v2134_v3 = vld [vmem:[%s5037_s30 + $0x218] sm:$0xff]  ;;  %v2135_v26 = vld [vmem:[%s5037_s30 + $0x220] sm:$0xff]  ;;  %2432 = vst [vmem:[%s5037_s30 + $0x1e8] sm:$0xff] %v2280_v38 }
 0x35f   : > { %2433 = vst [vmem:[%s5037_s30 + $0x1f0] sm:$0xff] %v2281_v63  ;;  %v6633_v25 = vld [vmem:[#allocation44_spill] sm:$0xff]  ;;  %v6634_v43 = vld [vmem:[#allocation46_spill] sm:$0xff]  ;;  %v6635_v44 = vld [vmem:[#allocation47_spill] sm:$0xff] }
 0x360   : > { %v2285_v41 = vadd.f32 %v2133_v42, %v6633_v25  ;;  %v2286_v27 = vadd.f32 %v2134_v3, %v6634_v43  ;;  %v2287_v28 = vadd.f32 %v2135_v26, %v6635_v44  ;;  %v2136_v12 = vld [vmem:[%s5037_s30 + $0x228] sm:$0xff]  ;;  %v2137_v46 = vld [vmem:[%s5037_s30 + $0x230] sm:$0xff]  ;;  %v2138_v45 = vld [vmem:[%s5037_s30 + $0x238] sm:$0xff]  ;;  %2434 = vst [vmem:[%s5037_s30 + $0x1f8] sm:$0xff] %v2282_v24 }
 0x361   : > { %2435 = vst [vmem:[%s5037_s30 + $0x200] sm:$0xff] %v2283_v40  ;;  %2436 = vst [vmem:[%s5037_s30 + $0x208] sm:$0xff] %v2284_v1  ;;  %v6636_v30 = vld [vmem:[#allocation49_spill] sm:$0xff]  ;;  %v6637_v6 = vld [vmem:[#allocation48_spill] sm:$0xff] }
 0x362   : > { %v2288_v47 = vadd.f32 %v2136_v12, %v6636_v30  ;;  %v2289_v5 = vadd.f32 %v2137_v46, %v6637_v6  ;;  %v6638_v48 = vld [vmem:[#allocation50_spill] sm:$0xff]  ;;  %v2139_v29 = vld [vmem:[%s5037_s30 + $0x240] sm:$0xff]  ;;  %v2140_v49 = vld [vmem:[%s5037_s30 + $0x248] sm:$0xff]  ;;  %2437 = vst [vmem:[%s5037_s30 + $0x210] sm:$0xff] %v2285_v41 }
 0x363   : > { %v2290_v50 = vadd.f32 %v2138_v45, %v6638_v48  ;;  %v2141_v31 = vld [vmem:[%s5037_s30 + $0x250] sm:$0xff]  ;;  %2438 = vst [vmem:[%s5037_s30 + $0x218] sm:$0xff] %v2286_v27  ;;  %2439 = vst [vmem:[%s5037_s30 + $0x220] sm:$0xff] %v2287_v28  ;;  %v6639_v7 = vld [vmem:[#allocation51_spill] sm:$0xff] }
 0x364   : > { %v2291_v51 = vadd.f32 %v2139_v29, %v6639_v7  ;;  %v6640_v52 = vld [vmem:[#allocation53_spill] sm:$0xff]  ;;  %v6641_v54 = vld [vmem:[#allocation52_spill] sm:$0xff]  ;;  %v2142_v13 = vld [vmem:[%s5037_s30 + $0x258] sm:$0xff]  ;;  %2440 = vst [vmem:[%s5037_s30 + $0x228] sm:$0xff] %v2288_v47 }
 0x365   : > { %v2292_v32 = vadd.f32 %v2140_v49, %v6640_v52  ;;  %v2293_v8 = vadd.f32 %v2141_v31, %v6641_v54  ;;  %v2143_v53 = vld [vmem:[%s5037_s30 + $0x260] sm:$0xff]  ;;  %v2144_v55 = vld [vmem:[%s5037_s30 + $0x268] sm:$0xff]  ;;  %2441 = vst [vmem:[%s5037_s30 + $0x230] sm:$0xff] %v2289_v5  ;;  %2442 = vst [vmem:[%s5037_s30 + $0x238] sm:$0xff] %v2290_v50 }
 0x366   : > { %v6642_v34 = vld [vmem:[#allocation54_spill] sm:$0xff]  ;;  %v6643_v33 = vld [vmem:[#allocation55_spill] sm:$0xff]  ;;  %v6644_v58 = vld [vmem:[#allocation57_spill] sm:$0xff]  ;;  %2443 = vst [vmem:[%s5037_s30 + $0x240] sm:$0xff] %v2291_v51 }
 0x367   : > { %v2294_v56 = vadd.f32 %v2142_v13, %v6642_v34  ;;  %v2295_v22 = vadd.f32 %v2143_v53, %v6643_v33  ;;  %v2296_v57 = vadd.f32 %v2144_v55, %v6644_v58  ;;  %v2145_v35 = vld [vmem:[%s5037_s30 + $0x270] sm:$0xff]  ;;  %v2146_v59 = vld [vmem:[%s5037_s30 + $0x278] sm:$0xff]  ;;  %v2147_v23 = vld [vmem:[%s5037_s30 + $0x280] sm:$0xff]  ;;  %2444 = vst [vmem:[%s5037_s30 + $0x248] sm:$0xff] %v2292_v32 }
 0x368   : > { %2445 = vst [vmem:[%s5037_s30 + $0x250] sm:$0xff] %v2293_v8  ;;  %v6645_v10 = vld [vmem:[#allocation56_spill] sm:$0xff]  ;;  %v6646_v62 = vld [vmem:[#allocation58_spill] sm:$0xff]  ;;  %v6647_v61 = vld [vmem:[#allocation59_spill] sm:$0xff] }
 0x369   : > { %v2297_v60 = vadd.f32 %v2145_v35, %v6645_v10  ;;  %v2298_v36 = vadd.f32 %v2146_v59, %v6646_v62  ;;  %v2299_v38 = vadd.f32 %v2147_v23, %v6647_v61  ;;  %v2148_v9 = vld [vmem:[%s5037_s30 + $0x288] sm:$0xff]  ;;  %v2149_v63 = vld [vmem:[%s5037_s30 + $0x290] sm:$0xff]  ;;  %v2150_v37 = vld [vmem:[%s5037_s30 + $0x298] sm:$0xff]  ;;  %2446 = vst [vmem:[%s5037_s30 + $0x258] sm:$0xff] %v2294_v56 }
 0x36a   : > { %2447 = vst [vmem:[%s5037_s30 + $0x260] sm:$0xff] %v2295_v22  ;;  %2448 = vst [vmem:[%s5037_s30 + $0x268] sm:$0xff] %v2296_v57  ;;  %v6648_v0 = vld [vmem:[#allocation61_spill] sm:$0xff]  ;;  %v6649_v2 = vld [vmem:[#allocation60_spill] sm:$0xff] }
 0x36b   : > { %v2300_v11 = vadd.f32 %v2148_v9, %v6648_v0  ;;  %v2301_v24 = vadd.f32 %v2149_v63, %v6649_v2  ;;  %v6650_v39 = vld [vmem:[#allocation62_spill] sm:$0xff]  ;;  %v2151_v4 = vld [vmem:[%s5037_s30 + $0x2a0] sm:$0xff]  ;;  %v2152_v1 = vld [vmem:[%s5037_s30 + $0x2a8] sm:$0xff]  ;;  %2449 = vst [vmem:[%s5037_s30 + $0x270] sm:$0xff] %v2297_v60 }
 0x36c   : > { %v2302_v40 = vadd.f32 %v2150_v37, %v6650_v39  ;;  %v2153_v42 = vld [vmem:[%s5037_s30 + $0x2b0] sm:$0xff]  ;;  %2450 = vst [vmem:[%s5037_s30 + $0x278] sm:$0xff] %v2298_v36  ;;  %2451 = vst [vmem:[%s5037_s30 + $0x280] sm:$0xff] %v2299_v38  ;;  %v6651_v3 = vld [vmem:[#allocation63_spill] sm:$0xff] }
 0x36d   : > { %v2303_v26 = vadd.f32 %v2151_v4, %v6651_v3  ;;  %v6652_v25 = vld [vmem:[#allocation65_spill] sm:$0xff]  ;;  %v6653_v43 = vld [vmem:[#allocation64_spill] sm:$0xff]  ;;  %v2154_v44 = vld [vmem:[%s5037_s30 + $0x2b8] sm:$0xff]  ;;  %2452 = vst [vmem:[%s5037_s30 + $0x288] sm:$0xff] %v2300_v11 }
 0x36e   : > { %v2304_v41 = vadd.f32 %v2152_v1, %v6652_v25  ;;  %v2305_v27 = vadd.f32 %v2153_v42, %v6653_v43  ;;  %v2155_v28 = vld [vmem:[%s5037_s30 + $0x2c0] sm:$0xff]  ;;  %v2156_v12 = vld [vmem:[%s5037_s30 + $0x2c8] sm:$0xff]  ;;  %2453 = vst [vmem:[%s5037_s30 + $0x290] sm:$0xff] %v2301_v24  ;;  %2454 = vst [vmem:[%s5037_s30 + $0x298] sm:$0xff] %v2302_v40 }
 0x36f   : > { %v6654_v46 = vld [vmem:[#allocation66_spill] sm:$0xff]  ;;  %v6655_v30 = vld [vmem:[#allocation67_spill] sm:$0xff]  ;;  %v6656_v6 = vld [vmem:[#allocation69_spill] sm:$0xff]  ;;  %2455 = vst [vmem:[%s5037_s30 + $0x2a0] sm:$0xff] %v2303_v26 }
 0x370   : > { %v2306_v45 = vadd.f32 %v2154_v44, %v6654_v46  ;;  %v2307_v47 = vadd.f32 %v2155_v28, %v6655_v30  ;;  %v2308_v5 = vadd.f32 %v2156_v12, %v6656_v6  ;;  %v2157_v48 = vld [vmem:[%s5037_s30 + $0x2d0] sm:$0xff]  ;;  %v2158_v50 = vld [vmem:[%s5037_s30 + $0x2d8] sm:$0xff]  ;;  %v2159_v29 = vld [vmem:[%s5037_s30 + $0x2e0] sm:$0xff]  ;;  %2456 = vst [vmem:[%s5037_s30 + $0x2a8] sm:$0xff] %v2304_v41 }
 0x371   : > { %2457 = vst [vmem:[%s5037_s30 + $0x2b0] sm:$0xff] %v2305_v27  ;;  %v6657_v49 = vld [vmem:[#allocation68_spill] sm:$0xff]  ;;  %v6658_v7 = vld [vmem:[#allocation70_spill] sm:$0xff]  ;;  %v6659_v52 = vld [vmem:[#allocation71_spill] sm:$0xff] }
 0x372   : > { %v2309_v31 = vadd.f32 %v2157_v48, %v6657_v49  ;;  %v2310_v51 = vadd.f32 %v2158_v50, %v6658_v7  ;;  %v2311_v32 = vadd.f32 %v2159_v29, %v6659_v52  ;;  %v2160_v54 = vld [vmem:[%s5037_s30 + $0x2e8] sm:$0xff]  ;;  %v2161_v8 = vld [vmem:[%s5037_s30 + $0x2f0] sm:$0xff]  ;;  %v2162_v13 = vld [vmem:[%s5037_s30 + $0x2f8] sm:$0xff]  ;;  %2458 = vst [vmem:[%s5037_s30 + $0x2b8] sm:$0xff] %v2306_v45 }
 0x373   : > { %2459 = vst [vmem:[%s5037_s30 + $0x2c0] sm:$0xff] %v2307_v47  ;;  %2460 = vst [vmem:[%s5037_s30 + $0x2c8] sm:$0xff] %v2308_v5  ;;  %v6660_v53 = vld [vmem:[#allocation73_spill] sm:$0xff]  ;;  %v6661_v34 = vld [vmem:[#allocation72_spill] sm:$0xff] }
 0x374   : > { %v2312_v55 = vadd.f32 %v2160_v54, %v6660_v53  ;;  %v2313_v56 = vadd.f32 %v2161_v8, %v6661_v34  ;;  %v6662_v33 = vld [vmem:[#allocation74_spill] sm:$0xff]  ;;  %v2163_v58 = vld [vmem:[%s5037_s30 + $0x300] sm:$0xff]  ;;  %v2164_v57 = vld [vmem:[%s5037_s30 + $0x308] sm:$0xff]  ;;  %2461 = vst [vmem:[%s5037_s30 + $0x2d0] sm:$0xff] %v2309_v31 }
 0x375   : > { %v2314_v22 = vadd.f32 %v2162_v13, %v6662_v33  ;;  %v2165_v35 = vld [vmem:[%s5037_s30 + $0x310] sm:$0xff]  ;;  %2462 = vst [vmem:[%s5037_s30 + $0x2d8] sm:$0xff] %v2310_v51  ;;  %2463 = vst [vmem:[%s5037_s30 + $0x2e0] sm:$0xff] %v2311_v32  ;;  %v6663_v59 = vld [vmem:[#allocation75_spill] sm:$0xff] }
 0x376   : > { %v2315_v23 = vadd.f32 %v2163_v58, %v6663_v59  ;;  %v6664_v10 = vld [vmem:[#allocation77_spill] sm:$0xff]  ;;  %v6665_v62 = vld [vmem:[#allocation76_spill] sm:$0xff]  ;;  %v2166_v61 = vld [vmem:[%s5037_s30 + $0x318] sm:$0xff]  ;;  %2464 = vst [vmem:[%s5037_s30 + $0x2e8] sm:$0xff] %v2312_v55 }
 0x377   : > { %v2316_v60 = vadd.f32 %v2164_v57, %v6664_v10  ;;  %v2317_v36 = vadd.f32 %v2165_v35, %v6665_v62  ;;  %v2167_v38 = vld [vmem:[%s5037_s30 + $0x320] sm:$0xff]  ;;  %v2168_v9 = vld [vmem:[%s5037_s30 + $0x328] sm:$0xff]  ;;  %2465 = vst [vmem:[%s5037_s30 + $0x2f0] sm:$0xff] %v2313_v56  ;;  %2466 = vst [vmem:[%s5037_s30 + $0x2f8] sm:$0xff] %v2314_v22 }
 0x378   : > { %v6666_v63 = vld [vmem:[#allocation78_spill] sm:$0xff]  ;;  %v6667_v0 = vld [vmem:[#allocation79_spill] sm:$0xff]  ;;  %v6668_v2 = vld [vmem:[#allocation81_spill] sm:$0xff]  ;;  %2467 = vst [vmem:[%s5037_s30 + $0x300] sm:$0xff] %v2315_v23 }
 0x379   : > { %v2318_v37 = vadd.f32 %v2166_v61, %v6666_v63  ;;  %v2319_v11 = vadd.f32 %v2167_v38, %v6667_v0  ;;  %v2320_v24 = vadd.f32 %v2168_v9, %v6668_v2  ;;  %v2169_v39 = vld [vmem:[%s5037_s30 + $0x330] sm:$0xff]  ;;  %v2170_v40 = vld [vmem:[%s5037_s30 + $0x338] sm:$0xff]  ;;  %v2171_v4 = vld [vmem:[%s5037_s30 + $0x340] sm:$0xff]  ;;  %2468 = vst [vmem:[%s5037_s30 + $0x308] sm:$0xff] %v2316_v60 }
 0x37a   : > { %2469 = vst [vmem:[%s5037_s30 + $0x310] sm:$0xff] %v2317_v36  ;;  %v6669_v1 = vld [vmem:[#allocation80_spill] sm:$0xff]  ;;  %v6670_v3 = vld [vmem:[#allocation82_spill] sm:$0xff]  ;;  %v6671_v25 = vld [vmem:[#allocation83_spill] sm:$0xff] }
 0x37b   : > { %v2321_v42 = vadd.f32 %v2169_v39, %v6669_v1  ;;  %v2322_v26 = vadd.f32 %v2170_v40, %v6670_v3  ;;  %v2323_v41 = vadd.f32 %v2171_v4, %v6671_v25  ;;  %v2172_v43 = vld [vmem:[%s5037_s30 + $0x348] sm:$0xff]  ;;  %v2173_v27 = vld [vmem:[%s5037_s30 + $0x350] sm:$0xff]  ;;  %v2174_v44 = vld [vmem:[%s5037_s30 + $0x358] sm:$0xff]  ;;  %2470 = vst [vmem:[%s5037_s30 + $0x318] sm:$0xff] %v2318_v37 }
 0x37c   : > { %2471 = vst [vmem:[%s5037_s30 + $0x320] sm:$0xff] %v2319_v11  ;;  %2472 = vst [vmem:[%s5037_s30 + $0x328] sm:$0xff] %v2320_v24  ;;  %v6672_v28 = vld [vmem:[#allocation85_spill] sm:$0xff]  ;;  %v6673_v46 = vld [vmem:[#allocation84_spill] sm:$0xff] }
 0x37d   : > { %v2324_v12 = vadd.f32 %v2172_v43, %v6672_v28  ;;  %v2325_v45 = vadd.f32 %v2173_v27, %v6673_v46  ;;  %v6674_v30 = vld [vmem:[#allocation86_spill] sm:$0xff]  ;;  %v2175_v6 = vld [vmem:[%s5037_s30 + $0x360] sm:$0xff]  ;;  %v2176_v5 = vld [vmem:[%s5037_s30 + $0x368] sm:$0xff]  ;;  %2473 = vst [vmem:[%s5037_s30 + $0x330] sm:$0xff] %v2321_v42 }
 0x37e   : > { %v2326_v47 = vadd.f32 %v2174_v44, %v6674_v30  ;;  %v2177_v48 = vld [vmem:[%s5037_s30 + $0x370] sm:$0xff]  ;;  %2474 = vst [vmem:[%s5037_s30 + $0x338] sm:$0xff] %v2322_v26  ;;  %2475 = vst [vmem:[%s5037_s30 + $0x340] sm:$0xff] %v2323_v41  ;;  %v6675_v50 = vld [vmem:[#allocation87_spill] sm:$0xff] }
 0x37f   : > { %v2327_v29 = vadd.f32 %v2175_v6, %v6675_v50  ;;  %v6676_v49 = vld [vmem:[#allocation89_spill] sm:$0xff]  ;;  %v6677_v7 = vld [vmem:[#allocation88_spill] sm:$0xff]  ;;  %v2178_v52 = vld [vmem:[%s5037_s30 + $0x378] sm:$0xff]  ;;  %2476 = vst [vmem:[%s5037_s30 + $0x348] sm:$0xff] %v2324_v12 }
 0x380   : > { %v2328_v31 = vadd.f32 %v2176_v5, %v6676_v49  ;;  %v2329_v51 = vadd.f32 %v2177_v48, %v6677_v7  ;;  %v2179_v32 = vld [vmem:[%s5037_s30 + $0x380] sm:$0xff]  ;;  %v2180_v54 = vld [vmem:[%s5037_s30 + $0x388] sm:$0xff]  ;;  %2477 = vst [vmem:[%s5037_s30 + $0x350] sm:$0xff] %v2325_v45  ;;  %2478 = vst [vmem:[%s5037_s30 + $0x358] sm:$0xff] %v2326_v47 }
 0x381   : > { %v6678_v8 = vld [vmem:[#allocation90_spill] sm:$0xff]  ;;  %v6679_v53 = vld [vmem:[#allocation91_spill] sm:$0xff]  ;;  %v6680_v34 = vld [vmem:[#allocation93_spill] sm:$0xff]  ;;  %2479 = vst [vmem:[%s5037_s30 + $0x360] sm:$0xff] %v2327_v29 }
 0x382   : > { %v2330_v13 = vadd.f32 %v2178_v52, %v6678_v8  ;;  %v2331_v55 = vadd.f32 %v2179_v32, %v6679_v53  ;;  %v2332_v56 = vadd.f32 %v2180_v54, %v6680_v34  ;;  %v2181_v33 = vld [vmem:[%s5037_s30 + $0x390] sm:$0xff]  ;;  %v2182_v22 = vld [vmem:[%s5037_s30 + $0x398] sm:$0xff]  ;;  %v2183_v58 = vld [vmem:[%s5037_s30 + $0x3a0] sm:$0xff]  ;;  %2480 = vst [vmem:[%s5037_s30 + $0x368] sm:$0xff] %v2328_v31 }
 0x383   : > { %2481 = vst [vmem:[%s5037_s30 + $0x370] sm:$0xff] %v2329_v51  ;;  %v6681_v57 = vld [vmem:[#allocation92_spill] sm:$0xff]  ;;  %v6682_v59 = vld [vmem:[#allocation94_spill] sm:$0xff]  ;;  %v6683_v10 = vld [vmem:[#allocation95_spill] sm:$0xff] }
 0x384   : > { %v2333_v35 = vadd.f32 %v2181_v33, %v6681_v57  ;;  %v2334_v23 = vadd.f32 %v2182_v22, %v6682_v59  ;;  %v2335_v60 = vadd.f32 %v2183_v58, %v6683_v10  ;;  %v2184_v62 = vld [vmem:[%s5037_s30 + $0x3a8] sm:$0xff]  ;;  %v2185_v36 = vld [vmem:[%s5037_s30 + $0x3b0] sm:$0xff]  ;;  %v2186_v61 = vld [vmem:[%s5037_s30 + $0x3b8] sm:$0xff]  ;;  %2482 = vst [vmem:[%s5037_s30 + $0x378] sm:$0xff] %v2330_v13 }
 0x385   : > { %2483 = vst [vmem:[%s5037_s30 + $0x380] sm:$0xff] %v2331_v55  ;;  %2484 = vst [vmem:[%s5037_s30 + $0x388] sm:$0xff] %v2332_v56  ;;  %v6684_v38 = vld [vmem:[#allocation97_spill] sm:$0xff]  ;;  %v6685_v63 = vld [vmem:[#allocation96_spill] sm:$0xff] }
 0x386   : > { %v2336_v9 = vadd.f32 %v2184_v62, %v6684_v38  ;;  %v2337_v37 = vadd.f32 %v2185_v36, %v6685_v63  ;;  %v6686_v0 = vld [vmem:[#allocation98_spill] sm:$0xff]  ;;  %v2187_v2 = vld [vmem:[%s5037_s30 + $0x3c0] sm:$0xff]  ;;  %v2188_v24 = vld [vmem:[%s5037_s30 + $0x3c8] sm:$0xff]  ;;  %2485 = vst [vmem:[%s5037_s30 + $0x390] sm:$0xff] %v2333_v35 }
 0x387   : > { %v2338_v11 = vadd.f32 %v2186_v61, %v6686_v0  ;;  %v2189_v39 = vld [vmem:[%s5037_s30 + $0x3d0] sm:$0xff]  ;;  %2486 = vst [vmem:[%s5037_s30 + $0x398] sm:$0xff] %v2334_v23  ;;  %2487 = vst [vmem:[%s5037_s30 + $0x3a0] sm:$0xff] %v2335_v60  ;;  %v6687_v40 = vld [vmem:[#allocation99_spill] sm:$0xff] }
 0x388   : > { %v2339_v4 = vadd.f32 %v2187_v2, %v6687_v40  ;;  %v6688_v1 = vld [vmem:[#allocation101_spill] sm:$0xff]  ;;  %v6689_v3 = vld [vmem:[#allocation100_spill] sm:$0xff]  ;;  %v2190_v25 = vld [vmem:[%s5037_s30 + $0x3d8] sm:$0xff]  ;;  %2488 = vst [vmem:[%s5037_s30 + $0x3a8] sm:$0xff] %v2336_v9 }
 0x389   : > { %v2340_v42 = vadd.f32 %v2188_v24, %v6688_v1  ;;  %v2341_v26 = vadd.f32 %v2189_v39, %v6689_v3  ;;  %v2191_v41 = vld [vmem:[%s5037_s30 + $0x3e0] sm:$0xff]  ;;  %v2192_v43 = vld [vmem:[%s5037_s30 + $0x3e8] sm:$0xff]  ;;  %2489 = vst [vmem:[%s5037_s30 + $0x3b0] sm:$0xff] %v2337_v37  ;;  %2490 = vst [vmem:[%s5037_s30 + $0x3b8] sm:$0xff] %v2338_v11 }
 0x38a   : > { %v6690_v27 = vld [vmem:[#allocation102_spill] sm:$0xff]  ;;  %v6691_v28 = vld [vmem:[#allocation103_spill] sm:$0xff]  ;;  %v6692_v46 = vld [vmem:[#allocation105_spill] sm:$0xff]  ;;  %2491 = vst [vmem:[%s5037_s30 + $0x3c0] sm:$0xff] %v2339_v4 }
 0x38b   : > { %v2342_v44 = vadd.f32 %v2190_v25, %v6690_v27  ;;  %v2343_v12 = vadd.f32 %v2191_v41, %v6691_v28  ;;  %v2344_v45 = vadd.f32 %v2192_v43, %v6692_v46  ;;  %v2193_v30 = vld [vmem:[%s5037_s30 + $0x3f0] sm:$0xff]  ;;  %v2194_v47 = vld [vmem:[%s5037_s30 + $0x3f8] sm:$0xff]  ;;  %v2195_v6 = vld [vmem:[%s5037_s30 + $0x400] sm:$0xff]  ;;  %2492 = vst [vmem:[%s5037_s30 + $0x3c8] sm:$0xff] %v2340_v42 }
 0x38c   : > { %2493 = vst [vmem:[%s5037_s30 + $0x3d0] sm:$0xff] %v2341_v26  ;;  %v6693_v5 = vld [vmem:[#allocation104_spill] sm:$0xff]  ;;  %v6694_v50 = vld [vmem:[#allocation106_spill] sm:$0xff]  ;;  %v6695_v49 = vld [vmem:[#allocation107_spill] sm:$0xff] }
 0x38d   : > { %v2345_v48 = vadd.f32 %v2193_v30, %v6693_v5  ;;  %v2346_v29 = vadd.f32 %v2194_v47, %v6694_v50  ;;  %v2347_v31 = vadd.f32 %v2195_v6, %v6695_v49  ;;  %v2196_v7 = vld [vmem:[%s5037_s30 + $0x408] sm:$0xff]  ;;  %v2197_v51 = vld [vmem:[%s5037_s30 + $0x410] sm:$0xff]  ;;  %v2198_v52 = vld [vmem:[%s5037_s30 + $0x418] sm:$0xff]  ;;  %2494 = vst [vmem:[%s5037_s30 + $0x3d8] sm:$0xff] %v2342_v44 }
 0x38e   : > { %2495 = vst [vmem:[%s5037_s30 + $0x3e0] sm:$0xff] %v2343_v12  ;;  %2496 = vst [vmem:[%s5037_s30 + $0x3e8] sm:$0xff] %v2344_v45  ;;  %v6696_v32 = vld [vmem:[#allocation109_spill] sm:$0xff]  ;;  %v6697_v8 = vld [vmem:[#allocation108_spill] sm:$0xff] }
 0x38f   : > { %v2348_v54 = vadd.f32 %v2196_v7, %v6696_v32  ;;  %v2349_v13 = vadd.f32 %v2197_v51, %v6697_v8  ;;  %v6698_v53 = vld [vmem:[#allocation110_spill] sm:$0xff]  ;;  %v2199_v34 = vld [vmem:[%s5037_s30 + $0x420] sm:$0xff]  ;;  %v2200_v56 = vld [vmem:[%s5037_s30 + $0x428] sm:$0xff]  ;;  %2497 = vst [vmem:[%s5037_s30 + $0x3f0] sm:$0xff] %v2345_v48 }
 0x390   : > { %v2350_v55 = vadd.f32 %v2198_v52, %v6698_v53  ;;  %v2201_v33 = vld [vmem:[%s5037_s30 + $0x430] sm:$0xff]  ;;  %2498 = vst [vmem:[%s5037_s30 + $0x3f8] sm:$0xff] %v2346_v29  ;;  %2499 = vst [vmem:[%s5037_s30 + $0x400] sm:$0xff] %v2347_v31  ;;  %v6699_v22 = vld [vmem:[#allocation111_spill] sm:$0xff] }
 0x391   : > { %v2351_v58 = vadd.f32 %v2199_v34, %v6699_v22  ;;  %v6700_v57 = vld [vmem:[#allocation113_spill] sm:$0xff]  ;;  %v6701_v59 = vld [vmem:[#allocation112_spill] sm:$0xff]  ;;  %v2202_v10 = vld [vmem:[%s5037_s30 + $0x438] sm:$0xff]  ;;  %2500 = vst [vmem:[%s5037_s30 + $0x408] sm:$0xff] %v2348_v54 }
 0x392   : > { %v2352_v35 = vadd.f32 %v2200_v56, %v6700_v57  ;;  %v2353_v23 = vadd.f32 %v2201_v33, %v6701_v59  ;;  %v2203_v60 = vld [vmem:[%s5037_s30 + $0x440] sm:$0xff]  ;;  %v2204_v62 = vld [vmem:[%s5037_s30 + $0x448] sm:$0xff]  ;;  %2501 = vst [vmem:[%s5037_s30 + $0x410] sm:$0xff] %v2349_v13  ;;  %2502 = vst [vmem:[%s5037_s30 + $0x418] sm:$0xff] %v2350_v55 }
 0x393   : > { %v6702_v36 = vld [vmem:[#allocation114_spill] sm:$0xff]  ;;  %v6703_v38 = vld [vmem:[#allocation115_spill] sm:$0xff]  ;;  %v6704_v63 = vld [vmem:[#allocation117_spill] sm:$0xff]  ;;  %2503 = vst [vmem:[%s5037_s30 + $0x420] sm:$0xff] %v2351_v58 }
 0x394   : > { %v2354_v61 = vadd.f32 %v2202_v10, %v6702_v36  ;;  %v2355_v9 = vadd.f32 %v2203_v60, %v6703_v38  ;;  %v2356_v37 = vadd.f32 %v2204_v62, %v6704_v63  ;;  %v2205_v0 = vld [vmem:[%s5037_s30 + $0x450] sm:$0xff]  ;;  %v2206_v11 = vld [vmem:[%s5037_s30 + $0x458] sm:$0xff]  ;;  %v2207_v2 = vld [vmem:[%s5037_s30 + $0x460] sm:$0xff]  ;;  %2504 = vst [vmem:[%s5037_s30 + $0x428] sm:$0xff] %v2352_v35 }
 0x395   : > { %2505 = vst [vmem:[%s5037_s30 + $0x430] sm:$0xff] %v2353_v23  ;;  %v6705_v24 = vld [vmem:[#allocation116_spill] sm:$0xff]  ;;  %v6706_v40 = vld [vmem:[#allocation118_spill] sm:$0xff]  ;;  %v6707_v1 = vld [vmem:[#allocation119_spill] sm:$0xff] }
 0x396   : > { %v2357_v39 = vadd.f32 %v2205_v0, %v6705_v24  ;;  %v2358_v4 = vadd.f32 %v2206_v11, %v6706_v40  ;;  %v2359_v42 = vadd.f32 %v2207_v2, %v6707_v1  ;;  %v2208_v3 = vld [vmem:[%s5037_s30 + $0x468] sm:$0xff]  ;;  %v2209_v26 = vld [vmem:[%s5037_s30 + $0x470] sm:$0xff]  ;;  %v2210_v25 = vld [vmem:[%s5037_s30 + $0x478] sm:$0xff]  ;;  %2506 = vst [vmem:[%s5037_s30 + $0x438] sm:$0xff] %v2354_v61 }
 0x397   : > { %2507 = vst [vmem:[%s5037_s30 + $0x440] sm:$0xff] %v2355_v9  ;;  %2508 = vst [vmem:[%s5037_s30 + $0x448] sm:$0xff] %v2356_v37  ;;  %v2360_v41 = vadd.f32 %v2208_v3, %v5015_v15  ;;  %v2361_v43 = vadd.f32 %v2209_v26, %v5013_v14  ;;  %v2362_v27 = vadd.f32 %v2210_v25, %v5017_v16  ;;  %v2211_v44 = vld [vmem:[%s5037_s30 + $0x480] sm:$0xff]  ;;  %v2212_v28 = vld [vmem:[%s5037_s30 + $0x488] sm:$0xff] }
 0x398   : > { %v2213_v12 = vld [vmem:[%s5037_s30 + $0x490] sm:$0xff]  ;;  %2509 = vst [vmem:[%s5037_s30 + $0x450] sm:$0xff] %v2357_v39  ;;  %2510 = vst [vmem:[%s5037_s30 + $0x458] sm:$0xff] %v2358_v4  ;;  %v2363_v46 = vadd.f32 %v2211_v44, %v5019_v17  ;;  %v2364_v15 = vadd.f32 %v2212_v28, %v5023_v19  ;;  %v2214_v45 = vld [vmem:[%s5037_s30 + $0x498] sm:$0xff] }
 0x399   : > { %2511 = vst [vmem:[%s5037_s30 + $0x460] sm:$0xff] %v2359_v42  ;;  %v2365_v14 = vadd.f32 %v2213_v12, %v5021_v18  ;;  %v2215_v16 = vld [vmem:[%s5037_s30 + $0x4a0] sm:$0xff]  ;;  %v2216_v30 = vld [vmem:[%s5037_s30 + $0x4a8] sm:$0xff]  ;;  %2512 = vst [vmem:[%s5037_s30 + $0x468] sm:$0xff] %v2360_v41  ;;  %v2366_v47 = vadd.f32 %v2214_v45, %v5025_v20 }
 0x39a   : > { %2513 = vst [vmem:[%s5037_s30 + $0x470] sm:$0xff] %v2361_v43  ;;  %2514 = vst [vmem:[%s5037_s30 + $0x478] sm:$0xff] %v2362_v27  ;;  %v2367_v17 = vadd.f32 %v2215_v16, %v5027_v21  ;;  %v6708_v6 = vld [vmem:[#allocation121_spill] sm:$0xff]  ;;  %v2218_v48 = vld [vmem:[%s5037_s30 + $0x4b8] sm:$0xff] }
 0x39b   : > { %v2368_v5 = vadd.f32 %v2216_v30, %v6708_v6  ;;  %v2217_v19 = vld [vmem:[%s5037_s30 + $0x4b0] sm:$0xff]  ;;  %2515 = vst [vmem:[%s5037_s30 + $0x480] sm:$0xff] %v2363_v46  ;;  %2516 = vst [vmem:[%s5037_s30 + $0x488] sm:$0xff] %v2364_v15  ;;  %v6709_v18 = vld [vmem:[#allocation120_spill] sm:$0xff] }
 0x39c   : > { %2517 = vst [vmem:[%s5037_s30 + $0x490] sm:$0xff] %v2365_v14  ;;  %v2369_v50 = vadd.f32 %v2217_v19, %v6709_v18  ;;  %v6710_v29 = vld [vmem:[#allocation122_spill] sm:$0xff]  ;;  %2518 = vst [vmem:[%s5037_s30 + $0x498] sm:$0xff] %v2366_v47 }
 0x39d   : > { %v2370_v49 = vadd.f32 %v2218_v48, %v6710_v29  ;;  %2519 = vst [vmem:[%s5037_s30 + $0x4a0] sm:$0xff] %v2367_v17  ;;  %2520 = vst [vmem:[%s5037_s30 + $0x4a8] sm:$0xff] %v2368_v5 }
 0x39e   : > { %2521 = vst [vmem:[%s5037_s30 + $0x4b0] sm:$0xff] %v2369_v50 }
 0x39f   : > { %2522 = vst [vmem:[%s5037_s30 + $0x4b8] sm:$0xff] %v2370_v49 }
 0x3a0 PF: > { %p3194_p10 = scmp.ne.s32.totalorder %s3971_s21, 1 }
 0x3a1   : > { %v2681_v20 = vlaneseq (!%p3194_p10)  ;;  %v2679_v21 = vld [vmem:[%s4316_s5] sm:$0xf] (!%p3194_p10)  ;;  %v2539_v62 = vld [vmem:[%s5037_s30 + $0x60] sm:$0xff] (!%p3194_p10)  ;;  %v2540_v36 = vld [vmem:[%s5037_s30 + $0x68] sm:$0xff] (!%p3194_p10) }
 0x3a2   : > { %2526 = sbr.rel (%p3194_p10) target bundleno = 1015 (0x3f7), region = 56  ;;  %v2527_v7 = vld [vmem:[%s5037_s30] sm:$0xff] (!%p3194_p10)  ;;  %v2528_v51 = vld [vmem:[%s5037_s30 + $0x8] sm:$0xff] (!%p3194_p10)  ;;  %v2541_v61 = vld [vmem:[%s5037_s30 + $0x70] sm:$0xff] (!%p3194_p10) }
 0x3a3   : > { %v2682_v31 = vshrl.u32 (!%p3194_p10), %v2681_v20, 7  ;;  %v2529_v52 = vld [vmem:[%s5037_s30 + $0x10] sm:$0xff] (!%p3194_p10)  ;;  %v2530_v32 = vld [vmem:[%s5037_s30 + $0x18] sm:$0xff] (!%p3194_p10)  ;;  %v2543_v9 = vld [vmem:[%s5037_s30 + $0x80] sm:$0xff] (!%p3194_p10) }
 0x3a4   : > { %v2531_v55 = vld [vmem:[%s5037_s30 + $0x20] sm:$0xff] (!%p3194_p10)  ;;  %v2532_v34 = vld [vmem:[%s5037_s30 + $0x28] sm:$0xff] (!%p3194_p10)  ;;  %v2542_v38 = vld [vmem:[%s5037_s30 + $0x78] sm:$0xff] (!%p3194_p10) }
 0x3a5   : > { %v2683_v54 = vsub.s32 (!%p3194_p10), 0, %v2682_v31  ;;  %v2687_v8 = vsub.s32 (!%p3194_p10), 1, %v2682_v31  ;;  %v2691_v13 = vsub.s32 (!%p3194_p10), 2, %v2682_v31  ;;  %v2695_v53 = vsub.s32 (!%p3194_p10), 3, %v2682_v31  ;;  %v2533_v56 = vld [vmem:[%s5037_s30 + $0x30] sm:$0xff] (!%p3194_p10)  ;;  %v2534_v33 = vld [vmem:[%s5037_s30 + $0x38] sm:$0xff] (!%p3194_p10) }
 0x3a6   : > { %v2535_v22 = vld [vmem:[%s5037_s30 + $0x40] sm:$0xff] (!%p3194_p10)  ;;  %v2536_v58 = vld [vmem:[%s5037_s30 + $0x48] sm:$0xff] (!%p3194_p10)  ;;  %v2545_v37 = vld [vmem:[%s5037_s30 + $0x90] sm:$0xff] (!%p3194_p10) }
 0x3a7   : > { %v2537_v57 = vld [vmem:[%s5037_s30 + $0x50] sm:$0xff] (!%p3194_p10)  ;;  %v2538_v35 = vld [vmem:[%s5037_s30 + $0x58] sm:$0xff] (!%p3194_p10)  ;;  %v5815_v59 = vrot.slane (!%p3194_p10), %v2679_v21, %v2683_v54  ;;  %v5817_v23 = vrot.slane (!%p3194_p10), %v2679_v21, %v2687_v8  ;;  %v5819_v10 = vrot.slane (!%p3194_p10), %v2679_v21, %v2691_v13  ;;  %v5821_v60 = vrot.slane (!%p3194_p10), %v2679_v21, %v2695_v53  ;;  %v2544_v63 = vld [vmem:[%s5037_s30 + $0x88] sm:$0xff] (!%p3194_p10) }
 0x3a8   : > { %v2546_v0 = vld [vmem:[%s5037_s30 + $0x98] sm:$0xff] (!%p3194_p10)  ;;  %v2547_v40 = vld [vmem:[%s5037_s30 + $0xa0] sm:$0xff] (!%p3194_p10)  ;;  %v2548_v4 = vld [vmem:[%s5037_s30 + $0xa8] sm:$0xff] (!%p3194_p10) }
 0x3a9   : > { %v2701_v11 = vadd.f32 %v5815_v59, %v2527_v7  ;;  %v2702_v2 = vadd.f32 %v5817_v23, %v2528_v51  ;;  %v2703_v24 = vadd.f32 %v5819_v10, %v2529_v52  ;;  %v2704_v39 = vadd.f32 %v5821_v60, %v2530_v32  ;;  %v2549_v1 = vld [vmem:[%s5037_s30 + $0xb0] sm:$0xff]  ;;  %v2550_v42 = vld [vmem:[%s5037_s30 + $0xb8] sm:$0xff]  ;;  %v2551_v43 = vld [vmem:[%s5037_s30 + $0xc0] sm:$0xff] }
 0x3aa   : > { %v2705_v3 = vadd.f32 %v5815_v59, %v2531_v55  ;;  %v2706_v26 = vadd.f32 %v5817_v23, %v2532_v34  ;;  %v2707_v25 = vadd.f32 %v5819_v10, %v2533_v56  ;;  %v2708_v41 = vadd.f32 %v5821_v60, %v2534_v33  ;;  %v2552_v27 = vld [vmem:[%s5037_s30 + $0xc8] sm:$0xff]  ;;  %v2553_v44 = vld [vmem:[%s5037_s30 + $0xd0] sm:$0xff]  ;;  %v2554_v28 = vld [vmem:[%s5037_s30 + $0xd8] sm:$0xff] }
 0x3ab   : > { %2853 = vst [vmem:[%s5037_s30] sm:$0xff] %v2701_v11  ;;  %2854 = vst [vmem:[%s5037_s30 + $0x8] sm:$0xff] %v2702_v2  ;;  %v2709_v12 = vadd.f32 %v5815_v59, %v2535_v22  ;;  %v2710_v46 = vadd.f32 %v5817_v23, %v2536_v58  ;;  %v2711_v15 = vadd.f32 %v5819_v10, %v2537_v57  ;;  %v2555_v45 = vld [vmem:[%s5037_s30 + $0xe0] sm:$0xff]  ;;  %v2556_v16 = vld [vmem:[%s5037_s30 + $0xe8] sm:$0xff] }
 0x3ac   : > { %2855 = vst [vmem:[%s5037_s30 + $0x10] sm:$0xff] %v2703_v24  ;;  %2856 = vst [vmem:[%s5037_s30 + $0x18] sm:$0xff] %v2704_v39  ;;  %v2712_v14 = vadd.f32 %v5821_v60, %v2538_v35  ;;  %v2557_v30 = vld [vmem:[%s5037_s30 + $0xf0] sm:$0xff]  ;;  %v2713_v47 = vadd.f32 %v5815_v59, %v2539_v62  ;;  %v2714_v17 = vadd.f32 %v5817_v23, %v2540_v36  ;;  %v2558_v19 = vld [vmem:[%s5037_s30 + $0xf8] sm:$0xff] }
 0x3ad   : > { %2857 = vst [vmem:[%s5037_s30 + $0x20] sm:$0xff] %v2705_v3  ;;  %2858 = vst [vmem:[%s5037_s30 + $0x28] sm:$0xff] %v2706_v26  ;;  %v2715_v6 = vadd.f32 %v5819_v10, %v2541_v61  ;;  %v2716_v5 = vadd.f32 %v5821_v60, %v2542_v38  ;;  %v2559_v48 = vld [vmem:[%s5037_s30 + $0x100] sm:$0xff]  ;;  %v2560_v18 = vld [vmem:[%s5037_s30 + $0x108] sm:$0xff]  ;;  %v2717_v50 = vadd.f32 %v5815_v59, %v2543_v9 }
 0x3ae   : > { %2859 = vst [vmem:[%s5037_s30 + $0x30] sm:$0xff] %v2707_v25  ;;  %2860 = vst [vmem:[%s5037_s30 + $0x38] sm:$0xff] %v2708_v41  ;;  %v2718_v29 = vadd.f32 %v5817_v23, %v2544_v63  ;;  %v2719_v49 = vadd.f32 %v5819_v10, %v2545_v37  ;;  %v2720_v20 = vadd.f32 %v5821_v60, %v2546_v0  ;;  %v2561_v21 = vld [vmem:[%s5037_s30 + $0x110] sm:$0xff]  ;;  %v2562_v31 = vld [vmem:[%s5037_s30 + $0x118] sm:$0xff] }
 0x3af   : > { %2861 = vst [vmem:[%s5037_s30 + $0x40] sm:$0xff] %v2709_v12  ;;  %2862 = vst [vmem:[%s5037_s30 + $0x48] sm:$0xff] %v2710_v46  ;;  %v2563_v7 = vld [vmem:[%s5037_s30 + $0x120] sm:$0xff]  ;;  %v2721_v51 = vadd.f32 %v5815_v59, %v2547_v40  ;;  %v2722_v52 = vadd.f32 %v5817_v23, %v2548_v4  ;;  %v2723_v32 = vadd.f32 %v5819_v10, %v2549_v1  ;;  %v2564_v8 = vld [vmem:[%s5037_s30 + $0x128] sm:$0xff] }
 0x3b0   : > { %2863 = vst [vmem:[%s5037_s30 + $0x50] sm:$0xff] %v2711_v15  ;;  %2864 = vst [vmem:[%s5037_s30 + $0x58] sm:$0xff] %v2712_v14  ;;  %v2724_v54 = vadd.f32 %v5821_v60, %v2550_v42  ;;  %v2565_v13 = vld [vmem:[%s5037_s30 + $0x130] sm:$0xff]  ;;  %v2566_v53 = vld [vmem:[%s5037_s30 + $0x138] sm:$0xff]  ;;  %v2725_v55 = vadd.f32 %v5815_v59, %v2551_v43  ;;  %v2726_v34 = vadd.f32 %v5817_v23, %v2552_v27 }
 0x3b1   : > { %2865 = vst [vmem:[%s5037_s30 + $0x60] sm:$0xff] %v2713_v47  ;;  %2866 = vst [vmem:[%s5037_s30 + $0x68] sm:$0xff] %v2714_v17  ;;  %v2727_v56 = vadd.f32 %v5819_v10, %v2553_v44  ;;  %v2728_v33 = vadd.f32 %v5821_v60, %v2554_v28  ;;  %v2567_v22 = vld [vmem:[%s5037_s30 + $0x140] sm:$0xff]  ;;  %v2568_v58 = vld [vmem:[%s5037_s30 + $0x148] sm:$0xff]  ;;  %v2729_v35 = vadd.f32 %v5815_v59, %v2555_v45 }
 0x3b2   : > { %2867 = vst [vmem:[%s5037_s30 + $0x70] sm:$0xff] %v2715_v6  ;;  %2868 = vst [vmem:[%s5037_s30 + $0x78] sm:$0xff] %v2716_v5  ;;  %v2569_v57 = vld [vmem:[%s5037_s30 + $0x150] sm:$0xff]  ;;  %v2730_v62 = vadd.f32 %v5817_v23, %v2556_v16  ;;  %v2731_v36 = vadd.f32 %v5819_v10, %v2557_v30  ;;  %v2732_v61 = vadd.f32 %v5821_v60, %v2558_v19  ;;  %v2570_v38 = vld [vmem:[%s5037_s30 + $0x158] sm:$0xff] }
 0x3b3   : > { %2869 = vst [vmem:[%s5037_s30 + $0x80] sm:$0xff] %v2717_v50  ;;  %2870 = vst [vmem:[%s5037_s30 + $0x88] sm:$0xff] %v2718_v29  ;;  %v2571_v9 = vld [vmem:[%s5037_s30 + $0x160] sm:$0xff]  ;;  %v2572_v63 = vld [vmem:[%s5037_s30 + $0x168] sm:$0xff]  ;;  %v2733_v37 = vadd.f32 %v5815_v59, %v2559_v48  ;;  %v2734_v0 = vadd.f32 %v5817_v23, %v2560_v18  ;;  %v2735_v11 = vadd.f32 %v5819_v10, %v2561_v21 }
 0x3b4   : > { %2871 = vst [vmem:[%s5037_s30 + $0x90] sm:$0xff] %v2719_v49  ;;  %2872 = vst [vmem:[%s5037_s30 + $0x98] sm:$0xff] %v2720_v20  ;;  %v2736_v2 = vadd.f32 %v5821_v60, %v2562_v31  ;;  %v2573_v24 = vld [vmem:[%s5037_s30 + $0x170] sm:$0xff]  ;;  %v2574_v39 = vld [vmem:[%s5037_s30 + $0x178] sm:$0xff]  ;;  %v2737_v4 = vadd.f32 %v5815_v59, %v2563_v7  ;;  %v2738_v1 = vadd.f32 %v5817_v23, %v2564_v8 }
 0x3b5   : > { %2873 = vst [vmem:[%s5037_s30 + $0xa0] sm:$0xff] %v2721_v51  ;;  %2874 = vst [vmem:[%s5037_s30 + $0xa8] sm:$0xff] %v2722_v52  ;;  %v2575_v40 = vld [vmem:[%s5037_s30 + $0x180] sm:$0xff]  ;;  %v2739_v42 = vadd.f32 %v5819_v10, %v2565_v13  ;;  %v2740_v3 = vadd.f32 %v5821_v60, %v2566_v53  ;;  %v2576_v26 = vld [vmem:[%s5037_s30 + $0x188] sm:$0xff]  ;;  %v2741_v43 = vadd.f32 %v5815_v59, %v2567_v22 }
 0x3b6   : > { %2875 = vst [vmem:[%s5037_s30 + $0xb0] sm:$0xff] %v2723_v32  ;;  %2876 = vst [vmem:[%s5037_s30 + $0xb8] sm:$0xff] %v2724_v54  ;;  %v2577_v25 = vld [vmem:[%s5037_s30 + $0x190] sm:$0xff]  ;;  %v2578_v41 = vld [vmem:[%s5037_s30 + $0x198] sm:$0xff]  ;;  %v2742_v27 = vadd.f32 %v5817_v23, %v2568_v58  ;;  %v2743_v44 = vadd.f32 %v5819_v10, %v2569_v57  ;;  %v2744_v28 = vadd.f32 %v5821_v60, %v2570_v38 }
 0x3b7   : > { %2877 = vst [vmem:[%s5037_s30 + $0xc0] sm:$0xff] %v2725_v55  ;;  %2878 = vst [vmem:[%s5037_s30 + $0xc8] sm:$0xff] %v2726_v34  ;;  %v2579_v12 = vld [vmem:[%s5037_s30 + $0x1a0] sm:$0xff]  ;;  %v2580_v46 = vld [vmem:[%s5037_s30 + $0x1a8] sm:$0xff]  ;;  %v2745_v14 = vadd.f32 %v5815_v59, %v2571_v9  ;;  %v2746_v45 = vadd.f32 %v5817_v23, %v2572_v63  ;;  %v2747_v16 = vadd.f32 %v5819_v10, %v2573_v24 }
 0x3b8   : > { %2879 = vst [vmem:[%s5037_s30 + $0xd0] sm:$0xff] %v2727_v56  ;;  %2880 = vst [vmem:[%s5037_s30 + $0xd8] sm:$0xff] %v2728_v33  ;;  %v2581_v15 = vld [vmem:[%s5037_s30 + $0x1b0] sm:$0xff]  ;;  %v2748_v30 = vadd.f32 %v5821_v60, %v2574_v39  ;;  %v2582_v47 = vld [vmem:[%s5037_s30 + $0x1b8] sm:$0xff]  ;;  %v2749_v5 = vadd.f32 %v5815_v59, %v2575_v40  ;;  %v2750_v19 = vadd.f32 %v5817_v23, %v2576_v26 }
 0x3b9   : > { %2881 = vst [vmem:[%s5037_s30 + $0xe0] sm:$0xff] %v2729_v35  ;;  %2882 = vst [vmem:[%s5037_s30 + $0xe8] sm:$0xff] %v2730_v62  ;;  %v2583_v17 = vld [vmem:[%s5037_s30 + $0x1c0] sm:$0xff]  ;;  %v2584_v6 = vld [vmem:[%s5037_s30 + $0x1c8] sm:$0xff]  ;;  %v2751_v48 = vadd.f32 %v5819_v10, %v2577_v25  ;;  %v2752_v18 = vadd.f32 %v5821_v60, %v2578_v41  ;;  %v2753_v20 = vadd.f32 %v5815_v59, %v2579_v12 }
 0x3ba   : > { %2883 = vst [vmem:[%s5037_s30 + $0xf0] sm:$0xff] %v2731_v36  ;;  %2884 = vst [vmem:[%s5037_s30 + $0xf8] sm:$0xff] %v2732_v61  ;;  %v2585_v50 = vld [vmem:[%s5037_s30 + $0x1d0] sm:$0xff]  ;;  %v2586_v29 = vld [vmem:[%s5037_s30 + $0x1d8] sm:$0xff]  ;;  %v2754_v21 = vadd.f32 %v5817_v23, %v2580_v46  ;;  %v2755_v31 = vadd.f32 %v5819_v10, %v2581_v15  ;;  %v2756_v7 = vadd.f32 %v5821_v60, %v2582_v47 }
 0x3bb   : > { %2885 = vst [vmem:[%s5037_s30 + $0x100] sm:$0xff] %v2733_v37  ;;  %2886 = vst [vmem:[%s5037_s30 + $0x108] sm:$0xff] %v2734_v0  ;;  %v2587_v49 = vld [vmem:[%s5037_s30 + $0x1e0] sm:$0xff]  ;;  %v2588_v51 = vld [vmem:[%s5037_s30 + $0x1e8] sm:$0xff]  ;;  %v2757_v54 = vadd.f32 %v5815_v59, %v2583_v17  ;;  %v2758_v8 = vadd.f32 %v5817_v23, %v2584_v6  ;;  %v2759_v13 = vadd.f32 %v5819_v10, %v2585_v50 }
 0x3bc   : > { %2887 = vst [vmem:[%s5037_s30 + $0x110] sm:$0xff] %v2735_v11  ;;  %2888 = vst [vmem:[%s5037_s30 + $0x118] sm:$0xff] %v2736_v2  ;;  %v2589_v52 = vld [vmem:[%s5037_s30 + $0x1f0] sm:$0xff]  ;;  %v2590_v32 = vld [vmem:[%s5037_s30 + $0x1f8] sm:$0xff]  ;;  %v2760_v53 = vadd.f32 %v5821_v60, %v2586_v29  ;;  %v2761_v33 = vadd.f32 %v5815_v59, %v2587_v49  ;;  %v2762_v22 = vadd.f32 %v5817_v23, %v2588_v51 }
 0x3bd   : > { %2889 = vst [vmem:[%s5037_s30 + $0x120] sm:$0xff] %v2737_v4  ;;  %2890 = vst [vmem:[%s5037_s30 + $0x128] sm:$0xff] %v2738_v1  ;;  %v2591_v55 = vld [vmem:[%s5037_s30 + $0x200] sm:$0xff]  ;;  %v2592_v34 = vld [vmem:[%s5037_s30 + $0x208] sm:$0xff]  ;;  %v2763_v58 = vadd.f32 %v5819_v10, %v2589_v52  ;;  %v2764_v57 = vadd.f32 %v5821_v60, %v2590_v32 }
 0x3be   : > { %2891 = vst [vmem:[%s5037_s30 + $0x130] sm:$0xff] %v2739_v42  ;;  %2892 = vst [vmem:[%s5037_s30 + $0x138] sm:$0xff] %v2740_v3  ;;  %v2593_v56 = vld [vmem:[%s5037_s30 + $0x210] sm:$0xff]  ;;  %v2594_v35 = vld [vmem:[%s5037_s30 + $0x218] sm:$0xff]  ;;  %v2765_v61 = vadd.f32 %v5815_v59, %v2591_v55  ;;  %v2766_v38 = vadd.f32 %v5817_v23, %v2592_v34 }
 0x3bf   : > { %2893 = vst [vmem:[%s5037_s30 + $0x140] sm:$0xff] %v2741_v43  ;;  %2894 = vst [vmem:[%s5037_s30 + $0x148] sm:$0xff] %v2742_v27  ;;  %v2595_v62 = vld [vmem:[%s5037_s30 + $0x220] sm:$0xff]  ;;  %v2596_v36 = vld [vmem:[%s5037_s30 + $0x228] sm:$0xff]  ;;  %v2767_v9 = vadd.f32 %v5819_v10, %v2593_v56  ;;  %v2768_v63 = vadd.f32 %v5821_v60, %v2594_v35 }
 0x3c0   : > { %2895 = vst [vmem:[%s5037_s30 + $0x150] sm:$0xff] %v2743_v44  ;;  %2896 = vst [vmem:[%s5037_s30 + $0x158] sm:$0xff] %v2744_v28  ;;  %v2597_v37 = vld [vmem:[%s5037_s30 + $0x230] sm:$0xff]  ;;  %v2598_v0 = vld [vmem:[%s5037_s30 + $0x238] sm:$0xff]  ;;  %v2769_v2 = vadd.f32 %v5815_v59, %v2595_v62  ;;  %v2770_v24 = vadd.f32 %v5817_v23, %v2596_v36 }
 0x3c1   : > { %2897 = vst [vmem:[%s5037_s30 + $0x160] sm:$0xff] %v2745_v14  ;;  %2898 = vst [vmem:[%s5037_s30 + $0x168] sm:$0xff] %v2746_v45  ;;  %v2599_v11 = vld [vmem:[%s5037_s30 + $0x240] sm:$0xff]  ;;  %v2771_v39 = vadd.f32 %v5819_v10, %v2597_v37  ;;  %v2772_v40 = vadd.f32 %v5821_v60, %v2598_v0  ;;  %v2600_v4 = vld [vmem:[%s5037_s30 + $0x248] sm:$0xff] }
 0x3c2   : > { %2899 = vst [vmem:[%s5037_s30 + $0x170] sm:$0xff] %v2747_v16  ;;  %2900 = vst [vmem:[%s5037_s30 + $0x178] sm:$0xff] %v2748_v30  ;;  %v2601_v1 = vld [vmem:[%s5037_s30 + $0x250] sm:$0xff]  ;;  %v2602_v42 = vld [vmem:[%s5037_s30 + $0x258] sm:$0xff]  ;;  %v2773_v3 = vadd.f32 %v5815_v59, %v2599_v11  ;;  %v2774_v26 = vadd.f32 %v5817_v23, %v2600_v4 }
 0x3c3   : > { %2901 = vst [vmem:[%s5037_s30 + $0x180] sm:$0xff] %v2749_v5  ;;  %2902 = vst [vmem:[%s5037_s30 + $0x188] sm:$0xff] %v2750_v19  ;;  %v2775_v25 = vadd.f32 %v5819_v10, %v2601_v1  ;;  %v2776_v41 = vadd.f32 %v5821_v60, %v2602_v42  ;;  %v2603_v43 = vld [vmem:[%s5037_s30 + $0x260] sm:$0xff]  ;;  %v2604_v27 = vld [vmem:[%s5037_s30 + $0x268] sm:$0xff] }
 0x3c4   : > { %2903 = vst [vmem:[%s5037_s30 + $0x190] sm:$0xff] %v2751_v48  ;;  %2904 = vst [vmem:[%s5037_s30 + $0x198] sm:$0xff] %v2752_v18  ;;  %v2605_v44 = vld [vmem:[%s5037_s30 + $0x270] sm:$0xff]  ;;  %v2777_v28 = vadd.f32 %v5815_v59, %v2603_v43  ;;  %v2778_v12 = vadd.f32 %v5817_v23, %v2604_v27  ;;  %v2606_v15 = vld [vmem:[%s5037_s30 + $0x278] sm:$0xff] }
 0x3c5   : > { %2905 = vst [vmem:[%s5037_s30 + $0x1a0] sm:$0xff] %v2753_v20  ;;  %2906 = vst [vmem:[%s5037_s30 + $0x1a8] sm:$0xff] %v2754_v21  ;;  %v2779_v46 = vadd.f32 %v5819_v10, %v2605_v44  ;;  %v2607_v14 = vld [vmem:[%s5037_s30 + $0x280] sm:$0xff]  ;;  %v2608_v45 = vld [vmem:[%s5037_s30 + $0x288] sm:$0xff]  ;;  %v2780_v16 = vadd.f32 %v5821_v60, %v2606_v15 }
 0x3c6   : > { %2907 = vst [vmem:[%s5037_s30 + $0x1b0] sm:$0xff] %v2755_v31  ;;  %2908 = vst [vmem:[%s5037_s30 + $0x1b8] sm:$0xff] %v2756_v7  ;;  %v2781_v30 = vadd.f32 %v5815_v59, %v2607_v14  ;;  %v2782_v47 = vadd.f32 %v5817_v23, %v2608_v45  ;;  %v2609_v17 = vld [vmem:[%s5037_s30 + $0x290] sm:$0xff]  ;;  %v2610_v6 = vld [vmem:[%s5037_s30 + $0x298] sm:$0xff] }
 0x3c7   : > { %2909 = vst [vmem:[%s5037_s30 + $0x1c0] sm:$0xff] %v2757_v54  ;;  %2910 = vst [vmem:[%s5037_s30 + $0x1c8] sm:$0xff] %v2758_v8  ;;  %v2611_v5 = vld [vmem:[%s5037_s30 + $0x2a0] sm:$0xff]  ;;  %v2783_v19 = vadd.f32 %v5819_v10, %v2609_v17  ;;  %v2784_v48 = vadd.f32 %v5821_v60, %v2610_v6  ;;  %v2612_v50 = vld [vmem:[%s5037_s30 + $0x2a8] sm:$0xff] }
 0x3c8   : > { %2911 = vst [vmem:[%s5037_s30 + $0x1d0] sm:$0xff] %v2759_v13  ;;  %2912 = vst [vmem:[%s5037_s30 + $0x1d8] sm:$0xff] %v2760_v53  ;;  %v2785_v18 = vadd.f32 %v5815_v59, %v2611_v5  ;;  %v2613_v29 = vld [vmem:[%s5037_s30 + $0x2b0] sm:$0xff]  ;;  %v2614_v49 = vld [vmem:[%s5037_s30 + $0x2b8] sm:$0xff]  ;;  %v2786_v20 = vadd.f32 %v5817_v23, %v2612_v50 }
 0x3c9   : > { %2913 = vst [vmem:[%s5037_s30 + $0x1e0] sm:$0xff] %v2761_v33  ;;  %2914 = vst [vmem:[%s5037_s30 + $0x1e8] sm:$0xff] %v2762_v22  ;;  %v2787_v21 = vadd.f32 %v5819_v10, %v2613_v29  ;;  %v2788_v31 = vadd.f32 %v5821_v60, %v2614_v49  ;;  %v2615_v7 = vld [vmem:[%s5037_s30 + $0x2c0] sm:$0xff]  ;;  %v2616_v51 = vld [vmem:[%s5037_s30 + $0x2c8] sm:$0xff] }
 0x3ca   : > { %2915 = vst [vmem:[%s5037_s30 + $0x1f0] sm:$0xff] %v2763_v58  ;;  %2916 = vst [vmem:[%s5037_s30 + $0x1f8] sm:$0xff] %v2764_v57  ;;  %v2617_v52 = vld [vmem:[%s5037_s30 + $0x2d0] sm:$0xff]  ;;  %v2789_v32 = vadd.f32 %v5815_v59, %v2615_v7  ;;  %v2790_v54 = vadd.f32 %v5817_v23, %v2616_v51  ;;  %v2618_v13 = vld [vmem:[%s5037_s30 + $0x2d8] sm:$0xff] }
 0x3cb   : > { %2917 = vst [vmem:[%s5037_s30 + $0x200] sm:$0xff] %v2765_v61  ;;  %2918 = vst [vmem:[%s5037_s30 + $0x208] sm:$0xff] %v2766_v38  ;;  %v2791_v8 = vadd.f32 %v5819_v10, %v2617_v52  ;;  %v2619_v53 = vld [vmem:[%s5037_s30 + $0x2e0] sm:$0xff]  ;;  %v2620_v55 = vld [vmem:[%s5037_s30 + $0x2e8] sm:$0xff]  ;;  %v2792_v34 = vadd.f32 %v5821_v60, %v2618_v13 }
 0x3cc   : > { %2919 = vst [vmem:[%s5037_s30 + $0x210] sm:$0xff] %v2767_v9  ;;  %2920 = vst [vmem:[%s5037_s30 + $0x218] sm:$0xff] %v2768_v63  ;;  %v2793_v56 = vadd.f32 %v5815_v59, %v2619_v53  ;;  %v2794_v33 = vadd.f32 %v5817_v23, %v2620_v55  ;;  %v2621_v22 = vld [vmem:[%s5037_s30 + $0x2f0] sm:$0xff]  ;;  %v2622_v58 = vld [vmem:[%s5037_s30 + $0x2f8] sm:$0xff] }
 0x3cd   : > { %2921 = vst [vmem:[%s5037_s30 + $0x220] sm:$0xff] %v2769_v2  ;;  %2922 = vst [vmem:[%s5037_s30 + $0x228] sm:$0xff] %v2770_v24  ;;  %v2623_v57 = vld [vmem:[%s5037_s30 + $0x300] sm:$0xff]  ;;  %v2795_v35 = vadd.f32 %v5819_v10, %v2621_v22  ;;  %v2796_v62 = vadd.f32 %v5821_v60, %v2622_v58  ;;  %v2624_v61 = vld [vmem:[%s5037_s30 + $0x308] sm:$0xff] }
 0x3ce   : > { %2923 = vst [vmem:[%s5037_s30 + $0x230] sm:$0xff] %v2771_v39  ;;  %2924 = vst [vmem:[%s5037_s30 + $0x238] sm:$0xff] %v2772_v40  ;;  %v2797_v36 = vadd.f32 %v5815_v59, %v2623_v57  ;;  %v2625_v38 = vld [vmem:[%s5037_s30 + $0x310] sm:$0xff]  ;;  %v2626_v9 = vld [vmem:[%s5037_s30 + $0x318] sm:$0xff]  ;;  %v2798_v63 = vadd.f32 %v5817_v23, %v2624_v61 }
 0x3cf   : > { %2925 = vst [vmem:[%s5037_s30 + $0x240] sm:$0xff] %v2773_v3  ;;  %2926 = vst [vmem:[%s5037_s30 + $0x248] sm:$0xff] %v2774_v26  ;;  %v2799_v37 = vadd.f32 %v5819_v10, %v2625_v38  ;;  %v2800_v0 = vadd.f32 %v5821_v60, %v2626_v9  ;;  %v2627_v11 = vld [vmem:[%s5037_s30 + $0x320] sm:$0xff]  ;;  %v2628_v2 = vld [vmem:[%s5037_s30 + $0x328] sm:$0xff] }
 0x3d0   : > { %2927 = vst [vmem:[%s5037_s30 + $0x250] sm:$0xff] %v2775_v25  ;;  %2928 = vst [vmem:[%s5037_s30 + $0x258] sm:$0xff] %v2776_v41  ;;  %v2629_v24 = vld [vmem:[%s5037_s30 + $0x330] sm:$0xff]  ;;  %v2801_v39 = vadd.f32 %v5815_v59, %v2627_v11  ;;  %v2802_v40 = vadd.f32 %v5817_v23, %v2628_v2  ;;  %v2630_v1 = vld [vmem:[%s5037_s30 + $0x338] sm:$0xff] }
 0x3d1   : > { %2929 = vst [vmem:[%s5037_s30 + $0x260] sm:$0xff] %v2777_v28  ;;  %2930 = vst [vmem:[%s5037_s30 + $0x268] sm:$0xff] %v2778_v12  ;;  %v2803_v4 = vadd.f32 %v5819_v10, %v2629_v24  ;;  %v2631_v42 = vld [vmem:[%s5037_s30 + $0x340] sm:$0xff]  ;;  %v2632_v3 = vld [vmem:[%s5037_s30 + $0x348] sm:$0xff]  ;;  %v2804_v26 = vadd.f32 %v5821_v60, %v2630_v1 }
 0x3d2   : > { %2931 = vst [vmem:[%s5037_s30 + $0x270] sm:$0xff] %v2779_v46  ;;  %2932 = vst [vmem:[%s5037_s30 + $0x278] sm:$0xff] %v2780_v16  ;;  %v2805_v25 = vadd.f32 %v5815_v59, %v2631_v42  ;;  %v2806_v41 = vadd.f32 %v5817_v23, %v2632_v3  ;;  %v2633_v43 = vld [vmem:[%s5037_s30 + $0x350] sm:$0xff]  ;;  %v2634_v27 = vld [vmem:[%s5037_s30 + $0x358] sm:$0xff] }
 0x3d3   : > { %2933 = vst [vmem:[%s5037_s30 + $0x280] sm:$0xff] %v2781_v30  ;;  %2934 = vst [vmem:[%s5037_s30 + $0x288] sm:$0xff] %v2782_v47  ;;  %v2635_v44 = vld [vmem:[%s5037_s30 + $0x360] sm:$0xff]  ;;  %v2807_v28 = vadd.f32 %v5819_v10, %v2633_v43  ;;  %v2808_v12 = vadd.f32 %v5821_v60, %v2634_v27  ;;  %v2636_v15 = vld [vmem:[%s5037_s30 + $0x368] sm:$0xff] }
 0x3d4   : > { %2935 = vst [vmem:[%s5037_s30 + $0x290] sm:$0xff] %v2783_v19  ;;  %2936 = vst [vmem:[%s5037_s30 + $0x298] sm:$0xff] %v2784_v48  ;;  %v2809_v46 = vadd.f32 %v5815_v59, %v2635_v44  ;;  %v2637_v14 = vld [vmem:[%s5037_s30 + $0x370] sm:$0xff]  ;;  %v2638_v45 = vld [vmem:[%s5037_s30 + $0x378] sm:$0xff]  ;;  %v2810_v16 = vadd.f32 %v5817_v23, %v2636_v15 }
 0x3d5   : > { %2937 = vst [vmem:[%s5037_s30 + $0x2a0] sm:$0xff] %v2785_v18  ;;  %2938 = vst [vmem:[%s5037_s30 + $0x2a8] sm:$0xff] %v2786_v20  ;;  %v2811_v30 = vadd.f32 %v5819_v10, %v2637_v14  ;;  %v2812_v47 = vadd.f32 %v5821_v60, %v2638_v45  ;;  %v2639_v17 = vld [vmem:[%s5037_s30 + $0x380] sm:$0xff]  ;;  %v2640_v6 = vld [vmem:[%s5037_s30 + $0x388] sm:$0xff] }
 0x3d6   : > { %2939 = vst [vmem:[%s5037_s30 + $0x2b0] sm:$0xff] %v2787_v21  ;;  %2940 = vst [vmem:[%s5037_s30 + $0x2b8] sm:$0xff] %v2788_v31  ;;  %v2641_v5 = vld [vmem:[%s5037_s30 + $0x390] sm:$0xff]  ;;  %v2813_v19 = vadd.f32 %v5815_v59, %v2639_v17  ;;  %v2814_v48 = vadd.f32 %v5817_v23, %v2640_v6  ;;  %v2642_v50 = vld [vmem:[%s5037_s30 + $0x398] sm:$0xff] }
 0x3d7   : > { %2941 = vst [vmem:[%s5037_s30 + $0x2c0] sm:$0xff] %v2789_v32  ;;  %2942 = vst [vmem:[%s5037_s30 + $0x2c8] sm:$0xff] %v2790_v54  ;;  %v2815_v18 = vadd.f32 %v5819_v10, %v2641_v5  ;;  %v2643_v29 = vld [vmem:[%s5037_s30 + $0x3a0] sm:$0xff]  ;;  %v2644_v49 = vld [vmem:[%s5037_s30 + $0x3a8] sm:$0xff]  ;;  %v2816_v20 = vadd.f32 %v5821_v60, %v2642_v50 }
 0x3d8   : > { %2943 = vst [vmem:[%s5037_s30 + $0x2d0] sm:$0xff] %v2791_v8  ;;  %2944 = vst [vmem:[%s5037_s30 + $0x2d8] sm:$0xff] %v2792_v34  ;;  %v2817_v21 = vadd.f32 %v5815_v59, %v2643_v29  ;;  %v2818_v31 = vadd.f32 %v5817_v23, %v2644_v49  ;;  %v2645_v7 = vld [vmem:[%s5037_s30 + $0x3b0] sm:$0xff]  ;;  %v2646_v51 = vld [vmem:[%s5037_s30 + $0x3b8] sm:$0xff] }
 0x3d9   : > { %2945 = vst [vmem:[%s5037_s30 + $0x2e0] sm:$0xff] %v2793_v56  ;;  %2946 = vst [vmem:[%s5037_s30 + $0x2e8] sm:$0xff] %v2794_v33  ;;  %v2647_v52 = vld [vmem:[%s5037_s30 + $0x3c0] sm:$0xff]  ;;  %v2819_v32 = vadd.f32 %v5819_v10, %v2645_v7  ;;  %v2820_v54 = vadd.f32 %v5821_v60, %v2646_v51  ;;  %v2648_v13 = vld [vmem:[%s5037_s30 + $0x3c8] sm:$0xff] }
 0x3da   : > { %2947 = vst [vmem:[%s5037_s30 + $0x2f0] sm:$0xff] %v2795_v35  ;;  %2948 = vst [vmem:[%s5037_s30 + $0x2f8] sm:$0xff] %v2796_v62  ;;  %v2821_v8 = vadd.f32 %v5815_v59, %v2647_v52  ;;  %v2649_v53 = vld [vmem:[%s5037_s30 + $0x3d0] sm:$0xff]  ;;  %v2650_v55 = vld [vmem:[%s5037_s30 + $0x3d8] sm:$0xff]  ;;  %v2822_v34 = vadd.f32 %v5817_v23, %v2648_v13 }
 0x3db   : > { %2949 = vst [vmem:[%s5037_s30 + $0x300] sm:$0xff] %v2797_v36  ;;  %2950 = vst [vmem:[%s5037_s30 + $0x308] sm:$0xff] %v2798_v63  ;;  %v2823_v56 = vadd.f32 %v5819_v10, %v2649_v53  ;;  %v2824_v33 = vadd.f32 %v5821_v60, %v2650_v55  ;;  %v2651_v22 = vld [vmem:[%s5037_s30 + $0x3e0] sm:$0xff]  ;;  %v2652_v58 = vld [vmem:[%s5037_s30 + $0x3e8] sm:$0xff] }
 0x3dc   : > { %2951 = vst [vmem:[%s5037_s30 + $0x310] sm:$0xff] %v2799_v37  ;;  %2952 = vst [vmem:[%s5037_s30 + $0x318] sm:$0xff] %v2800_v0  ;;  %v2653_v57 = vld [vmem:[%s5037_s30 + $0x3f0] sm:$0xff]  ;;  %v2825_v35 = vadd.f32 %v5815_v59, %v2651_v22  ;;  %v2826_v62 = vadd.f32 %v5817_v23, %v2652_v58  ;;  %v2654_v61 = vld [vmem:[%s5037_s30 + $0x3f8] sm:$0xff] }
 0x3dd   : > { %2953 = vst [vmem:[%s5037_s30 + $0x320] sm:$0xff] %v2801_v39  ;;  %2954 = vst [vmem:[%s5037_s30 + $0x328] sm:$0xff] %v2802_v40  ;;  %v2827_v36 = vadd.f32 %v5819_v10, %v2653_v57  ;;  %v2655_v38 = vld [vmem:[%s5037_s30 + $0x400] sm:$0xff]  ;;  %v2656_v9 = vld [vmem:[%s5037_s30 + $0x408] sm:$0xff]  ;;  %v2828_v63 = vadd.f32 %v5821_v60, %v2654_v61 }
 0x3de   : > { %2955 = vst [vmem:[%s5037_s30 + $0x330] sm:$0xff] %v2803_v4  ;;  %2956 = vst [vmem:[%s5037_s30 + $0x338] sm:$0xff] %v2804_v26  ;;  %v2829_v37 = vadd.f32 %v5815_v59, %v2655_v38  ;;  %v2830_v0 = vadd.f32 %v5817_v23, %v2656_v9  ;;  %v2657_v11 = vld [vmem:[%s5037_s30 + $0x410] sm:$0xff]  ;;  %v2658_v2 = vld [vmem:[%s5037_s30 + $0x418] sm:$0xff] }
 0x3df   : > { %2957 = vst [vmem:[%s5037_s30 + $0x340] sm:$0xff] %v2805_v25  ;;  %2958 = vst [vmem:[%s5037_s30 + $0x348] sm:$0xff] %v2806_v41  ;;  %v2659_v24 = vld [vmem:[%s5037_s30 + $0x420] sm:$0xff]  ;;  %v2831_v39 = vadd.f32 %v5819_v10, %v2657_v11  ;;  %v2832_v40 = vadd.f32 %v5821_v60, %v2658_v2  ;;  %v2660_v1 = vld [vmem:[%s5037_s30 + $0x428] sm:$0xff] }
 0x3e0   : > { %2959 = vst [vmem:[%s5037_s30 + $0x350] sm:$0xff] %v2807_v28  ;;  %2960 = vst [vmem:[%s5037_s30 + $0x358] sm:$0xff] %v2808_v12  ;;  %v2833_v4 = vadd.f32 %v5815_v59, %v2659_v24  ;;  %v2661_v42 = vld [vmem:[%s5037_s30 + $0x430] sm:$0xff]  ;;  %v2662_v3 = vld [vmem:[%s5037_s30 + $0x438] sm:$0xff]  ;;  %v2834_v26 = vadd.f32 %v5817_v23, %v2660_v1 }
 0x3e1   : > { %2961 = vst [vmem:[%s5037_s30 + $0x360] sm:$0xff] %v2809_v46  ;;  %2962 = vst [vmem:[%s5037_s30 + $0x368] sm:$0xff] %v2810_v16  ;;  %v2835_v25 = vadd.f32 %v5819_v10, %v2661_v42  ;;  %v2836_v41 = vadd.f32 %v5821_v60, %v2662_v3  ;;  %v2663_v43 = vld [vmem:[%s5037_s30 + $0x440] sm:$0xff]  ;;  %v2664_v27 = vld [vmem:[%s5037_s30 + $0x448] sm:$0xff] }
 0x3e2   : > { %2963 = vst [vmem:[%s5037_s30 + $0x370] sm:$0xff] %v2811_v30  ;;  %2964 = vst [vmem:[%s5037_s30 + $0x378] sm:$0xff] %v2812_v47  ;;  %v2665_v44 = vld [vmem:[%s5037_s30 + $0x450] sm:$0xff]  ;;  %v2837_v28 = vadd.f32 %v5815_v59, %v2663_v43  ;;  %v2838_v12 = vadd.f32 %v5817_v23, %v2664_v27  ;;  %v2666_v15 = vld [vmem:[%s5037_s30 + $0x458] sm:$0xff] }
 0x3e3   : > { %2965 = vst [vmem:[%s5037_s30 + $0x380] sm:$0xff] %v2813_v19  ;;  %2966 = vst [vmem:[%s5037_s30 + $0x388] sm:$0xff] %v2814_v48  ;;  %v2839_v46 = vadd.f32 %v5819_v10, %v2665_v44  ;;  %v2667_v14 = vld [vmem:[%s5037_s30 + $0x460] sm:$0xff]  ;;  %v2668_v45 = vld [vmem:[%s5037_s30 + $0x468] sm:$0xff]  ;;  %v2840_v16 = vadd.f32 %v5821_v60, %v2666_v15 }
 0x3e4   : > { %2967 = vst [vmem:[%s5037_s30 + $0x390] sm:$0xff] %v2815_v18  ;;  %2968 = vst [vmem:[%s5037_s30 + $0x398] sm:$0xff] %v2816_v20  ;;  %v2841_v30 = vadd.f32 %v5815_v59, %v2667_v14  ;;  %v2842_v47 = vadd.f32 %v5817_v23, %v2668_v45  ;;  %v2669_v17 = vld [vmem:[%s5037_s30 + $0x470] sm:$0xff]  ;;  %v2670_v6 = vld [vmem:[%s5037_s30 + $0x478] sm:$0xff] }
 0x3e5   : > { %2969 = vst [vmem:[%s5037_s30 + $0x3a0] sm:$0xff] %v2817_v21  ;;  %2970 = vst [vmem:[%s5037_s30 + $0x3a8] sm:$0xff] %v2818_v31  ;;  %v2671_v5 = vld [vmem:[%s5037_s30 + $0x480] sm:$0xff]  ;;  %v2843_v19 = vadd.f32 %v5819_v10, %v2669_v17  ;;  %v2844_v48 = vadd.f32 %v5821_v60, %v2670_v6  ;;  %v2672_v50 = vld [vmem:[%s5037_s30 + $0x488] sm:$0xff] }
 0x3e6   : > { %2971 = vst [vmem:[%s5037_s30 + $0x3b0] sm:$0xff] %v2819_v32  ;;  %2972 = vst [vmem:[%s5037_s30 + $0x3b8] sm:$0xff] %v2820_v54  ;;  %v2845_v18 = vadd.f32 %v5815_v59, %v2671_v5  ;;  %v2673_v29 = vld [vmem:[%s5037_s30 + $0x490] sm:$0xff]  ;;  %v2674_v49 = vld [vmem:[%s5037_s30 + $0x498] sm:$0xff]  ;;  %v2846_v20 = vadd.f32 %v5817_v23, %v2672_v50 }
 0x3e7   : > { %2973 = vst [vmem:[%s5037_s30 + $0x3c0] sm:$0xff] %v2821_v8  ;;  %2974 = vst [vmem:[%s5037_s30 + $0x3c8] sm:$0xff] %v2822_v34  ;;  %v2847_v21 = vadd.f32 %v5819_v10, %v2673_v29  ;;  %v2848_v31 = vadd.f32 %v5821_v60, %v2674_v49  ;;  %v2675_v7 = vld [vmem:[%s5037_s30 + $0x4a0] sm:$0xff]  ;;  %v2676_v51 = vld [vmem:[%s5037_s30 + $0x4a8] sm:$0xff] }
 0x3e8   : > { %2975 = vst [vmem:[%s5037_s30 + $0x3d0] sm:$0xff] %v2823_v56  ;;  %2976 = vst [vmem:[%s5037_s30 + $0x3d8] sm:$0xff] %v2824_v33  ;;  %v2677_v52 = vld [vmem:[%s5037_s30 + $0x4b0] sm:$0xff]  ;;  %v2849_v32 = vadd.f32 %v5815_v59, %v2675_v7  ;;  %v2850_v54 = vadd.f32 %v5817_v23, %v2676_v51  ;;  %v2678_v13 = vld [vmem:[%s5037_s30 + $0x4b8] sm:$0xff] }
 0x3e9   : > { %2977 = vst [vmem:[%s5037_s30 + $0x3e0] sm:$0xff] %v2825_v35  ;;  %2978 = vst [vmem:[%s5037_s30 + $0x3e8] sm:$0xff] %v2826_v62  ;;  %v2851_v8 = vadd.f32 %v5819_v10, %v2677_v52  ;;  %v2852_v53 = vadd.f32 %v5821_v60, %v2678_v13 }
 0x3ea   : > { %2979 = vst [vmem:[%s5037_s30 + $0x3f0] sm:$0xff] %v2827_v36  ;;  %2980 = vst [vmem:[%s5037_s30 + $0x3f8] sm:$0xff] %v2828_v63 }
 0x3eb   : > { %2981 = vst [vmem:[%s5037_s30 + $0x400] sm:$0xff] %v2829_v37  ;;  %2982 = vst [vmem:[%s5037_s30 + $0x408] sm:$0xff] %v2830_v0 }
 0x3ec   : > { %2983 = vst [vmem:[%s5037_s30 + $0x410] sm:$0xff] %v2831_v39  ;;  %2984 = vst [vmem:[%s5037_s30 + $0x418] sm:$0xff] %v2832_v40 }
 0x3ed   : > { %2985 = vst [vmem:[%s5037_s30 + $0x420] sm:$0xff] %v2833_v4  ;;  %2986 = vst [vmem:[%s5037_s30 + $0x428] sm:$0xff] %v2834_v26 }
 0x3ee   : > { %2987 = vst [vmem:[%s5037_s30 + $0x430] sm:$0xff] %v2835_v25  ;;  %2988 = vst [vmem:[%s5037_s30 + $0x438] sm:$0xff] %v2836_v41 }
 0x3ef   : > { %2989 = vst [vmem:[%s5037_s30 + $0x440] sm:$0xff] %v2837_v28  ;;  %2990 = vst [vmem:[%s5037_s30 + $0x448] sm:$0xff] %v2838_v12 }
 0x3f0   : > { %2991 = vst [vmem:[%s5037_s30 + $0x450] sm:$0xff] %v2839_v46  ;;  %2992 = vst [vmem:[%s5037_s30 + $0x458] sm:$0xff] %v2840_v16 }
 0x3f1   : > { %2993 = vst [vmem:[%s5037_s30 + $0x460] sm:$0xff] %v2841_v30  ;;  %2994 = vst [vmem:[%s5037_s30 + $0x468] sm:$0xff] %v2842_v47 }
 0x3f2   : > { %2995 = vst [vmem:[%s5037_s30 + $0x470] sm:$0xff] %v2843_v19  ;;  %2996 = vst [vmem:[%s5037_s30 + $0x478] sm:$0xff] %v2844_v48 }
 0x3f3   : > { %2997 = vst [vmem:[%s5037_s30 + $0x480] sm:$0xff] %v2845_v18  ;;  %2998 = vst [vmem:[%s5037_s30 + $0x488] sm:$0xff] %v2846_v20 }
 0x3f4   : > { %2999 = vst [vmem:[%s5037_s30 + $0x490] sm:$0xff] %v2847_v21  ;;  %3000 = vst [vmem:[%s5037_s30 + $0x498] sm:$0xff] %v2848_v31 }
 0x3f5   : > { %3001 = vst [vmem:[%s5037_s30 + $0x4a0] sm:$0xff] %v2849_v32  ;;  %3002 = vst [vmem:[%s5037_s30 + $0x4a8] sm:$0xff] %v2850_v54 }
 0x3f6   : > { %3003 = vst [vmem:[%s5037_s30 + $0x4b0] sm:$0xff] %v2851_v8  ;;  %3004 = vst [vmem:[%s5037_s30 + $0x4b8] sm:$0xff] %v2852_v53 }
 0x3f7 PF: > { %s3006_s21 = scalar_lea.sflag [#allocation4], %s4313_s10  ;;  %s6711_s9 = sld [smem:[#allocation21_spill]] }
 0x3fd   : > { %p6712_p4 = scmp.ne.s32.totalorder %s6711_s9, 0 }
 0x3fe   : > { %s6713_s18 = sld [smem:[#allocation15_spill]] (%p6712_p4) }
 0x3ff   : > { %3012 = sbr.rel (!%p6712_p4) target bundleno = 1062 (0x426), region = 60 }
 0x404   : > { %s3195_s4 = sshll.u32 (%p6712_p4), %s6713_s18, 2 }
 0x405   : > { %s3015_s8 = ssub.s32 (%p6712_p4), 5, %s3195_s4 }
 0x406   : > { %p3016_p11 = scmp.lt.s32.totalorder %s3015_s8, 4 }
 0x408   : > { %s6749_s8 = smov (!%p3016_p11, %s3015_s8), 4 }
 0x409   : > { %s6274_s0 = smul.u32 4864, %s6749_s8 }
 0x40b   : > { %s3020_s15 = ssub.s32 19456, %s6274_s0 }
 0x40c   : > { %3021 = vsyncadd %s3006_s21, %s3020_s15  ;;  %p3196_p12 = scmp.ne.s32.totalorder %s6274_s0, 0  ;;  %s3207_s3 = sshll.u32 %s6713_s18, 9 }
 0x40d   : > { %s6714_s12 = sld [smem:[#allocation124_spill]]  ;;  %s3198_s20 = sshll.u32 %s6749_s8, 3 }
 0x40e   : > { %s3029_s11 = sshll.u32 %s5037_s30, 4  ;;  %s3998_s7 = smov [#allocation8]   ;;  %s6288_s11 = int_to_ptr.vmem [resolvable:$true] %s3029_s11 }
 0x40f   : > { %s3833_s28 = scalar_lea.vmem %s6288_s11, %s6274_s0  ;;  %s3837_s5 = sshll.u32 %s3998_s7, 4  ;;  %s3838_s5 = int_to_ptr.vmem [resolvable:$false] %s3837_s5 }
 0x410   : > { %p3834_p5 = scmp.ne.s32.totalorder %s6288_s11, %s3833_s28  ;;  %s3839_s26 = scalar_lea.vmem %s3838_s5, 38912 }
 0x411   : > { %p3840_p7 = scmp.lt.s32.totalorder %s6288_s11, %s3838_s5  ;;  %p3841_p6 = scmp.lt.s32.totalorder %s3839_s26, %s3833_s28 }
 0x412   : > { %p3835_p1 = pnand %p3834_p5, %p3196_p12 }
 0x413   : > { %s6715_s27 = smov %s6714_s12  ;;  %s6284_s29 = scalar_lea.hbm %s6714_s12, %s3207_s3 }
 0x414   : > { %p3836_p2 = pneg %p3835_p1  ;;  %p3842_p9 = por %p3841_p6, %p3840_p7 }
 0x416   : > { %p3843_p3 = pnand %p3842_p9, %p3836_p2 }
 0x418   : > { %3846 = shalt.err (!%p3843_p3)
}
 0x419   : > { %s3847_s30 = scalar_lea.hbm %s6284_s29, %s6274_s0  ;;  %s3851_s4 = scalar_lea.hbm %s6715_s27, 24320 }
 0x41a   : > { %p3848_p8 = scmp.ne.s32.totalorder %s6284_s29, %s3847_s30  ;;  %p3852_p10 = scmp.lt.u32.totalorder %s6284_s29, %s6715_s27 }
 0x41b   : > { %p3853_p4 = scmp.lt.u32.totalorder %s3851_s4, %s3847_s30  ;;  %p3855_p5 = scmp.lt.u32.totalorder %s3847_s30, %s6284_s29 }
 0x41c   : > { %p3849_p13 = pnand %p3848_p8, %p3196_p12 }
 0x41d   : > { %p3854_p11 = por %p3853_p4, %p3852_p10 }
 0x41e   : > { %p3850_p0 = pneg %p3849_p13 }
 0x41f   : > { %p3856_p1 = por %p3855_p5, %p3854_p11 }
 0x421   : > { %p3857_p2 = pnand %p3856_p1, %p3850_p0 }
 0x423   : > { %3860 = shalt.err (!%p3857_p2)
}
 0x424   : > { %s3999_s22 = smov 512   ;;  %s4000_s6 = smov 640  }
 0x425   : > { %3035 = dma.vmem_to_hbm [thread:$0]  (%p3196_p12), %s6288_s11, %s6274_s0, %s6284_s29, %s3006_s21, %s3999_s22, %s4000_s6, %s3198_s20  }
 0x426 PF: > { %s6716_s12 = sld [smem:[#allocation13_spill]]  ;;  %s6717_s28 = sld [smem:[#allocation22_spill]] }
 0x427   : > { %p3628_p7 = scmp.ge.s32.totalorder %s3987_s25, 2 }
 0x42c   : > { %s3044_s7 = sand.u32 1, %s6716_s12   ;;  %p6718_p6 = scmp.ne.s32.totalorder %s6717_s28, 0 }
 0x42d   : > { %s3045_s5 = scalar_lea.sflag [#allocation4], %s3044_s7 }
 0x42e   : > { %p3625_p9 = pnand %p3628_p7, %p6718_p6 }
 0x430   : > { %3930 = dma.done.wait (!%p3625_p9), %s3045_s5, 19456  }
 0x431   : > { %3932 = vsyncadd (!%p3625_p9), %s3045_s5, 4294947840  ;;  %s22_s25 = sadd.s32 1, %s3987_s25   ;;  %s6720_s10 = sld [smem:[#allocation20_spill]] }
 0x432   : > { %p6323_p3 = scmp.ge.s32.totalorder %s22_s25, 6   ;;  %s6721_s21 = sld [smem:[#allocation19_spill]] }
 0x433   : > { %s6722_s8 = sld [smem:[#allocation14_spill]]  ;;  %s6723_s20 = sld [smem:[#allocation18_spill]] }
 0x434   : > { %s6724_s0 = sld [smem:[#allocation16_spill]]  ;;  %s6725_s29 = sld [smem:[#allocation17_spill]] }
 0x435   : > { %s6726_s12 = smov %s3939_s13  ;;  %s6727_s13 = smov %s3943_s14 }
 0x436   : > { %s6729_s15 = smov %s3951_s16  ;;  %s6730_s16 = smov %s3955_s17 }
 0x437   : > { %s6728_s14 = smov %s6720_s10  ;;  %s6732_s18 = smov %s3963_s19 }
 0x438   : > { %s6731_s17 = smov %s6721_s21  ;;  %s6734_s21 = smov %s3979_s23 }
 0x439   : > { %s6733_s19 = smov %s6722_s8  ;;  %s6735_s22 = smov %s3983_s24 }
 0x43a   : > { %s6736_s23 = smov %s6724_s0  ;;  %s6737_s24 = smov %s6725_s29 }
 0x43b   :  { %21 = sbr.rel (!%p6323_p3) target bundleno = 15 (0xf), region = 113 }
 0x442   :  { %3050 = vsyncpa [#allocation3], 1 }
 0x443   :  { %3052 = vsyncpa [#allocation3 + $0x1], 1 }
 0x444   :  { %3053 = vsyncpa [#allocation6], 1 }
 0x445   :  { %3055 = vsyncpa [#allocation6 + $0x1], 1 }
 0x446   :  { %3056 = vsyncpa [#allocation4], 1 }
 0x447   :  { %3058 = vsyncpa [#allocation4 + $0x1], 1 }

</bundles_post_ra>
